<compile_context>
chip_gen: v7x
topology: tpu7x:2x2x1
jax: 0.10.0
libtpu: 0.0.40
codegen_flags: <defaults>
</compile_context>

<pallas_src>
import math
import jax
import jax.numpy as jnp
from jax import lax
from jax.experimental import pallas as pl
from jax.experimental.pallas import tpu as pltpu

EPS = 1e-5


# --------------------------------------------------------------------------
# conv_0 fused kernel
#   stride 1: input = raw x zero-padded to (N, H+2, W+2, Cin)
#   stride 2: input = raw x zero-padded (0,2,0,2) and parity phase-split to
#             (N, 4*Hh, Wh, Cin), xs[n, (p*2+q)*Hh+a, b] = pad(x)[n, 2a+p, 2b+q]
# Outputs: f = relu(bn1(conv0(pad(relu(bn0(x)))))) as (N, Ho*Wo, Cout)
#          res = relu(bn0(x))[::s, ::s] @ shortcut_w          (optional)
# --------------------------------------------------------------------------
def make_conv0(N, H, W, Cin, Cout, *, stride, emit_shortcut):
    if stride == 1:
        Ho, Wo = H, W
        Hin, Win = H + 2, W + 2
    else:
        Ho, Wo = H // 2, W // 2
        Hh, Wh = (H + 2) // 2, (W + 2) // 2
        Hin, Win = 4 * Hh, Wh

    def kernel(*refs):
        i = 0
        x_ref = refs[i]; i += 1
        w_ref = refs[i]; i += 1
        s0_ref, b0_ref = refs[i], refs[i + 1]; i += 2
        s1_ref, b1_ref = refs[i], refs[i + 1]; i += 2
        if emit_shortcut:
            sc_ref = refs[i]; i += 1
        f_ref = refs[i]; i += 1
        if emit_shortcut:
            r_ref = refs[i]

        x = x_ref[0]                                      # (Hin, Win, Cin) f32
        # bn0 + relu prologue (elementwise stays f32: v5e VPU has no bf16 path)
        y = jnp.maximum(x * s0_ref[...] + b0_ref[...], 0.0)
        # re-zero the zero-padding positions: the reference pads AFTER the
        # activation and relu(0*scale + bias) is nonzero in general.
        ri = lax.broadcasted_iota(jnp.int32, (Hin, Win, Cin), 0)
        ci = lax.broadcasted_iota(jnp.int32, (Hin, Win, Cin), 1)
        if stride == 1:
            pad_mask = (ri < 1) | (ri > H) | (ci < 1) | (ci > W)
        else:
            pad_mask = ((ri == Hh - 1) | (ri == 2 * Hh - 1) |
                        (ri == 3 * Hh - 1) | (ri == 4 * Hh - 1) |
                        (ci == Wh - 1))
        y = jnp.where(pad_mask, 0.0, y)

        acc = jnp.zeros((Ho * Wo, Cout), jnp.float32)
        t = 0
        for kh in range(3):
            for kw in range(3):
                if stride == 1:
                    tap = y[kh:kh + Ho, kw:kw + Wo, :]
                else:
                    pq = (kh % 2) * 2 + (kw % 2)
                    r0 = pq * Hh + kh // 2
                    c0 = kw // 2
                    tap = y[r0:r0 + Ho, c0:c0 + Wo, :]
                acc = acc + jnp.dot(
                    tap.reshape(Ho * Wo, Cin).astype(jnp.bfloat16), w_ref[t],
                    preferred_element_type=jnp.float32)
                t += 1
        # bn1 + relu epilogue
        acc = jnp.maximum(acc * s1_ref[...] + b1_ref[...], 0.0)
        f_ref[0] = acc
        if emit_shortcut:
            if stride == 1:
                a_sub = y[1:H + 1, 1:W + 1, :]            # activated x
            else:
                a_sub = y[0:Ho, 0:Wo, :]                  # activated x[::2, ::2]
            r_ref[0] = jnp.dot(
                a_sub.reshape(Ho * Wo, Cin).astype(jnp.bfloat16), sc_ref[...],
                preferred_element_type=jnp.float32)

    in_specs = [pl.BlockSpec((1, Hin, Win, Cin), lambda n: (n, 0, 0, 0)),
                pl.BlockSpec((9, Cin, Cout), lambda n: (0, 0, 0)),
                pl.BlockSpec((1, Cin), lambda n: (0, 0)),
                pl.BlockSpec((1, Cin), lambda n: (0, 0)),
                pl.BlockSpec((1, Cout), lambda n: (0, 0)),
                pl.BlockSpec((1, Cout), lambda n: (0, 0))]
    flat = pl.BlockSpec((1, Ho * Wo, Cout), lambda n: (n, 0, 0))
    fshape = jax.ShapeDtypeStruct((N, Ho * Wo, Cout), jnp.float32)
    if emit_shortcut:
        in_specs.append(pl.BlockSpec((Cin, Cout), lambda n: (0, 0)))
        out_specs, out_shape = (flat, flat), (fshape, fshape)
    else:
        out_specs, out_shape = flat, fshape

    return pl.pallas_call(
        kernel, out_shape=out_shape, grid=(N,),
        in_specs=in_specs, out_specs=out_specs,
        compiler_params=pltpu.CompilerParams(dimension_semantics=("parallel",)))


# --------------------------------------------------------------------------
# conv_1 fused kernel (always 3x3 stride-1 over the already-activated f,
# zero-padded in glue to (H+2, W+2)) with the block tail fused:
#   mode='ini'  : also emit x_kp1 = residual + f_k                (_BlockIni)
#   mode='coes' : also emit x_kp1 = x_k - sum_i c_i * f_km_i      (_Block, no shortcut)
#   mode='plain': f_k only (rare fallback)
# --------------------------------------------------------------------------
def make_conv1(N, H, W, C, *, mode, coefs=None, n_prev=0):
    Hp, Wp = H + 2, W + 2

    def kernel(*refs):
        i = 0
        x_ref = refs[i]; i += 1
        w_ref = refs[i]; i += 1
        if mode == 'ini':
            res_ref = refs[i]; i += 1
        elif mode == 'coes':
            xk_ref = refs[i]; i += 1
            prev_refs = refs[i:i + n_prev]; i += n_prev
        if mode == 'ini':
            f_ref, xo_ref = refs[i], refs[i + 1]
        elif mode == 'coes':
            xo_ref, f_ref = refs[i], refs[i + 1]
        else:
            f_ref = refs[i]

        y = x_ref[0]                                      # (Hp, Wp, C) f32
        acc = jnp.zeros((H * W, C), jnp.float32)
        t = 0
        for kh in range(3):
            for kw in range(3):
                tap = y[kh:kh + H, kw:kw + W, :].reshape(H * W, C)
                acc = acc + jnp.dot(tap.astype(jnp.bfloat16), w_ref[t],
                                    preferred_element_type=jnp.float32)
                t += 1
        if mode == 'ini':
            f_ref[0] = acc
            xo_ref[0] = res_ref[0] + acc
        elif mode == 'coes':
            x_new = xk_ref[0] - coefs[0] * acc            # stepsize = 1.0
            for j in range(n_prev):
                x_new = x_new - coefs[j + 1] * prev_refs[j][0]
            xo_ref[0] = x_new
            f_ref[0] = acc
        else:
            f_ref[0] = acc

    flat = pl.BlockSpec((1, H * W, C), lambda n: (n, 0, 0))
    in_specs = [pl.BlockSpec((1, Hp, Wp, C), lambda n: (n, 0, 0, 0)),
                pl.BlockSpec((9, C, C), lambda n: (0, 0, 0))]
    if mode == 'ini':
        in_specs.append(flat)
        n_out = 2
    elif mode == 'coes':
        in_specs += [flat] * (1 + n_prev)
        n_out = 2
    else:
        n_out = 1
    fshape = jax.ShapeDtypeStruct((N, H * W, C), jnp.float32)
    return pl.pallas_call(
        kernel,
        out_shape=tuple([fshape] * n_out) if n_out > 1 else fshape,
        grid=(N,),
        in_specs=in_specs,
        out_specs=tuple([flat] * n_out) if n_out > 1 else flat,
        compiler_params=pltpu.CompilerParams(dimension_semantics=("parallel",)))


# 1x1 convolution (rare _Block-with-shortcut fallback) == plain pixel GEMM.
def _matmul_kernel(a_ref, b_ref, o_ref):
    o_ref[...] = jnp.dot(a_ref[...].astype(jnp.bfloat16), b_ref[...],
                         preferred_element_type=jnp.float32)


def conv1x1(x, w_bf16):
    """x: [N,H,W,Cin] f32 (already stride-subsampled), w: [Cin,Cout] bf16."""
    N, H, W, Cin = x.shape
    Cout = w_bf16.shape[1]
    M = N * H * W
    A = x.reshape(M, Cin)
    Mp = ((M + 7) // 8) * 8
    if Mp != M:
        A = jnp.pad(A, ((0, Mp - M), (0, 0)))
    TM = Mp
    for t in (512, 256, 128, 64, 32, 16, 8):
        if Mp % t == 0 and Mp // t >= 2:
            TM = t
            break
    out = pl.pallas_call(
        _matmul_kernel,
        out_shape=jax.ShapeDtypeStruct((Mp, Cout), jnp.float32),
        grid=(Mp // TM,),
        in_specs=[pl.BlockSpec((TM, Cin), lambda i: (i, 0)),
                  pl.BlockSpec((Cin, Cout), lambda i: (0, 0))],
        out_specs=pl.BlockSpec((TM, Cout), lambda i: (i, 0)),
        compiler_params=pltpu.CompilerParams(dimension_semantics=("parallel",)),
    )(A, w_bf16)
    return out[:M].reshape(N, H, W, Cout)


# --------------------------------------------------------------------------
# glue helpers
# --------------------------------------------------------------------------
def phase_split_raw(x):
    """[N,H,W,C] -> [N,4*Hh,Wh,C] with xs[n,(p*2+q)*Hh+a,b] = pad(x)[n,2a+p,2b+q];
    the bottom/right zero pad of 2 covers F.pad(v,(0,1,0,1)) of a stride-2 conv."""
    N, H, W, C = x.shape
    assert H % 2 == 0 and W % 2 == 0
    Hh, Wh = (H + 2) // 2, (W + 2) // 2
    xp = jnp.pad(x, ((0, 0), (0, 2), (0, 2), (0, 0)))
    xs = xp.reshape(N, Hh, 2, Wh, 2, C).transpose(0, 2, 4, 1, 3, 5)
    return xs.reshape(N, 4 * Hh, Wh, C)


def run_conv0(x, bp, sc_w):
    """One fused pallas_call: relu(bn1(conv_0(pad(relu(bn0(x)))))) and, when
    sc_w is given, the 1x1 shortcut on the activated stride-subsampled input."""
    N, H, W, Cin = x.shape
    Cout = bp['out_planes']
    stride = bp['stride']
    Ho, Wo = H // stride, W // stride
    s0, b0 = bp['bn0']
    s1, b1 = bp['bn1']
    xin = phase_split_raw(x) if stride == 2 else \
        jnp.pad(x, ((0, 0), (1, 1), (1, 1), (0, 0)))
    conv = make_conv0(N, H, W, Cin, Cout, stride=stride,
                      emit_shortcut=sc_w is not None)
    args = [xin, bp['conv0_w'], s0.reshape(1, Cin), b0.reshape(1, Cin),
            s1.reshape(1, Cout), b1.reshape(1, Cout)]
    if sc_w is not None:
        f, res = conv(*args, sc_w)
        return f.reshape(N, Ho, Wo, Cout), res.reshape(N, Ho, Wo, Cout)
    f = conv(*args)
    return f.reshape(N, Ho, Wo, Cout), None


# --------------------------------------------------------------------------
# block forward passes (match _BlockIni / _Block semantics)
# --------------------------------------------------------------------------
def block_ini_fwd(x_and_f, bp):
    x_in = x_and_f[0]
    N = x_in.shape[0]
    Cout = bp['out_planes']
    f, res = run_conv0(x_in, bp, bp.get('shortcut_w'))
    _, Ho, Wo, _ = f.shape
    if res is None:
        res = x_in                                   # no shortcut: raw x_k
    fp = jnp.pad(f, ((0, 0), (1, 1), (1, 1), (0, 0)))
    conv1 = make_conv1(N, Ho, Wo, Cout, mode='ini')
    f_k, x_kp1 = conv1(fp, bp['conv1_w'], res.reshape(N, Ho * Wo, Cout))
    f_k = f_k.reshape(N, Ho, Wo, Cout)
    x_kp1 = x_kp1.reshape(N, Ho, Wo, Cout)
    return [x_kp1, f_k] + x_and_f[1:]


def block_coes_fwd(x_and_f, bp):
    x_in = x_and_f[0]
    N = x_in.shape[0]
    Cout = bp['out_planes']
    ncoes = len(bp['coes'])
    stride = bp['stride']
    has_sc = bp['has_shortcut']
    sc_w0 = bp['shortcut_ws'][0] if has_sc else None
    f, res = run_conv0(x_in, bp, sc_w0)
    _, Ho, Wo, _ = f.shape
    fp = jnp.pad(f, ((0, 0), (1, 1), (1, 1), (0, 0)))

    if not has_sc:
        # fully fused tail: conv_1 also emits x_kp1 = x_k - sum_i c_i * f_km_i.
        # TODO(synk): Mask=True (per-pixel coesB of shape (H,W)) would need a
        # (1,H,W,1) broadcast operand instead of baked scalar coefficients.
        prev = [x_and_f[i].reshape(N, Ho * Wo, Cout) for i in range(1, ncoes)]
        conv1 = make_conv1(N, Ho, Wo, Cout, mode='coes',
                           coefs=bp['coes'], n_prev=ncoes - 1)
        x_kp1, f_k = conv1(fp, bp['conv1_w'],
                           x_in.reshape(N, Ho * Wo, Cout), *prev)
        x_kp1 = x_kp1.reshape(N, Ho, Wo, Cout)
        f_k = f_k.reshape(N, Ho, Wo, Cout)
        f_km = [f_k] + [x_and_f[i] for i in range(1, ncoes)]
        return [x_kp1] + f_km[:ncoes - 1]

    # rare fallback: channel-changing _Block with per-coefficient shortcuts.
    # TODO(synk): these 1x1 convs act on different tensors, so they stay as
    # separate small GEMMs + an XLA combination pass.
    conv1 = make_conv1(N, Ho, Wo, Cout, mode='plain')
    f_k = conv1(fp, bp['conv1_w']).reshape(N, Ho, Wo, Cout)
    f_km = [f_k] + [x_and_f[i] for i in range(1, ncoes)]
    for i in range(ncoes - 1):
        v = f_km[i]
        if stride == 2:
            v = v[:, ::2, ::2, :]
        f_km[i] = conv1x1(v, bp['shortcut_ws'][i + 1])
    x_kp1 = res
    for i in range(ncoes):
        x_kp1 = x_kp1 - bp['coes'][i] * f_km[i]
    return [x_kp1] + f_km[:ncoes - 1]


def block_group_forward(x_nchw, params):
    """_BlockGroup.forward: run the block chain and return only x_and_f[0]."""
    x = jnp.transpose(x_nchw, (0, 2, 3, 1)).astype(jnp.float32)   # NCHW -> NHWC
    x_and_f = [x]
    for bp in params['blocks']:
        if bp['kind'] == 'ini':
            x_and_f = block_ini_fwd(x_and_f, bp)
        else:
            x_and_f = block_coes_fwd(x_and_f, bp)
    return jnp.transpose(x_and_f[0], (0, 3, 1, 2))                # NHWC -> NCHW


# --------------------------------------------------------------------------
# parameters
# --------------------------------------------------------------------------
def _conv3x3_weight(key, cin, cout):
    n = 3 * 3 * cout
    w = jax.random.normal(key, (3, 3, cin, cout), jnp.float32) * math.sqrt(2.0 / n)
    return w.reshape(9, cin, cout).astype(jnp.bfloat16)   # tap-major bf16 MXU operand


def _conv1x1_weight(key, cin, cout):
    w = jax.random.normal(key, (cin, cout), jnp.float32) * math.sqrt(2.0 / cout)
    return w.astype(jnp.bfloat16)


def _bn_params(c):
    gamma = jnp.ones((c,), jnp.float32)
    beta = jnp.zeros((c,), jnp.float32)
    mean = jnp.zeros((c,), jnp.float32)
    var = jnp.ones((c,), jnp.float32)
    scale = gamma / jnp.sqrt(var + EPS)
    bias = beta - mean * scale
    return scale, bias


def make_block_group_params(key, num_blocks, nb_ini_block, in_planes, out_planes,
                            stride, coesB=(0.0, 0.0, 0.0)):
    keys = iter(jax.random.split(key, 8 * num_blocks + 8))
    blocks = []
    for i in range(num_blocks):
        bin_planes = in_planes if i == 0 else out_planes
        bstride = stride if i == 0 else 1
        has_shortcut = bin_planes != out_planes
        bp = {
            'kind': 'ini' if i < nb_ini_block else 'coes',
            'stride': bstride,
            'has_shortcut': has_shortcut,
            'in_planes': bin_planes,
            'out_planes': out_planes,
            'bn0': _bn_params(bin_planes),
            'conv0_w': _conv3x3_weight(next(keys), bin_planes, out_planes),
            'bn1': _bn_params(out_planes),
            'conv1_w': _conv3x3_weight(next(keys), out_planes, out_planes),
        }
        if bp['kind'] == 'ini':
            if has_shortcut:
                bp['shortcut_w'] = _conv1x1_weight(next(keys), bin_planes, out_planes)
        else:
            bp['coes'] = tuple(float(c) for c in coesB)   # Mask=False, learn=False
            if has_shortcut:
                bp['shortcut_ws'] = [_conv1x1_weight(next(keys), bin_planes, out_planes)
                                     for _ in range(len(coesB))]
        blocks.append(bp)
    return {'blocks': blocks}


if __name__ == "__main__":
    key = jax.random.PRNGKey(0)
    pkey, xkey = jax.random.split(key)
    # One WideResNet_learn _BlockGroup: 3 blocks (2 x _BlockIni + 1 x _Block),
    # in_planes=4 -> out_planes=8, stride=2, coesB=(0,0,0), Mask=False, eval BN.
    params = make_block_group_params(pkey, num_blocks=3, nb_ini_block=2,
                                     in_planes=4, out_planes=8, stride=2,
                                     coesB=(0.0, 0.0, 0.0))
    x = jax.random.uniform(xkey, (2, 4, 16, 16), dtype=jnp.float32)   # NCHW input
    fwd = jax.jit(lambda xx: block_group_forward(xx, params))
    out = fwd(x)
    jax.block_until_ready(out)
    assert out.shape == (2, 8, 8, 8) and out.dtype == jnp.float32
    print("KERNEL_OK")
</pallas_src>

<mosaic_0001>
module attributes {stable_mosaic.version = 11 : i64} {
  func.func @kernel(%arg0: i32, %arg1: memref<1x36x9x4xf32, #tpu.memory_space<vmem>>, %arg2: memref<9x4x8xbf16, #tpu.memory_space<vmem>>, %arg3: memref<1x4xf32, #tpu.memory_space<vmem>>, %arg4: memref<1x4xf32, #tpu.memory_space<vmem>>, %arg5: memref<1x8xf32, #tpu.memory_space<vmem>>, %arg6: memref<1x8xf32, #tpu.memory_space<vmem>>, %arg7: memref<4x8xbf16, #tpu.memory_space<vmem>>, %arg8: memref<1x64x8xf32, #tpu.memory_space<vmem>>, %arg9: memref<1x64x8xf32, #tpu.memory_space<vmem>>) attributes {dimension_semantics = [#tpu.dimension_semantics<parallel>], iteration_bounds = array<i64: 2>, scalar_prefetch = 0 : i64, scratch_operands = 0 : i64, tpu.core_type = #tpu.core_type<tc>, window_params = [{transform_indices = @transform_0, window_bounds = array<i64: 1, 36, 9, 4>}, {pipeline_mode = #tpu.pipeline_mode<synchronous>, transform_indices = @transform_1, window_bounds = array<i64: 9, 4, 8>}, {pipeline_mode = #tpu.pipeline_mode<synchronous>, transform_indices = @transform_2, window_bounds = array<i64: 1, 4>}, {pipeline_mode = #tpu.pipeline_mode<synchronous>, transform_indices = @transform_3, window_bounds = array<i64: 1, 4>}, {pipeline_mode = #tpu.pipeline_mode<synchronous>, transform_indices = @transform_4, window_bounds = array<i64: 1, 8>}, {pipeline_mode = #tpu.pipeline_mode<synchronous>, transform_indices = @transform_5, window_bounds = array<i64: 1, 8>}, {pipeline_mode = #tpu.pipeline_mode<synchronous>, transform_indices = @transform_6, window_bounds = array<i64: 4, 8>}, {transform_indices = @transform_7, window_bounds = array<i64: 1, 64, 8>}, {transform_indices = @transform_8, window_bounds = array<i64: 1, 64, 8>}]} {
    %c0 = arith.constant 0 : index
    %c0_0 = arith.constant 0 : index
    %c0_1 = arith.constant 0 : index
    %c0_2 = arith.constant 0 : index
    %0 = vector.load %arg1[%c0, %c0_0, %c0_1, %c0_2] : memref<1x36x9x4xf32, #tpu.memory_space<vmem>>, vector<1x36x9x4xf32>
    %1 = vector.shape_cast %0 : vector<1x36x9x4xf32> to vector<36x9x4xf32>
    %c0_3 = arith.constant 0 : index
    %c0_4 = arith.constant 0 : index
    %2 = vector.load %arg3[%c0_3, %c0_4] : memref<1x4xf32, #tpu.memory_space<vmem>>, vector<1x4xf32>
    %3 = vector.shape_cast %2 : vector<1x4xf32> to vector<1x1x4xf32>
    %4 = vector.broadcast %3 : vector<1x1x4xf32> to vector<36x9x4xf32>
    %5 = arith.mulf %1, %4 : vector<36x9x4xf32>
    %c0_5 = arith.constant 0 : index
    %c0_6 = arith.constant 0 : index
    %6 = vector.load %arg4[%c0_5, %c0_6] : memref<1x4xf32, #tpu.memory_space<vmem>>, vector<1x4xf32>
    %7 = vector.shape_cast %6 : vector<1x4xf32> to vector<1x1x4xf32>
    %8 = vector.broadcast %7 : vector<1x1x4xf32> to vector<36x9x4xf32>
    %9 = arith.addf %5, %8 : vector<36x9x4xf32>
    %cst = arith.constant 0.000000e+00 : f32
    %10 = vector.broadcast %cst : f32 to vector<36x9x4xf32>
    %11 = arith.maximumf %9, %10 : vector<36x9x4xf32>
    %12 = tpu.iota {dimensions = array<i32: 0>} : vector<36x9x4xi32>
    %13 = tpu.iota {dimensions = array<i32: 1>} : vector<36x9x4xi32>
    %c8_i32 = arith.constant 8 : i32
    %14 = vector.broadcast %c8_i32 : i32 to vector<36x9x4xi32>
    %15 = arith.cmpi eq, %12, %14 : vector<36x9x4xi32>
    %c17_i32 = arith.constant 17 : i32
    %16 = vector.broadcast %c17_i32 : i32 to vector<36x9x4xi32>
    %17 = arith.cmpi eq, %12, %16 : vector<36x9x4xi32>
    %18 = arith.ori %15, %17 : vector<36x9x4xi1>
    %c26_i32 = arith.constant 26 : i32
    %19 = vector.broadcast %c26_i32 : i32 to vector<36x9x4xi32>
    %20 = arith.cmpi eq, %12, %19 : vector<36x9x4xi32>
    %21 = arith.ori %18, %20 : vector<36x9x4xi1>
    %c35_i32 = arith.constant 35 : i32
    %22 = vector.broadcast %c35_i32 : i32 to vector<36x9x4xi32>
    %23 = arith.cmpi eq, %12, %22 : vector<36x9x4xi32>
    %24 = arith.ori %21, %23 : vector<36x9x4xi1>
    %c8_i32_7 = arith.constant 8 : i32
    %25 = vector.broadcast %c8_i32_7 : i32 to vector<36x9x4xi32>
    %26 = arith.cmpi eq, %13, %25 : vector<36x9x4xi32>
    %27 = arith.ori %24, %26 : vector<36x9x4xi1>
    %cst_8 = arith.constant 0.000000e+00 : f32
    %28 = vector.broadcast %cst_8 : f32 to vector<36x9x4xf32>
    %29 = arith.select %27, %28, %11 : vector<36x9x4xi1>, vector<36x9x4xf32>
    %cst_9 = arith.constant 0.000000e+00 : f32
    %30 = vector.broadcast %cst_9 : f32 to vector<64x8xf32>
    %31 = vector.extract_strided_slice %29 {offsets = [0, 0, 0], sizes = [8, 8, 4], strides = [1, 1, 1]} : vector<36x9x4xf32> to vector<8x8x4xf32>
    %32 = vector.shape_cast %31 : vector<8x8x4xf32> to vector<64x4xf32>
    %33 = arith.truncf %32 : vector<64x4xf32> to vector<64x4xbf16>
    %c0_10 = arith.constant 0 : index
    %c0_11 = arith.constant 0 : index
    %c0_12 = arith.constant 0 : index
    %34 = vector.load %arg2[%c0_10, %c0_11, %c0_12] : memref<9x4x8xbf16, #tpu.memory_space<vmem>>, vector<1x4x8xbf16>
    %35 = vector.shape_cast %34 : vector<1x4x8xbf16> to vector<4x8xbf16>
    %cst_13 = arith.constant dense<0.000000e+00> : vector<64x8xf32>
    %36 = tpu.matmul %33, %35, %cst_13 {dimension_numbers = #tpu.dot_dimension_numbers<[1], [0], [0], [1], [0, 0, 1, 1], [], []>} : vector<64x4xbf16>, vector<4x8xbf16>, vector<64x8xf32> -> vector<64x8xf32>
    %37 = arith.addf %30, %36 : vector<64x8xf32>
    %38 = vector.extract_strided_slice %29 {offsets = [9, 0, 0], sizes = [8, 8, 4], strides = [1, 1, 1]} : vector<36x9x4xf32> to vector<8x8x4xf32>
    %39 = vector.shape_cast %38 : vector<8x8x4xf32> to vector<64x4xf32>
    %40 = arith.truncf %39 : vector<64x4xf32> to vector<64x4xbf16>
    %c1 = arith.constant 1 : index
    %c0_14 = arith.constant 0 : index
    %c0_15 = arith.constant 0 : index
    %41 = vector.load %arg2[%c1, %c0_14, %c0_15] : memref<9x4x8xbf16, #tpu.memory_space<vmem>>, vector<1x4x8xbf16>
    %42 = vector.shape_cast %41 : vector<1x4x8xbf16> to vector<4x8xbf16>
    %cst_16 = arith.constant dense<0.000000e+00> : vector<64x8xf32>
    %43 = tpu.matmul %40, %42, %cst_16 {dimension_numbers = #tpu.dot_dimension_numbers<[1], [0], [0], [1], [0, 0, 1, 1], [], []>} : vector<64x4xbf16>, vector<4x8xbf16>, vector<64x8xf32> -> vector<64x8xf32>
    %44 = arith.addf %37, %43 : vector<64x8xf32>
    %45 = vector.extract_strided_slice %29 {offsets = [0, 1, 0], sizes = [8, 8, 4], strides = [1, 1, 1]} : vector<36x9x4xf32> to vector<8x8x4xf32>
    %46 = vector.shape_cast %45 : vector<8x8x4xf32> to vector<64x4xf32>
    %47 = arith.truncf %46 : vector<64x4xf32> to vector<64x4xbf16>
    %c2 = arith.constant 2 : index
    %c0_17 = arith.constant 0 : index
    %c0_18 = arith.constant 0 : index
    %48 = vector.load %arg2[%c2, %c0_17, %c0_18] : memref<9x4x8xbf16, #tpu.memory_space<vmem>>, vector<1x4x8xbf16>
    %49 = vector.shape_cast %48 : vector<1x4x8xbf16> to vector<4x8xbf16>
    %cst_19 = arith.constant dense<0.000000e+00> : vector<64x8xf32>
    %50 = tpu.matmul %47, %49, %cst_19 {dimension_numbers = #tpu.dot_dimension_numbers<[1], [0], [0], [1], [0, 0, 1, 1], [], []>} : vector<64x4xbf16>, vector<4x8xbf16>, vector<64x8xf32> -> vector<64x8xf32>
    %51 = arith.addf %44, %50 : vector<64x8xf32>
    %52 = vector.extract_strided_slice %29 {offsets = [18, 0, 0], sizes = [8, 8, 4], strides = [1, 1, 1]} : vector<36x9x4xf32> to vector<8x8x4xf32>
    %53 = vector.shape_cast %52 : vector<8x8x4xf32> to vector<64x4xf32>
    %54 = arith.truncf %53 : vector<64x4xf32> to vector<64x4xbf16>
    %c3 = arith.constant 3 : index
    %c0_20 = arith.constant 0 : index
    %c0_21 = arith.constant 0 : index
    %55 = vector.load %arg2[%c3, %c0_20, %c0_21] : memref<9x4x8xbf16, #tpu.memory_space<vmem>>, vector<1x4x8xbf16>
    %56 = vector.shape_cast %55 : vector<1x4x8xbf16> to vector<4x8xbf16>
    %cst_22 = arith.constant dense<0.000000e+00> : vector<64x8xf32>
    %57 = tpu.matmul %54, %56, %cst_22 {dimension_numbers = #tpu.dot_dimension_numbers<[1], [0], [0], [1], [0, 0, 1, 1], [], []>} : vector<64x4xbf16>, vector<4x8xbf16>, vector<64x8xf32> -> vector<64x8xf32>
    %58 = arith.addf %51, %57 : vector<64x8xf32>
    %59 = vector.extract_strided_slice %29 {offsets = [27, 0, 0], sizes = [8, 8, 4], strides = [1, 1, 1]} : vector<36x9x4xf32> to vector<8x8x4xf32>
    %60 = vector.shape_cast %59 : vector<8x8x4xf32> to vector<64x4xf32>
    %61 = arith.truncf %60 : vector<64x4xf32> to vector<64x4xbf16>
    %c4 = arith.constant 4 : index
    %c0_23 = arith.constant 0 : index
    %c0_24 = arith.constant 0 : index
    %62 = vector.load %arg2[%c4, %c0_23, %c0_24] : memref<9x4x8xbf16, #tpu.memory_space<vmem>>, vector<1x4x8xbf16>
    %63 = vector.shape_cast %62 : vector<1x4x8xbf16> to vector<4x8xbf16>
    %cst_25 = arith.constant dense<0.000000e+00> : vector<64x8xf32>
    %64 = tpu.matmul %61, %63, %cst_25 {dimension_numbers = #tpu.dot_dimension_numbers<[1], [0], [0], [1], [0, 0, 1, 1], [], []>} : vector<64x4xbf16>, vector<4x8xbf16>, vector<64x8xf32> -> vector<64x8xf32>
    %65 = arith.addf %58, %64 : vector<64x8xf32>
    %66 = vector.extract_strided_slice %29 {offsets = [18, 1, 0], sizes = [8, 8, 4], strides = [1, 1, 1]} : vector<36x9x4xf32> to vector<8x8x4xf32>
    %67 = vector.shape_cast %66 : vector<8x8x4xf32> to vector<64x4xf32>
    %68 = arith.truncf %67 : vector<64x4xf32> to vector<64x4xbf16>
    %c5 = arith.constant 5 : index
    %c0_26 = arith.constant 0 : index
    %c0_27 = arith.constant 0 : index
    %69 = vector.load %arg2[%c5, %c0_26, %c0_27] : memref<9x4x8xbf16, #tpu.memory_space<vmem>>, vector<1x4x8xbf16>
    %70 = vector.shape_cast %69 : vector<1x4x8xbf16> to vector<4x8xbf16>
    %cst_28 = arith.constant dense<0.000000e+00> : vector<64x8xf32>
    %71 = tpu.matmul %68, %70, %cst_28 {dimension_numbers = #tpu.dot_dimension_numbers<[1], [0], [0], [1], [0, 0, 1, 1], [], []>} : vector<64x4xbf16>, vector<4x8xbf16>, vector<64x8xf32> -> vector<64x8xf32>
    %72 = arith.addf %65, %71 : vector<64x8xf32>
    %73 = vector.extract_strided_slice %29 {offsets = [1, 0, 0], sizes = [8, 8, 4], strides = [1, 1, 1]} : vector<36x9x4xf32> to vector<8x8x4xf32>
    %74 = vector.shape_cast %73 : vector<8x8x4xf32> to vector<64x4xf32>
    %75 = arith.truncf %74 : vector<64x4xf32> to vector<64x4xbf16>
    %c6 = arith.constant 6 : index
    %c0_29 = arith.constant 0 : index
    %c0_30 = arith.constant 0 : index
    %76 = vector.load %arg2[%c6, %c0_29, %c0_30] : memref<9x4x8xbf16, #tpu.memory_space<vmem>>, vector<1x4x8xbf16>
    %77 = vector.shape_cast %76 : vector<1x4x8xbf16> to vector<4x8xbf16>
    %cst_31 = arith.constant dense<0.000000e+00> : vector<64x8xf32>
    %78 = tpu.matmul %75, %77, %cst_31 {dimension_numbers = #tpu.dot_dimension_numbers<[1], [0], [0], [1], [0, 0, 1, 1], [], []>} : vector<64x4xbf16>, vector<4x8xbf16>, vector<64x8xf32> -> vector<64x8xf32>
    %79 = arith.addf %72, %78 : vector<64x8xf32>
    %80 = vector.extract_strided_slice %29 {offsets = [10, 0, 0], sizes = [8, 8, 4], strides = [1, 1, 1]} : vector<36x9x4xf32> to vector<8x8x4xf32>
    %81 = vector.shape_cast %80 : vector<8x8x4xf32> to vector<64x4xf32>
    %82 = arith.truncf %81 : vector<64x4xf32> to vector<64x4xbf16>
    %c7 = arith.constant 7 : index
    %c0_32 = arith.constant 0 : index
    %c0_33 = arith.constant 0 : index
    %83 = vector.load %arg2[%c7, %c0_32, %c0_33] : memref<9x4x8xbf16, #tpu.memory_space<vmem>>, vector<1x4x8xbf16>
    %84 = vector.shape_cast %83 : vector<1x4x8xbf16> to vector<4x8xbf16>
    %cst_34 = arith.constant dense<0.000000e+00> : vector<64x8xf32>
    %85 = tpu.matmul %82, %84, %cst_34 {dimension_numbers = #tpu.dot_dimension_numbers<[1], [0], [0], [1], [0, 0, 1, 1], [], []>} : vector<64x4xbf16>, vector<4x8xbf16>, vector<64x8xf32> -> vector<64x8xf32>
    %86 = arith.addf %79, %85 : vector<64x8xf32>
    %87 = vector.extract_strided_slice %29 {offsets = [1, 1, 0], sizes = [8, 8, 4], strides = [1, 1, 1]} : vector<36x9x4xf32> to vector<8x8x4xf32>
    %88 = vector.shape_cast %87 : vector<8x8x4xf32> to vector<64x4xf32>
    %89 = arith.truncf %88 : vector<64x4xf32> to vector<64x4xbf16>
    %c8 = arith.constant 8 : index
    %c0_35 = arith.constant 0 : index
    %c0_36 = arith.constant 0 : index
    %90 = vector.load %arg2[%c8, %c0_35, %c0_36] : memref<9x4x8xbf16, #tpu.memory_space<vmem>>, vector<1x4x8xbf16>
    %91 = vector.shape_cast %90 : vector<1x4x8xbf16> to vector<4x8xbf16>
    %cst_37 = arith.constant dense<0.000000e+00> : vector<64x8xf32>
    %92 = tpu.matmul %89, %91, %cst_37 {dimension_numbers = #tpu.dot_dimension_numbers<[1], [0], [0], [1], [0, 0, 1, 1], [], []>} : vector<64x4xbf16>, vector<4x8xbf16>, vector<64x8xf32> -> vector<64x8xf32>
    %93 = arith.addf %86, %92 : vector<64x8xf32>
    %c0_38 = arith.constant 0 : index
    %c0_39 = arith.constant 0 : index
    %94 = vector.load %arg5[%c0_38, %c0_39] : memref<1x8xf32, #tpu.memory_space<vmem>>, vector<1x8xf32>
    %95 = vector.broadcast %94 : vector<1x8xf32> to vector<64x8xf32>
    %96 = arith.mulf %93, %95 : vector<64x8xf32>
    %c0_40 = arith.constant 0 : index
    %c0_41 = arith.constant 0 : index
    %97 = vector.load %arg6[%c0_40, %c0_41] : memref<1x8xf32, #tpu.memory_space<vmem>>, vector<1x8xf32>
    %98 = vector.broadcast %97 : vector<1x8xf32> to vector<64x8xf32>
    %99 = arith.addf %96, %98 : vector<64x8xf32>
    %cst_42 = arith.constant 0.000000e+00 : f32
    %100 = vector.broadcast %cst_42 : f32 to vector<64x8xf32>
    %101 = arith.maximumf %99, %100 : vector<64x8xf32>
    %c0_43 = arith.constant 0 : index
    %c0_44 = arith.constant 0 : index
    %c0_45 = arith.constant 0 : index
    %102 = vector.load %arg8[%c0_43, %c0_44, %c0_45] : memref<1x64x8xf32, #tpu.memory_space<vmem>>, vector<1x64x8xf32>
    %103 = vector.shape_cast %102 : vector<1x64x8xf32> to vector<64x8xf32>
    %104 = vector.shape_cast %101 : vector<64x8xf32> to vector<1x64x8xf32>
    tpu.vector_store %arg8[%c0_43, %c0_44, %c0_45], %104 {strides = array<i32>} : memref<1x64x8xf32, #tpu.memory_space<vmem>>, vector<1x64x8xf32>,
    %105 = vector.extract_strided_slice %29 {offsets = [0, 0, 0], sizes = [8, 8, 4], strides = [1, 1, 1]} : vector<36x9x4xf32> to vector<8x8x4xf32>
    %106 = vector.shape_cast %105 : vector<8x8x4xf32> to vector<64x4xf32>
    %107 = arith.truncf %106 : vector<64x4xf32> to vector<64x4xbf16>
    %c0_46 = arith.constant 0 : index
    %c0_47 = arith.constant 0 : index
    %108 = vector.load %arg7[%c0_46, %c0_47] : memref<4x8xbf16, #tpu.memory_space<vmem>>, vector<4x8xbf16>
    %cst_48 = arith.constant dense<0.000000e+00> : vector<64x8xf32>
    %109 = tpu.matmul %107, %108, %cst_48 {dimension_numbers = #tpu.dot_dimension_numbers<[1], [0], [0], [1], [0, 0, 1, 1], [], []>} : vector<64x4xbf16>, vector<4x8xbf16>, vector<64x8xf32> -> vector<64x8xf32>
    %c0_49 = arith.constant 0 : index
    %c0_50 = arith.constant 0 : index
    %c0_51 = arith.constant 0 : index
    %110 = vector.load %arg9[%c0_49, %c0_50, %c0_51] : memref<1x64x8xf32, #tpu.memory_space<vmem>>, vector<1x64x8xf32>
    %111 = vector.shape_cast %110 : vector<1x64x8xf32> to vector<64x8xf32>
    %112 = vector.shape_cast %109 : vector<64x8xf32> to vector<1x64x8xf32>
    tpu.vector_store %arg9[%c0_49, %c0_50, %c0_51], %112 {strides = array<i32>} : memref<1x64x8xf32, #tpu.memory_space<vmem>>, vector<1x64x8xf32>,
    return
  }
  func.func @transform_0(%arg0: i32) -> (i32, i32, i32, i32) {
    %c0_i32 = arith.constant 0 : i32
    %c0_i32_0 = arith.constant 0 : i32
    %c0_i32_1 = arith.constant 0 : i32
    %c0_i32_2 = arith.constant 0 : i32
    return %arg0, %c0_i32, %c0_i32_0, %c0_i32_1 : i32, i32, i32, i32
  }
  func.func @transform_1(%arg0: i32) -> (i32, i32, i32) {
    %c0_i32 = arith.constant 0 : i32
    %c0_i32_0 = arith.constant 0 : i32
    %c0_i32_1 = arith.constant 0 : i32
    %c0_i32_2 = arith.constant 0 : i32
    return %c0_i32, %c0_i32_0, %c0_i32_1 : i32, i32, i32
  }
  func.func @transform_2(%arg0: i32) -> (i32, i32) {
    %c0_i32 = arith.constant 0 : i32
    %c0_i32_0 = arith.constant 0 : i32
    %c0_i32_1 = arith.constant 0 : i32
    return %c0_i32, %c0_i32_0 : i32, i32
  }
  func.func @transform_3(%arg0: i32) -> (i32, i32) {
    %c0_i32 = arith.constant 0 : i32
    %c0_i32_0 = arith.constant 0 : i32
    %c0_i32_1 = arith.constant 0 : i32
    return %c0_i32, %c0_i32_0 : i32, i32
  }
  func.func @transform_4(%arg0: i32) -> (i32, i32) {
    %c0_i32 = arith.constant 0 : i32
    %c0_i32_0 = arith.constant 0 : i32
    %c0_i32_1 = arith.constant 0 : i32
    return %c0_i32, %c0_i32_0 : i32, i32
  }
  func.func @transform_5(%arg0: i32) -> (i32, i32) {
    %c0_i32 = arith.constant 0 : i32
    %c0_i32_0 = arith.constant 0 : i32
    %c0_i32_1 = arith.constant 0 : i32
    return %c0_i32, %c0_i32_0 : i32, i32
  }
  func.func @transform_6(%arg0: i32) -> (i32, i32) {
    %c0_i32 = arith.constant 0 : i32
    %c0_i32_0 = arith.constant 0 : i32
    %c0_i32_1 = arith.constant 0 : i32
    return %c0_i32, %c0_i32_0 : i32, i32
  }
  func.func @transform_7(%arg0: i32) -> (i32, i32, i32) {
    %c0_i32 = arith.constant 0 : i32
    %c0_i32_0 = arith.constant 0 : i32
    %c0_i32_1 = arith.constant 0 : i32
    return %arg0, %c0_i32, %c0_i32_0 : i32, i32, i32
  }
  func.func @transform_8(%arg0: i32) -> (i32, i32, i32) {
    %c0_i32 = arith.constant 0 : i32
    %c0_i32_0 = arith.constant 0 : i32
    %c0_i32_1 = arith.constant 0 : i32
    return %arg0, %c0_i32, %c0_i32_0 : i32, i32, i32
  }
}

module attributes {stable_mosaic.version = 11 : i64} {
  func.func @kernel(%arg0: i32, %arg1: memref<1x10x10x8xf32, #tpu.memory_space<vmem>>, %arg2: memref<9x8x8xbf16, #tpu.memory_space<vmem>>, %arg3: memref<1x64x8xf32, #tpu.memory_space<vmem>>, %arg4: memref<1x64x8xf32, #tpu.memory_space<vmem>>, %arg5: memref<1x64x8xf32, #tpu.memory_space<vmem>>) attributes {dimension_semantics = [#tpu.dimension_semantics<parallel>], iteration_bounds = array<i64: 2>, scalar_prefetch = 0 : i64, scratch_operands = 0 : i64, tpu.core_type = #tpu.core_type<tc>, window_params = [{transform_indices = @transform_0, window_bounds = array<i64: 1, 10, 10, 8>}, {pipeline_mode = #tpu.pipeline_mode<synchronous>, transform_indices = @transform_1, window_bounds = array<i64: 9, 8, 8>}, {transform_indices = @transform_2, window_bounds = array<i64: 1, 64, 8>}, {transform_indices = @transform_3, window_bounds = array<i64: 1, 64, 8>}, {transform_indices = @transform_4, window_bounds = array<i64: 1, 64, 8>}]} {
    %c0 = arith.constant 0 : index
    %c0_0 = arith.constant 0 : index
    %c0_1 = arith.constant 0 : index
    %c0_2 = arith.constant 0 : index
    %0 = vector.load %arg1[%c0, %c0_0, %c0_1, %c0_2] : memref<1x10x10x8xf32, #tpu.memory_space<vmem>>, vector<1x10x10x8xf32>
    %1 = vector.shape_cast %0 : vector<1x10x10x8xf32> to vector<10x10x8xf32>
    %cst = arith.constant 0.000000e+00 : f32
    %2 = vector.broadcast %cst : f32 to vector<64x8xf32>
    %3 = vector.extract_strided_slice %1 {offsets = [0, 0, 0], sizes = [8, 8, 8], strides = [1, 1, 1]} : vector<10x10x8xf32> to vector<8x8x8xf32>
    %4 = vector.shape_cast %3 : vector<8x8x8xf32> to vector<64x8xf32>
    %5 = arith.truncf %4 : vector<64x8xf32> to vector<64x8xbf16>
    %c0_3 = arith.constant 0 : index
    %c0_4 = arith.constant 0 : index
    %c0_5 = arith.constant 0 : index
    %6 = vector.load %arg2[%c0_3, %c0_4, %c0_5] : memref<9x8x8xbf16, #tpu.memory_space<vmem>>, vector<1x8x8xbf16>
    %7 = vector.shape_cast %6 : vector<1x8x8xbf16> to vector<8x8xbf16>
    %cst_6 = arith.constant dense<0.000000e+00> : vector<64x8xf32>
    %8 = tpu.matmul %5, %7, %cst_6 {dimension_numbers = #tpu.dot_dimension_numbers<[1], [0], [0], [1], [0, 0, 1, 1], [], []>} : vector<64x8xbf16>, vector<8x8xbf16>, vector<64x8xf32> -> vector<64x8xf32>
    %9 = arith.addf %2, %8 : vector<64x8xf32>
    %10 = vector.extract_strided_slice %1 {offsets = [0, 1, 0], sizes = [8, 8, 8], strides = [1, 1, 1]} : vector<10x10x8xf32> to vector<8x8x8xf32>
    %11 = vector.shape_cast %10 : vector<8x8x8xf32> to vector<64x8xf32>
    %12 = arith.truncf %11 : vector<64x8xf32> to vector<64x8xbf16>
    %c1 = arith.constant 1 : index
    %c0_7 = arith.constant 0 : index
    %c0_8 = arith.constant 0 : index
    %13 = vector.load %arg2[%c1, %c0_7, %c0_8] : memref<9x8x8xbf16, #tpu.memory_space<vmem>>, vector<1x8x8xbf16>
    %14 = vector.shape_cast %13 : vector<1x8x8xbf16> to vector<8x8xbf16>
    %cst_9 = arith.constant dense<0.000000e+00> : vector<64x8xf32>
    %15 = tpu.matmul %12, %14, %cst_9 {dimension_numbers = #tpu.dot_dimension_numbers<[1], [0], [0], [1], [0, 0, 1, 1], [], []>} : vector<64x8xbf16>, vector<8x8xbf16>, vector<64x8xf32> -> vector<64x8xf32>
    %16 = arith.addf %9, %15 : vector<64x8xf32>
    %17 = vector.extract_strided_slice %1 {offsets = [0, 2, 0], sizes = [8, 8, 8], strides = [1, 1, 1]} : vector<10x10x8xf32> to vector<8x8x8xf32>
    %18 = vector.shape_cast %17 : vector<8x8x8xf32> to vector<64x8xf32>
    %19 = arith.truncf %18 : vector<64x8xf32> to vector<64x8xbf16>
    %c2 = arith.constant 2 : index
    %c0_10 = arith.constant 0 : index
    %c0_11 = arith.constant 0 : index
    %20 = vector.load %arg2[%c2, %c0_10, %c0_11] : memref<9x8x8xbf16, #tpu.memory_space<vmem>>, vector<1x8x8xbf16>
    %21 = vector.shape_cast %20 : vector<1x8x8xbf16> to vector<8x8xbf16>
    %cst_12 = arith.constant dense<0.000000e+00> : vector<64x8xf32>
    %22 = tpu.matmul %19, %21, %cst_12 {dimension_numbers = #tpu.dot_dimension_numbers<[1], [0], [0], [1], [0, 0, 1, 1], [], []>} : vector<64x8xbf16>, vector<8x8xbf16>, vector<64x8xf32> -> vector<64x8xf32>
    %23 = arith.addf %16, %22 : vector<64x8xf32>
    %24 = vector.extract_strided_slice %1 {offsets = [1, 0, 0], sizes = [8, 8, 8], strides = [1, 1, 1]} : vector<10x10x8xf32> to vector<8x8x8xf32>
    %25 = vector.shape_cast %24 : vector<8x8x8xf32> to vector<64x8xf32>
    %26 = arith.truncf %25 : vector<64x8xf32> to vector<64x8xbf16>
    %c3 = arith.constant 3 : index
    %c0_13 = arith.constant 0 : index
    %c0_14 = arith.constant 0 : index
    %27 = vector.load %arg2[%c3, %c0_13, %c0_14] : memref<9x8x8xbf16, #tpu.memory_space<vmem>>, vector<1x8x8xbf16>
    %28 = vector.shape_cast %27 : vector<1x8x8xbf16> to vector<8x8xbf16>
    %cst_15 = arith.constant dense<0.000000e+00> : vector<64x8xf32>
    %29 = tpu.matmul %26, %28, %cst_15 {dimension_numbers = #tpu.dot_dimension_numbers<[1], [0], [0], [1], [0, 0, 1, 1], [], []>} : vector<64x8xbf16>, vector<8x8xbf16>, vector<64x8xf32> -> vector<64x8xf32>
    %30 = arith.addf %23, %29 : vector<64x8xf32>
    %31 = vector.extract_strided_slice %1 {offsets = [1, 1, 0], sizes = [8, 8, 8], strides = [1, 1, 1]} : vector<10x10x8xf32> to vector<8x8x8xf32>
    %32 = vector.shape_cast %31 : vector<8x8x8xf32> to vector<64x8xf32>
    %33 = arith.truncf %32 : vector<64x8xf32> to vector<64x8xbf16>
    %c4 = arith.constant 4 : index
    %c0_16 = arith.constant 0 : index
    %c0_17 = arith.constant 0 : index
    %34 = vector.load %arg2[%c4, %c0_16, %c0_17] : memref<9x8x8xbf16, #tpu.memory_space<vmem>>, vector<1x8x8xbf16>
    %35 = vector.shape_cast %34 : vector<1x8x8xbf16> to vector<8x8xbf16>
    %cst_18 = arith.constant dense<0.000000e+00> : vector<64x8xf32>
    %36 = tpu.matmul %33, %35, %cst_18 {dimension_numbers = #tpu.dot_dimension_numbers<[1], [0], [0], [1], [0, 0, 1, 1], [], []>} : vector<64x8xbf16>, vector<8x8xbf16>, vector<64x8xf32> -> vector<64x8xf32>
    %37 = arith.addf %30, %36 : vector<64x8xf32>
    %38 = vector.extract_strided_slice %1 {offsets = [1, 2, 0], sizes = [8, 8, 8], strides = [1, 1, 1]} : vector<10x10x8xf32> to vector<8x8x8xf32>
    %39 = vector.shape_cast %38 : vector<8x8x8xf32> to vector<64x8xf32>
    %40 = arith.truncf %39 : vector<64x8xf32> to vector<64x8xbf16>
    %c5 = arith.constant 5 : index
    %c0_19 = arith.constant 0 : index
    %c0_20 = arith.constant 0 : index
    %41 = vector.load %arg2[%c5, %c0_19, %c0_20] : memref<9x8x8xbf16, #tpu.memory_space<vmem>>, vector<1x8x8xbf16>
    %42 = vector.shape_cast %41 : vector<1x8x8xbf16> to vector<8x8xbf16>
    %cst_21 = arith.constant dense<0.000000e+00> : vector<64x8xf32>
    %43 = tpu.matmul %40, %42, %cst_21 {dimension_numbers = #tpu.dot_dimension_numbers<[1], [0], [0], [1], [0, 0, 1, 1], [], []>} : vector<64x8xbf16>, vector<8x8xbf16>, vector<64x8xf32> -> vector<64x8xf32>
    %44 = arith.addf %37, %43 : vector<64x8xf32>
    %45 = vector.extract_strided_slice %1 {offsets = [2, 0, 0], sizes = [8, 8, 8], strides = [1, 1, 1]} : vector<10x10x8xf32> to vector<8x8x8xf32>
    %46 = vector.shape_cast %45 : vector<8x8x8xf32> to vector<64x8xf32>
    %47 = arith.truncf %46 : vector<64x8xf32> to vector<64x8xbf16>
    %c6 = arith.constant 6 : index
    %c0_22 = arith.constant 0 : index
    %c0_23 = arith.constant 0 : index
    %48 = vector.load %arg2[%c6, %c0_22, %c0_23] : memref<9x8x8xbf16, #tpu.memory_space<vmem>>, vector<1x8x8xbf16>
    %49 = vector.shape_cast %48 : vector<1x8x8xbf16> to vector<8x8xbf16>
    %cst_24 = arith.constant dense<0.000000e+00> : vector<64x8xf32>
    %50 = tpu.matmul %47, %49, %cst_24 {dimension_numbers = #tpu.dot_dimension_numbers<[1], [0], [0], [1], [0, 0, 1, 1], [], []>} : vector<64x8xbf16>, vector<8x8xbf16>, vector<64x8xf32> -> vector<64x8xf32>
    %51 = arith.addf %44, %50 : vector<64x8xf32>
    %52 = vector.extract_strided_slice %1 {offsets = [2, 1, 0], sizes = [8, 8, 8], strides = [1, 1, 1]} : vector<10x10x8xf32> to vector<8x8x8xf32>
    %53 = vector.shape_cast %52 : vector<8x8x8xf32> to vector<64x8xf32>
    %54 = arith.truncf %53 : vector<64x8xf32> to vector<64x8xbf16>
    %c7 = arith.constant 7 : index
    %c0_25 = arith.constant 0 : index
    %c0_26 = arith.constant 0 : index
    %55 = vector.load %arg2[%c7, %c0_25, %c0_26] : memref<9x8x8xbf16, #tpu.memory_space<vmem>>, vector<1x8x8xbf16>
    %56 = vector.shape_cast %55 : vector<1x8x8xbf16> to vector<8x8xbf16>
    %cst_27 = arith.constant dense<0.000000e+00> : vector<64x8xf32>
    %57 = tpu.matmul %54, %56, %cst_27 {dimension_numbers = #tpu.dot_dimension_numbers<[1], [0], [0], [1], [0, 0, 1, 1], [], []>} : vector<64x8xbf16>, vector<8x8xbf16>, vector<64x8xf32> -> vector<64x8xf32>
    %58 = arith.addf %51, %57 : vector<64x8xf32>
    %59 = vector.extract_strided_slice %1 {offsets = [2, 2, 0], sizes = [8, 8, 8], strides = [1, 1, 1]} : vector<10x10x8xf32> to vector<8x8x8xf32>
    %60 = vector.shape_cast %59 : vector<8x8x8xf32> to vector<64x8xf32>
    %61 = arith.truncf %60 : vector<64x8xf32> to vector<64x8xbf16>
    %c8 = arith.constant 8 : index
    %c0_28 = arith.constant 0 : index
    %c0_29 = arith.constant 0 : index
    %62 = vector.load %arg2[%c8, %c0_28, %c0_29] : memref<9x8x8xbf16, #tpu.memory_space<vmem>>, vector<1x8x8xbf16>
    %63 = vector.shape_cast %62 : vector<1x8x8xbf16> to vector<8x8xbf16>
    %cst_30 = arith.constant dense<0.000000e+00> : vector<64x8xf32>
    %64 = tpu.matmul %61, %63, %cst_30 {dimension_numbers = #tpu.dot_dimension_numbers<[1], [0], [0], [1], [0, 0, 1, 1], [], []>} : vector<64x8xbf16>, vector<8x8xbf16>, vector<64x8xf32> -> vector<64x8xf32>
    %65 = arith.addf %58, %64 : vector<64x8xf32>
    %c0_31 = arith.constant 0 : index
    %c0_32 = arith.constant 0 : index
    %c0_33 = arith.constant 0 : index
    %66 = vector.load %arg4[%c0_31, %c0_32, %c0_33] : memref<1x64x8xf32, #tpu.memory_space<vmem>>, vector<1x64x8xf32>
    %67 = vector.shape_cast %66 : vector<1x64x8xf32> to vector<64x8xf32>
    %68 = vector.shape_cast %65 : vector<64x8xf32> to vector<1x64x8xf32>
    tpu.vector_store %arg4[%c0_31, %c0_32, %c0_33], %68 {strides = array<i32>} : memref<1x64x8xf32, #tpu.memory_space<vmem>>, vector<1x64x8xf32>,
    %c0_34 = arith.constant 0 : index
    %c0_35 = arith.constant 0 : index
    %c0_36 = arith.constant 0 : index
    %69 = vector.load %arg3[%c0_34, %c0_35, %c0_36] : memref<1x64x8xf32, #tpu.memory_space<vmem>>, vector<1x64x8xf32>
    %70 = vector.shape_cast %69 : vector<1x64x8xf32> to vector<64x8xf32>
    %71 = arith.addf %70, %65 : vector<64x8xf32>
    %c0_37 = arith.constant 0 : index
    %c0_38 = arith.constant 0 : index
    %c0_39 = arith.constant 0 : index
    %72 = vector.load %arg5[%c0_37, %c0_38, %c0_39] : memref<1x64x8xf32, #tpu.memory_space<vmem>>, vector<1x64x8xf32>
    %73 = vector.shape_cast %72 : vector<1x64x8xf32> to vector<64x8xf32>
    %74 = vector.shape_cast %71 : vector<64x8xf32> to vector<1x64x8xf32>
    tpu.vector_store %arg5[%c0_37, %c0_38, %c0_39], %74 {strides = array<i32>} : memref<1x64x8xf32, #tpu.memory_space<vmem>>, vector<1x64x8xf32>,
    return
  }
  func.func @transform_0(%arg0: i32) -> (i32, i32, i32, i32) {
    %c0_i32 = arith.constant 0 : i32
    %c0_i32_0 = arith.constant 0 : i32
    %c0_i32_1 = arith.constant 0 : i32
    %c0_i32_2 = arith.constant 0 : i32
    return %arg0, %c0_i32, %c0_i32_0, %c0_i32_1 : i32, i32, i32, i32
  }
  func.func @transform_1(%arg0: i32) -> (i32, i32, i32) {
    %c0_i32 = arith.constant 0 : i32
    %c0_i32_0 = arith.constant 0 : i32
    %c0_i32_1 = arith.constant 0 : i32
    %c0_i32_2 = arith.constant 0 : i32
    return %c0_i32, %c0_i32_0, %c0_i32_1 : i32, i32, i32
  }
  func.func @transform_2(%arg0: i32) -> (i32, i32, i32) {
    %c0_i32 = arith.constant 0 : i32
    %c0_i32_0 = arith.constant 0 : i32
    %c0_i32_1 = arith.constant 0 : i32
    return %arg0, %c0_i32, %c0_i32_0 : i32, i32, i32
  }
  func.func @transform_3(%arg0: i32) -> (i32, i32, i32) {
    %c0_i32 = arith.constant 0 : i32
    %c0_i32_0 = arith.constant 0 : i32
    %c0_i32_1 = arith.constant 0 : i32
    return %arg0, %c0_i32, %c0_i32_0 : i32, i32, i32
  }
  func.func @transform_4(%arg0: i32) -> (i32, i32, i32) {
    %c0_i32 = arith.constant 0 : i32
    %c0_i32_0 = arith.constant 0 : i32
    %c0_i32_1 = arith.constant 0 : i32
    return %arg0, %c0_i32, %c0_i32_0 : i32, i32, i32
  }
}

module attributes {stable_mosaic.version = 11 : i64} {
  func.func @kernel(%arg0: i32, %arg1: memref<1x10x10x8xf32, #tpu.memory_space<vmem>>, %arg2: memref<9x8x8xbf16, #tpu.memory_space<vmem>>, %arg3: memref<1x8xf32, #tpu.memory_space<vmem>>, %arg4: memref<1x8xf32, #tpu.memory_space<vmem>>, %arg5: memref<1x8xf32, #tpu.memory_space<vmem>>, %arg6: memref<1x8xf32, #tpu.memory_space<vmem>>, %arg7: memref<1x64x8xf32, #tpu.memory_space<vmem>>) attributes {dimension_semantics = [#tpu.dimension_semantics<parallel>], iteration_bounds = array<i64: 2>, scalar_prefetch = 0 : i64, scratch_operands = 0 : i64, tpu.core_type = #tpu.core_type<tc>, window_params = [{transform_indices = @transform_0, window_bounds = array<i64: 1, 10, 10, 8>}, {pipeline_mode = #tpu.pipeline_mode<synchronous>, transform_indices = @transform_1, window_bounds = array<i64: 9, 8, 8>}, {pipeline_mode = #tpu.pipeline_mode<synchronous>, transform_indices = @transform_2, window_bounds = array<i64: 1, 8>}, {pipeline_mode = #tpu.pipeline_mode<synchronous>, transform_indices = @transform_3, window_bounds = array<i64: 1, 8>}, {pipeline_mode = #tpu.pipeline_mode<synchronous>, transform_indices = @transform_4, window_bounds = array<i64: 1, 8>}, {pipeline_mode = #tpu.pipeline_mode<synchronous>, transform_indices = @transform_5, window_bounds = array<i64: 1, 8>}, {transform_indices = @transform_6, window_bounds = array<i64: 1, 64, 8>}]} {
    %c0 = arith.constant 0 : index
    %c0_0 = arith.constant 0 : index
    %c0_1 = arith.constant 0 : index
    %c0_2 = arith.constant 0 : index
    %0 = vector.load %arg1[%c0, %c0_0, %c0_1, %c0_2] : memref<1x10x10x8xf32, #tpu.memory_space<vmem>>, vector<1x10x10x8xf32>
    %1 = vector.shape_cast %0 : vector<1x10x10x8xf32> to vector<10x10x8xf32>
    %c0_3 = arith.constant 0 : index
    %c0_4 = arith.constant 0 : index
    %2 = vector.load %arg3[%c0_3, %c0_4] : memref<1x8xf32, #tpu.memory_space<vmem>>, vector<1x8xf32>
    %3 = vector.shape_cast %2 : vector<1x8xf32> to vector<1x1x8xf32>
    %4 = vector.broadcast %3 : vector<1x1x8xf32> to vector<10x10x8xf32>
    %5 = arith.mulf %1, %4 : vector<10x10x8xf32>
    %c0_5 = arith.constant 0 : index
    %c0_6 = arith.constant 0 : index
    %6 = vector.load %arg4[%c0_5, %c0_6] : memref<1x8xf32, #tpu.memory_space<vmem>>, vector<1x8xf32>
    %7 = vector.shape_cast %6 : vector<1x8xf32> to vector<1x1x8xf32>
    %8 = vector.broadcast %7 : vector<1x1x8xf32> to vector<10x10x8xf32>
    %9 = arith.addf %5, %8 : vector<10x10x8xf32>
    %cst = arith.constant 0.000000e+00 : f32
    %10 = vector.broadcast %cst : f32 to vector<10x10x8xf32>
    %11 = arith.maximumf %9, %10 : vector<10x10x8xf32>
    %12 = tpu.iota {dimensions = array<i32: 0>} : vector<10x10x8xi32>
    %13 = tpu.iota {dimensions = array<i32: 1>} : vector<10x10x8xi32>
    %c1_i32 = arith.constant 1 : i32
    %14 = vector.broadcast %c1_i32 : i32 to vector<10x10x8xi32>
    %15 = arith.cmpi slt, %12, %14 : vector<10x10x8xi32>
    %c8_i32 = arith.constant 8 : i32
    %16 = vector.broadcast %c8_i32 : i32 to vector<10x10x8xi32>
    %17 = arith.cmpi sgt, %12, %16 : vector<10x10x8xi32>
    %18 = arith.ori %15, %17 : vector<10x10x8xi1>
    %c1_i32_7 = arith.constant 1 : i32
    %19 = vector.broadcast %c1_i32_7 : i32 to vector<10x10x8xi32>
    %20 = arith.cmpi slt, %13, %19 : vector<10x10x8xi32>
    %21 = arith.ori %18, %20 : vector<10x10x8xi1>
    %c8_i32_8 = arith.constant 8 : i32
    %22 = vector.broadcast %c8_i32_8 : i32 to vector<10x10x8xi32>
    %23 = arith.cmpi sgt, %13, %22 : vector<10x10x8xi32>
    %24 = arith.ori %21, %23 : vector<10x10x8xi1>
    %cst_9 = arith.constant 0.000000e+00 : f32
    %25 = vector.broadcast %cst_9 : f32 to vector<10x10x8xf32>
    %26 = arith.select %24, %25, %11 : vector<10x10x8xi1>, vector<10x10x8xf32>
    %cst_10 = arith.constant 0.000000e+00 : f32
    %27 = vector.broadcast %cst_10 : f32 to vector<64x8xf32>
    %28 = vector.extract_strided_slice %26 {offsets = [0, 0, 0], sizes = [8, 8, 8], strides = [1, 1, 1]} : vector<10x10x8xf32> to vector<8x8x8xf32>
    %29 = vector.shape_cast %28 : vector<8x8x8xf32> to vector<64x8xf32>
    %30 = arith.truncf %29 : vector<64x8xf32> to vector<64x8xbf16>
    %c0_11 = arith.constant 0 : index
    %c0_12 = arith.constant 0 : index
    %c0_13 = arith.constant 0 : index
    %31 = vector.load %arg2[%c0_11, %c0_12, %c0_13] : memref<9x8x8xbf16, #tpu.memory_space<vmem>>, vector<1x8x8xbf16>
    %32 = vector.shape_cast %31 : vector<1x8x8xbf16> to vector<8x8xbf16>
    %cst_14 = arith.constant dense<0.000000e+00> : vector<64x8xf32>
    %33 = tpu.matmul %30, %32, %cst_14 {dimension_numbers = #tpu.dot_dimension_numbers<[1], [0], [0], [1], [0, 0, 1, 1], [], []>} : vector<64x8xbf16>, vector<8x8xbf16>, vector<64x8xf32> -> vector<64x8xf32>
    %34 = arith.addf %27, %33 : vector<64x8xf32>
    %35 = vector.extract_strided_slice %26 {offsets = [0, 1, 0], sizes = [8, 8, 8], strides = [1, 1, 1]} : vector<10x10x8xf32> to vector<8x8x8xf32>
    %36 = vector.shape_cast %35 : vector<8x8x8xf32> to vector<64x8xf32>
    %37 = arith.truncf %36 : vector<64x8xf32> to vector<64x8xbf16>
    %c1 = arith.constant 1 : index
    %c0_15 = arith.constant 0 : index
    %c0_16 = arith.constant 0 : index
    %38 = vector.load %arg2[%c1, %c0_15, %c0_16] : memref<9x8x8xbf16, #tpu.memory_space<vmem>>, vector<1x8x8xbf16>
    %39 = vector.shape_cast %38 : vector<1x8x8xbf16> to vector<8x8xbf16>
    %cst_17 = arith.constant dense<0.000000e+00> : vector<64x8xf32>
    %40 = tpu.matmul %37, %39, %cst_17 {dimension_numbers = #tpu.dot_dimension_numbers<[1], [0], [0], [1], [0, 0, 1, 1], [], []>} : vector<64x8xbf16>, vector<8x8xbf16>, vector<64x8xf32> -> vector<64x8xf32>
    %41 = arith.addf %34, %40 : vector<64x8xf32>
    %42 = vector.extract_strided_slice %26 {offsets = [0, 2, 0], sizes = [8, 8, 8], strides = [1, 1, 1]} : vector<10x10x8xf32> to vector<8x8x8xf32>
    %43 = vector.shape_cast %42 : vector<8x8x8xf32> to vector<64x8xf32>
    %44 = arith.truncf %43 : vector<64x8xf32> to vector<64x8xbf16>
    %c2 = arith.constant 2 : index
    %c0_18 = arith.constant 0 : index
    %c0_19 = arith.constant 0 : index
    %45 = vector.load %arg2[%c2, %c0_18, %c0_19] : memref<9x8x8xbf16, #tpu.memory_space<vmem>>, vector<1x8x8xbf16>
    %46 = vector.shape_cast %45 : vector<1x8x8xbf16> to vector<8x8xbf16>
    %cst_20 = arith.constant dense<0.000000e+00> : vector<64x8xf32>
    %47 = tpu.matmul %44, %46, %cst_20 {dimension_numbers = #tpu.dot_dimension_numbers<[1], [0], [0], [1], [0, 0, 1, 1], [], []>} : vector<64x8xbf16>, vector<8x8xbf16>, vector<64x8xf32> -> vector<64x8xf32>
    %48 = arith.addf %41, %47 : vector<64x8xf32>
    %49 = vector.extract_strided_slice %26 {offsets = [1, 0, 0], sizes = [8, 8, 8], strides = [1, 1, 1]} : vector<10x10x8xf32> to vector<8x8x8xf32>
    %50 = vector.shape_cast %49 : vector<8x8x8xf32> to vector<64x8xf32>
    %51 = arith.truncf %50 : vector<64x8xf32> to vector<64x8xbf16>
    %c3 = arith.constant 3 : index
    %c0_21 = arith.constant 0 : index
    %c0_22 = arith.constant 0 : index
    %52 = vector.load %arg2[%c3, %c0_21, %c0_22] : memref<9x8x8xbf16, #tpu.memory_space<vmem>>, vector<1x8x8xbf16>
    %53 = vector.shape_cast %52 : vector<1x8x8xbf16> to vector<8x8xbf16>
    %cst_23 = arith.constant dense<0.000000e+00> : vector<64x8xf32>
    %54 = tpu.matmul %51, %53, %cst_23 {dimension_numbers = #tpu.dot_dimension_numbers<[1], [0], [0], [1], [0, 0, 1, 1], [], []>} : vector<64x8xbf16>, vector<8x8xbf16>, vector<64x8xf32> -> vector<64x8xf32>
    %55 = arith.addf %48, %54 : vector<64x8xf32>
    %56 = vector.extract_strided_slice %26 {offsets = [1, 1, 0], sizes = [8, 8, 8], strides = [1, 1, 1]} : vector<10x10x8xf32> to vector<8x8x8xf32>
    %57 = vector.shape_cast %56 : vector<8x8x8xf32> to vector<64x8xf32>
    %58 = arith.truncf %57 : vector<64x8xf32> to vector<64x8xbf16>
    %c4 = arith.constant 4 : index
    %c0_24 = arith.constant 0 : index
    %c0_25 = arith.constant 0 : index
    %59 = vector.load %arg2[%c4, %c0_24, %c0_25] : memref<9x8x8xbf16, #tpu.memory_space<vmem>>, vector<1x8x8xbf16>
    %60 = vector.shape_cast %59 : vector<1x8x8xbf16> to vector<8x8xbf16>
    %cst_26 = arith.constant dense<0.000000e+00> : vector<64x8xf32>
    %61 = tpu.matmul %58, %60, %cst_26 {dimension_numbers = #tpu.dot_dimension_numbers<[1], [0], [0], [1], [0, 0, 1, 1], [], []>} : vector<64x8xbf16>, vector<8x8xbf16>, vector<64x8xf32> -> vector<64x8xf32>
    %62 = arith.addf %55, %61 : vector<64x8xf32>
    %63 = vector.extract_strided_slice %26 {offsets = [1, 2, 0], sizes = [8, 8, 8], strides = [1, 1, 1]} : vector<10x10x8xf32> to vector<8x8x8xf32>
    %64 = vector.shape_cast %63 : vector<8x8x8xf32> to vector<64x8xf32>
    %65 = arith.truncf %64 : vector<64x8xf32> to vector<64x8xbf16>
    %c5 = arith.constant 5 : index
    %c0_27 = arith.constant 0 : index
    %c0_28 = arith.constant 0 : index
    %66 = vector.load %arg2[%c5, %c0_27, %c0_28] : memref<9x8x8xbf16, #tpu.memory_space<vmem>>, vector<1x8x8xbf16>
    %67 = vector.shape_cast %66 : vector<1x8x8xbf16> to vector<8x8xbf16>
    %cst_29 = arith.constant dense<0.000000e+00> : vector<64x8xf32>
    %68 = tpu.matmul %65, %67, %cst_29 {dimension_numbers = #tpu.dot_dimension_numbers<[1], [0], [0], [1], [0, 0, 1, 1], [], []>} : vector<64x8xbf16>, vector<8x8xbf16>, vector<64x8xf32> -> vector<64x8xf32>
    %69 = arith.addf %62, %68 : vector<64x8xf32>
    %70 = vector.extract_strided_slice %26 {offsets = [2, 0, 0], sizes = [8, 8, 8], strides = [1, 1, 1]} : vector<10x10x8xf32> to vector<8x8x8xf32>
    %71 = vector.shape_cast %70 : vector<8x8x8xf32> to vector<64x8xf32>
    %72 = arith.truncf %71 : vector<64x8xf32> to vector<64x8xbf16>
    %c6 = arith.constant 6 : index
    %c0_30 = arith.constant 0 : index
    %c0_31 = arith.constant 0 : index
    %73 = vector.load %arg2[%c6, %c0_30, %c0_31] : memref<9x8x8xbf16, #tpu.memory_space<vmem>>, vector<1x8x8xbf16>
    %74 = vector.shape_cast %73 : vector<1x8x8xbf16> to vector<8x8xbf16>
    %cst_32 = arith.constant dense<0.000000e+00> : vector<64x8xf32>
    %75 = tpu.matmul %72, %74, %cst_32 {dimension_numbers = #tpu.dot_dimension_numbers<[1], [0], [0], [1], [0, 0, 1, 1], [], []>} : vector<64x8xbf16>, vector<8x8xbf16>, vector<64x8xf32> -> vector<64x8xf32>
    %76 = arith.addf %69, %75 : vector<64x8xf32>
    %77 = vector.extract_strided_slice %26 {offsets = [2, 1, 0], sizes = [8, 8, 8], strides = [1, 1, 1]} : vector<10x10x8xf32> to vector<8x8x8xf32>
    %78 = vector.shape_cast %77 : vector<8x8x8xf32> to vector<64x8xf32>
    %79 = arith.truncf %78 : vector<64x8xf32> to vector<64x8xbf16>
    %c7 = arith.constant 7 : index
    %c0_33 = arith.constant 0 : index
    %c0_34 = arith.constant 0 : index
    %80 = vector.load %arg2[%c7, %c0_33, %c0_34] : memref<9x8x8xbf16, #tpu.memory_space<vmem>>, vector<1x8x8xbf16>
    %81 = vector.shape_cast %80 : vector<1x8x8xbf16> to vector<8x8xbf16>
    %cst_35 = arith.constant dense<0.000000e+00> : vector<64x8xf32>
    %82 = tpu.matmul %79, %81, %cst_35 {dimension_numbers = #tpu.dot_dimension_numbers<[1], [0], [0], [1], [0, 0, 1, 1], [], []>} : vector<64x8xbf16>, vector<8x8xbf16>, vector<64x8xf32> -> vector<64x8xf32>
    %83 = arith.addf %76, %82 : vector<64x8xf32>
    %84 = vector.extract_strided_slice %26 {offsets = [2, 2, 0], sizes = [8, 8, 8], strides = [1, 1, 1]} : vector<10x10x8xf32> to vector<8x8x8xf32>
    %85 = vector.shape_cast %84 : vector<8x8x8xf32> to vector<64x8xf32>
    %86 = arith.truncf %85 : vector<64x8xf32> to vector<64x8xbf16>
    %c8 = arith.constant 8 : index
    %c0_36 = arith.constant 0 : index
    %c0_37 = arith.constant 0 : index
    %87 = vector.load %arg2[%c8, %c0_36, %c0_37] : memref<9x8x8xbf16, #tpu.memory_space<vmem>>, vector<1x8x8xbf16>
    %88 = vector.shape_cast %87 : vector<1x8x8xbf16> to vector<8x8xbf16>
    %cst_38 = arith.constant dense<0.000000e+00> : vector<64x8xf32>
    %89 = tpu.matmul %86, %88, %cst_38 {dimension_numbers = #tpu.dot_dimension_numbers<[1], [0], [0], [1], [0, 0, 1, 1], [], []>} : vector<64x8xbf16>, vector<8x8xbf16>, vector<64x8xf32> -> vector<64x8xf32>
    %90 = arith.addf %83, %89 : vector<64x8xf32>
    %c0_39 = arith.constant 0 : index
    %c0_40 = arith.constant 0 : index
    %91 = vector.load %arg5[%c0_39, %c0_40] : memref<1x8xf32, #tpu.memory_space<vmem>>, vector<1x8xf32>
    %92 = vector.broadcast %91 : vector<1x8xf32> to vector<64x8xf32>
    %93 = arith.mulf %90, %92 : vector<64x8xf32>
    %c0_41 = arith.constant 0 : index
    %c0_42 = arith.constant 0 : index
    %94 = vector.load %arg6[%c0_41, %c0_42] : memref<1x8xf32, #tpu.memory_space<vmem>>, vector<1x8xf32>
    %95 = vector.broadcast %94 : vector<1x8xf32> to vector<64x8xf32>
    %96 = arith.addf %93, %95 : vector<64x8xf32>
    %cst_43 = arith.constant 0.000000e+00 : f32
    %97 = vector.broadcast %cst_43 : f32 to vector<64x8xf32>
    %98 = arith.maximumf %96, %97 : vector<64x8xf32>
    %c0_44 = arith.constant 0 : index
    %c0_45 = arith.constant 0 : index
    %c0_46 = arith.constant 0 : index
    %99 = vector.load %arg7[%c0_44, %c0_45, %c0_46] : memref<1x64x8xf32, #tpu.memory_space<vmem>>, vector<1x64x8xf32>
    %100 = vector.shape_cast %99 : vector<1x64x8xf32> to vector<64x8xf32>
    %101 = vector.shape_cast %98 : vector<64x8xf32> to vector<1x64x8xf32>
    tpu.vector_store %arg7[%c0_44, %c0_45, %c0_46], %101 {strides = array<i32>} : memref<1x64x8xf32, #tpu.memory_space<vmem>>, vector<1x64x8xf32>,
    return
  }
  func.func @transform_0(%arg0: i32) -> (i32, i32, i32, i32) {
    %c0_i32 = arith.constant 0 : i32
    %c0_i32_0 = arith.constant 0 : i32
    %c0_i32_1 = arith.constant 0 : i32
    %c0_i32_2 = arith.constant 0 : i32
    return %arg0, %c0_i32, %c0_i32_0, %c0_i32_1 : i32, i32, i32, i32
  }
  func.func @transform_1(%arg0: i32) -> (i32, i32, i32) {
    %c0_i32 = arith.constant 0 : i32
    %c0_i32_0 = arith.constant 0 : i32
    %c0_i32_1 = arith.constant 0 : i32
    %c0_i32_2 = arith.constant 0 : i32
    return %c0_i32, %c0_i32_0, %c0_i32_1 : i32, i32, i32
  }
  func.func @transform_2(%arg0: i32) -> (i32, i32) {
    %c0_i32 = arith.constant 0 : i32
    %c0_i32_0 = arith.constant 0 : i32
    %c0_i32_1 = arith.constant 0 : i32
    return %c0_i32, %c0_i32_0 : i32, i32
  }
  func.func @transform_3(%arg0: i32) -> (i32, i32) {
    %c0_i32 = arith.constant 0 : i32
    %c0_i32_0 = arith.constant 0 : i32
    %c0_i32_1 = arith.constant 0 : i32
    return %c0_i32, %c0_i32_0 : i32, i32
  }
  func.func @transform_4(%arg0: i32) -> (i32, i32) {
    %c0_i32 = arith.constant 0 : i32
    %c0_i32_0 = arith.constant 0 : i32
    %c0_i32_1 = arith.constant 0 : i32
    return %c0_i32, %c0_i32_0 : i32, i32
  }
  func.func @transform_5(%arg0: i32) -> (i32, i32) {
    %c0_i32 = arith.constant 0 : i32
    %c0_i32_0 = arith.constant 0 : i32
    %c0_i32_1 = arith.constant 0 : i32
    return %c0_i32, %c0_i32_0 : i32, i32
  }
  func.func @transform_6(%arg0: i32) -> (i32, i32, i32) {
    %c0_i32 = arith.constant 0 : i32
    %c0_i32_0 = arith.constant 0 : i32
    %c0_i32_1 = arith.constant 0 : i32
    return %arg0, %c0_i32, %c0_i32_0 : i32, i32, i32
  }
}

module attributes {stable_mosaic.version = 11 : i64} {
  func.func @kernel(%arg0: i32, %arg1: memref<1x10x10x8xf32, #tpu.memory_space<vmem>>, %arg2: memref<9x8x8xbf16, #tpu.memory_space<vmem>>, %arg3: memref<1x64x8xf32, #tpu.memory_space<vmem>>, %arg4: memref<1x64x8xf32, #tpu.memory_space<vmem>>, %arg5: memref<1x64x8xf32, #tpu.memory_space<vmem>>, %arg6: memref<1x64x8xf32, #tpu.memory_space<vmem>>, %arg7: memref<1x64x8xf32, #tpu.memory_space<vmem>>) attributes {dimension_semantics = [#tpu.dimension_semantics<parallel>], iteration_bounds = array<i64: 2>, scalar_prefetch = 0 : i64, scratch_operands = 0 : i64, tpu.core_type = #tpu.core_type<tc>, window_params = [{transform_indices = @transform_0, window_bounds = array<i64: 1, 10, 10, 8>}, {pipeline_mode = #tpu.pipeline_mode<synchronous>, transform_indices = @transform_1, window_bounds = array<i64: 9, 8, 8>}, {transform_indices = @transform_2, window_bounds = array<i64: 1, 64, 8>}, {transform_indices = @transform_3, window_bounds = array<i64: 1, 64, 8>}, {transform_indices = @transform_4, window_bounds = array<i64: 1, 64, 8>}, {transform_indices = @transform_5, window_bounds = array<i64: 1, 64, 8>}, {transform_indices = @transform_6, window_bounds = array<i64: 1, 64, 8>}]} {
    %c0 = arith.constant 0 : index
    %c0_0 = arith.constant 0 : index
    %c0_1 = arith.constant 0 : index
    %c0_2 = arith.constant 0 : index
    %0 = vector.load %arg1[%c0, %c0_0, %c0_1, %c0_2] : memref<1x10x10x8xf32, #tpu.memory_space<vmem>>, vector<1x10x10x8xf32>
    %1 = vector.shape_cast %0 : vector<1x10x10x8xf32> to vector<10x10x8xf32>
    %cst = arith.constant 0.000000e+00 : f32
    %2 = vector.broadcast %cst : f32 to vector<64x8xf32>
    %3 = vector.extract_strided_slice %1 {offsets = [0, 0, 0], sizes = [8, 8, 8], strides = [1, 1, 1]} : vector<10x10x8xf32> to vector<8x8x8xf32>
    %4 = vector.shape_cast %3 : vector<8x8x8xf32> to vector<64x8xf32>
    %5 = arith.truncf %4 : vector<64x8xf32> to vector<64x8xbf16>
    %c0_3 = arith.constant 0 : index
    %c0_4 = arith.constant 0 : index
    %c0_5 = arith.constant 0 : index
    %6 = vector.load %arg2[%c0_3, %c0_4, %c0_5] : memref<9x8x8xbf16, #tpu.memory_space<vmem>>, vector<1x8x8xbf16>
    %7 = vector.shape_cast %6 : vector<1x8x8xbf16> to vector<8x8xbf16>
    %cst_6 = arith.constant dense<0.000000e+00> : vector<64x8xf32>
    %8 = tpu.matmul %5, %7, %cst_6 {dimension_numbers = #tpu.dot_dimension_numbers<[1], [0], [0], [1], [0, 0, 1, 1], [], []>} : vector<64x8xbf16>, vector<8x8xbf16>, vector<64x8xf32> -> vector<64x8xf32>
    %9 = arith.addf %2, %8 : vector<64x8xf32>
    %10 = vector.extract_strided_slice %1 {offsets = [0, 1, 0], sizes = [8, 8, 8], strides = [1, 1, 1]} : vector<10x10x8xf32> to vector<8x8x8xf32>
    %11 = vector.shape_cast %10 : vector<8x8x8xf32> to vector<64x8xf32>
    %12 = arith.truncf %11 : vector<64x8xf32> to vector<64x8xbf16>
    %c1 = arith.constant 1 : index
    %c0_7 = arith.constant 0 : index
    %c0_8 = arith.constant 0 : index
    %13 = vector.load %arg2[%c1, %c0_7, %c0_8] : memref<9x8x8xbf16, #tpu.memory_space<vmem>>, vector<1x8x8xbf16>
    %14 = vector.shape_cast %13 : vector<1x8x8xbf16> to vector<8x8xbf16>
    %cst_9 = arith.constant dense<0.000000e+00> : vector<64x8xf32>
    %15 = tpu.matmul %12, %14, %cst_9 {dimension_numbers = #tpu.dot_dimension_numbers<[1], [0], [0], [1], [0, 0, 1, 1], [], []>} : vector<64x8xbf16>, vector<8x8xbf16>, vector<64x8xf32> -> vector<64x8xf32>
    %16 = arith.addf %9, %15 : vector<64x8xf32>
    %17 = vector.extract_strided_slice %1 {offsets = [0, 2, 0], sizes = [8, 8, 8], strides = [1, 1, 1]} : vector<10x10x8xf32> to vector<8x8x8xf32>
    %18 = vector.shape_cast %17 : vector<8x8x8xf32> to vector<64x8xf32>
    %19 = arith.truncf %18 : vector<64x8xf32> to vector<64x8xbf16>
    %c2 = arith.constant 2 : index
    %c0_10 = arith.constant 0 : index
    %c0_11 = arith.constant 0 : index
    %20 = vector.load %arg2[%c2, %c0_10, %c0_11] : memref<9x8x8xbf16, #tpu.memory_space<vmem>>, vector<1x8x8xbf16>
    %21 = vector.shape_cast %20 : vector<1x8x8xbf16> to vector<8x8xbf16>
    %cst_12 = arith.constant dense<0.000000e+00> : vector<64x8xf32>
    %22 = tpu.matmul %19, %21, %cst_12 {dimension_numbers = #tpu.dot_dimension_numbers<[1], [0], [0], [1], [0, 0, 1, 1], [], []>} : vector<64x8xbf16>, vector<8x8xbf16>, vector<64x8xf32> -> vector<64x8xf32>
    %23 = arith.addf %16, %22 : vector<64x8xf32>
    %24 = vector.extract_strided_slice %1 {offsets = [1, 0, 0], sizes = [8, 8, 8], strides = [1, 1, 1]} : vector<10x10x8xf32> to vector<8x8x8xf32>
    %25 = vector.shape_cast %24 : vector<8x8x8xf32> to vector<64x8xf32>
    %26 = arith.truncf %25 : vector<64x8xf32> to vector<64x8xbf16>
    %c3 = arith.constant 3 : index
    %c0_13 = arith.constant 0 : index
    %c0_14 = arith.constant 0 : index
    %27 = vector.load %arg2[%c3, %c0_13, %c0_14] : memref<9x8x8xbf16, #tpu.memory_space<vmem>>, vector<1x8x8xbf16>
    %28 = vector.shape_cast %27 : vector<1x8x8xbf16> to vector<8x8xbf16>
    %cst_15 = arith.constant dense<0.000000e+00> : vector<64x8xf32>
    %29 = tpu.matmul %26, %28, %cst_15 {dimension_numbers = #tpu.dot_dimension_numbers<[1], [0], [0], [1], [0, 0, 1, 1], [], []>} : vector<64x8xbf16>, vector<8x8xbf16>, vector<64x8xf32> -> vector<64x8xf32>
    %30 = arith.addf %23, %29 : vector<64x8xf32>
    %31 = vector.extract_strided_slice %1 {offsets = [1, 1, 0], sizes = [8, 8, 8], strides = [1, 1, 1]} : vector<10x10x8xf32> to vector<8x8x8xf32>
    %32 = vector.shape_cast %31 : vector<8x8x8xf32> to vector<64x8xf32>
    %33 = arith.truncf %32 : vector<64x8xf32> to vector<64x8xbf16>
    %c4 = arith.constant 4 : index
    %c0_16 = arith.constant 0 : index
    %c0_17 = arith.constant 0 : index
    %34 = vector.load %arg2[%c4, %c0_16, %c0_17] : memref<9x8x8xbf16, #tpu.memory_space<vmem>>, vector<1x8x8xbf16>
    %35 = vector.shape_cast %34 : vector<1x8x8xbf16> to vector<8x8xbf16>
    %cst_18 = arith.constant dense<0.000000e+00> : vector<64x8xf32>
    %36 = tpu.matmul %33, %35, %cst_18 {dimension_numbers = #tpu.dot_dimension_numbers<[1], [0], [0], [1], [0, 0, 1, 1], [], []>} : vector<64x8xbf16>, vector<8x8xbf16>, vector<64x8xf32> -> vector<64x8xf32>
    %37 = arith.addf %30, %36 : vector<64x8xf32>
    %38 = vector.extract_strided_slice %1 {offsets = [1, 2, 0], sizes = [8, 8, 8], strides = [1, 1, 1]} : vector<10x10x8xf32> to vector<8x8x8xf32>
    %39 = vector.shape_cast %38 : vector<8x8x8xf32> to vector<64x8xf32>
    %40 = arith.truncf %39 : vector<64x8xf32> to vector<64x8xbf16>
    %c5 = arith.constant 5 : index
    %c0_19 = arith.constant 0 : index
    %c0_20 = arith.constant 0 : index
    %41 = vector.load %arg2[%c5, %c0_19, %c0_20] : memref<9x8x8xbf16, #tpu.memory_space<vmem>>, vector<1x8x8xbf16>
    %42 = vector.shape_cast %41 : vector<1x8x8xbf16> to vector<8x8xbf16>
    %cst_21 = arith.constant dense<0.000000e+00> : vector<64x8xf32>
    %43 = tpu.matmul %40, %42, %cst_21 {dimension_numbers = #tpu.dot_dimension_numbers<[1], [0], [0], [1], [0, 0, 1, 1], [], []>} : vector<64x8xbf16>, vector<8x8xbf16>, vector<64x8xf32> -> vector<64x8xf32>
    %44 = arith.addf %37, %43 : vector<64x8xf32>
    %45 = vector.extract_strided_slice %1 {offsets = [2, 0, 0], sizes = [8, 8, 8], strides = [1, 1, 1]} : vector<10x10x8xf32> to vector<8x8x8xf32>
    %46 = vector.shape_cast %45 : vector<8x8x8xf32> to vector<64x8xf32>
    %47 = arith.truncf %46 : vector<64x8xf32> to vector<64x8xbf16>
    %c6 = arith.constant 6 : index
    %c0_22 = arith.constant 0 : index
    %c0_23 = arith.constant 0 : index
    %48 = vector.load %arg2[%c6, %c0_22, %c0_23] : memref<9x8x8xbf16, #tpu.memory_space<vmem>>, vector<1x8x8xbf16>
    %49 = vector.shape_cast %48 : vector<1x8x8xbf16> to vector<8x8xbf16>
    %cst_24 = arith.constant dense<0.000000e+00> : vector<64x8xf32>
    %50 = tpu.matmul %47, %49, %cst_24 {dimension_numbers = #tpu.dot_dimension_numbers<[1], [0], [0], [1], [0, 0, 1, 1], [], []>} : vector<64x8xbf16>, vector<8x8xbf16>, vector<64x8xf32> -> vector<64x8xf32>
    %51 = arith.addf %44, %50 : vector<64x8xf32>
    %52 = vector.extract_strided_slice %1 {offsets = [2, 1, 0], sizes = [8, 8, 8], strides = [1, 1, 1]} : vector<10x10x8xf32> to vector<8x8x8xf32>
    %53 = vector.shape_cast %52 : vector<8x8x8xf32> to vector<64x8xf32>
    %54 = arith.truncf %53 : vector<64x8xf32> to vector<64x8xbf16>
    %c7 = arith.constant 7 : index
    %c0_25 = arith.constant 0 : index
    %c0_26 = arith.constant 0 : index
    %55 = vector.load %arg2[%c7, %c0_25, %c0_26] : memref<9x8x8xbf16, #tpu.memory_space<vmem>>, vector<1x8x8xbf16>
    %56 = vector.shape_cast %55 : vector<1x8x8xbf16> to vector<8x8xbf16>
    %cst_27 = arith.constant dense<0.000000e+00> : vector<64x8xf32>
    %57 = tpu.matmul %54, %56, %cst_27 {dimension_numbers = #tpu.dot_dimension_numbers<[1], [0], [0], [1], [0, 0, 1, 1], [], []>} : vector<64x8xbf16>, vector<8x8xbf16>, vector<64x8xf32> -> vector<64x8xf32>
    %58 = arith.addf %51, %57 : vector<64x8xf32>
    %59 = vector.extract_strided_slice %1 {offsets = [2, 2, 0], sizes = [8, 8, 8], strides = [1, 1, 1]} : vector<10x10x8xf32> to vector<8x8x8xf32>
    %60 = vector.shape_cast %59 : vector<8x8x8xf32> to vector<64x8xf32>
    %61 = arith.truncf %60 : vector<64x8xf32> to vector<64x8xbf16>
    %c8 = arith.constant 8 : index
    %c0_28 = arith.constant 0 : index
    %c0_29 = arith.constant 0 : index
    %62 = vector.load %arg2[%c8, %c0_28, %c0_29] : memref<9x8x8xbf16, #tpu.memory_space<vmem>>, vector<1x8x8xbf16>
    %63 = vector.shape_cast %62 : vector<1x8x8xbf16> to vector<8x8xbf16>
    %cst_30 = arith.constant dense<0.000000e+00> : vector<64x8xf32>
    %64 = tpu.matmul %61, %63, %cst_30 {dimension_numbers = #tpu.dot_dimension_numbers<[1], [0], [0], [1], [0, 0, 1, 1], [], []>} : vector<64x8xbf16>, vector<8x8xbf16>, vector<64x8xf32> -> vector<64x8xf32>
    %65 = arith.addf %58, %64 : vector<64x8xf32>
    %c0_31 = arith.constant 0 : index
    %c0_32 = arith.constant 0 : index
    %c0_33 = arith.constant 0 : index
    %66 = vector.load %arg3[%c0_31, %c0_32, %c0_33] : memref<1x64x8xf32, #tpu.memory_space<vmem>>, vector<1x64x8xf32>
    %67 = vector.shape_cast %66 : vector<1x64x8xf32> to vector<64x8xf32>
    %cst_34 = arith.constant 0.000000e+00 : f32
    %68 = vector.broadcast %cst_34 : f32 to vector<64x8xf32>
    %69 = arith.mulf %68, %65 : vector<64x8xf32>
    %70 = arith.subf %67, %69 : vector<64x8xf32>
    %c0_35 = arith.constant 0 : index
    %c0_36 = arith.constant 0 : index
    %c0_37 = arith.constant 0 : index
    %71 = vector.load %arg4[%c0_35, %c0_36, %c0_37] : memref<1x64x8xf32, #tpu.memory_space<vmem>>, vector<1x64x8xf32>
    %72 = vector.shape_cast %71 : vector<1x64x8xf32> to vector<64x8xf32>
    %cst_38 = arith.constant 0.000000e+00 : f32
    %73 = vector.broadcast %cst_38 : f32 to vector<64x8xf32>
    %74 = arith.mulf %73, %72 : vector<64x8xf32>
    %75 = arith.subf %70, %74 : vector<64x8xf32>
    %c0_39 = arith.constant 0 : index
    %c0_40 = arith.constant 0 : index
    %c0_41 = arith.constant 0 : index
    %76 = vector.load %arg5[%c0_39, %c0_40, %c0_41] : memref<1x64x8xf32, #tpu.memory_space<vmem>>, vector<1x64x8xf32>
    %77 = vector.shape_cast %76 : vector<1x64x8xf32> to vector<64x8xf32>
    %cst_42 = arith.constant 0.000000e+00 : f32
    %78 = vector.broadcast %cst_42 : f32 to vector<64x8xf32>
    %79 = arith.mulf %78, %77 : vector<64x8xf32>
    %80 = arith.subf %75, %79 : vector<64x8xf32>
    %c0_43 = arith.constant 0 : index
    %c0_44 = arith.constant 0 : index
    %c0_45 = arith.constant 0 : index
    %81 = vector.load %arg6[%c0_43, %c0_44, %c0_45] : memref<1x64x8xf32, #tpu.memory_space<vmem>>, vector<1x64x8xf32>
    %82 = vector.shape_cast %81 : vector<1x64x8xf32> to vector<64x8xf32>
    %83 = vector.shape_cast %80 : vector<64x8xf32> to vector<1x64x8xf32>
    tpu.vector_store %arg6[%c0_43, %c0_44, %c0_45], %83 {strides = array<i32>} : memref<1x64x8xf32, #tpu.memory_space<vmem>>, vector<1x64x8xf32>,
    %c0_46 = arith.constant 0 : index
    %c0_47 = arith.constant 0 : index
    %c0_48 = arith.constant 0 : index
    %84 = vector.load %arg7[%c0_46, %c0_47, %c0_48] : memref<1x64x8xf32, #tpu.memory_space<vmem>>, vector<1x64x8xf32>
    %85 = vector.shape_cast %84 : vector<1x64x8xf32> to vector<64x8xf32>
    %86 = vector.shape_cast %65 : vector<64x8xf32> to vector<1x64x8xf32>
    tpu.vector_store %arg7[%c0_46, %c0_47, %c0_48], %86 {strides = array<i32>} : memref<1x64x8xf32, #tpu.memory_space<vmem>>, vector<1x64x8xf32>,
    return
  }
  func.func @transform_0(%arg0: i32) -> (i32, i32, i32, i32) {
    %c0_i32 = arith.constant 0 : i32
    %c0_i32_0 = arith.constant 0 : i32
    %c0_i32_1 = arith.constant 0 : i32
    %c0_i32_2 = arith.constant 0 : i32
    return %arg0, %c0_i32, %c0_i32_0, %c0_i32_1 : i32, i32, i32, i32
  }
  func.func @transform_1(%arg0: i32) -> (i32, i32, i32) {
    %c0_i32 = arith.constant 0 : i32
    %c0_i32_0 = arith.constant 0 : i32
    %c0_i32_1 = arith.constant 0 : i32
    %c0_i32_2 = arith.constant 0 : i32
    return %c0_i32, %c0_i32_0, %c0_i32_1 : i32, i32, i32
  }
  func.func @transform_2(%arg0: i32) -> (i32, i32, i32) {
    %c0_i32 = arith.constant 0 : i32
    %c0_i32_0 = arith.constant 0 : i32
    %c0_i32_1 = arith.constant 0 : i32
    return %arg0, %c0_i32, %c0_i32_0 : i32, i32, i32
  }
  func.func @transform_3(%arg0: i32) -> (i32, i32, i32) {
    %c0_i32 = arith.constant 0 : i32
    %c0_i32_0 = arith.constant 0 : i32
    %c0_i32_1 = arith.constant 0 : i32
    return %arg0, %c0_i32, %c0_i32_0 : i32, i32, i32
  }
  func.func @transform_4(%arg0: i32) -> (i32, i32, i32) {
    %c0_i32 = arith.constant 0 : i32
    %c0_i32_0 = arith.constant 0 : i32
    %c0_i32_1 = arith.constant 0 : i32
    return %arg0, %c0_i32, %c0_i32_0 : i32, i32, i32
  }
  func.func @transform_5(%arg0: i32) -> (i32, i32, i32) {
    %c0_i32 = arith.constant 0 : i32
    %c0_i32_0 = arith.constant 0 : i32
    %c0_i32_1 = arith.constant 0 : i32
    return %arg0, %c0_i32, %c0_i32_0 : i32, i32, i32
  }
  func.func @transform_6(%arg0: i32) -> (i32, i32, i32) {
    %c0_i32 = arith.constant 0 : i32
    %c0_i32_0 = arith.constant 0 : i32
    %c0_i32_1 = arith.constant 0 : i32
    return %arg0, %c0_i32, %c0_i32_0 : i32, i32, i32
  }
}

</mosaic_0001>

<bundles_post_ra>
// kernel: _lambda_.7
= control target key start
LH: loop header
LB: loop body
LE: loop exit
PB: predicated region body
PF: predicated region fallthrough
CT: control target
= control target key end

     0   :  { %s1595_s15 = smov 0   ;;  %s1902_s0 = inlined_call_operand.vmem [shape: f32[2,10,10,8], index: 0, kind: input, shape index: {}]   ;;  %s1903_s1 = inlined_call_operand.vmem [shape: bf16[9,8,8], index: 1, kind: input, shape index: {}]   ;;  %s1904_s2 = inlined_call_operand.vmem [shape: f32[2,64,8], index: 2, kind: input, shape index: {}]   ;;  %s1905_s3 = inlined_call_operand.vmem [shape: f32[2,64,8], index: 3, kind: output, shape index: {0}]   ;;  %s1906_s4 = inlined_call_operand.vmem [shape: f32[2,64,8], index: 4, kind: output, shape index: {1}]  }
   0x1 LB: > { %s1281_s16 = sadd.s32 4294967295, %s1568_s15   ;;  %p1285_p0 = scmp.ge.s32.totalorder %s1568_s15, 1  ;;  %s1568_s15 = sphi %s1595_s15, %s15_s15  }
   0x2   : > { %p175_p1 = scmp.lt.s32.totalorder %s1568_s15, 3 }
   0x4   : > { %p176_p2 = pnand %p1285_p0, %p175_p1 }
   0x5   : > { %v1293_v0 = vld [vmem:[%s1903_s1 + $0x4] sm:$0xf] (!%p176_p2)  ;;  %vm325_vm0 = vcmask (!%p176_p2), 1043456   ;;  %v1609_v1 = vld [vmem:[%s1903_s1 + $0x10] sm:$0xf] (!%p176_p2)  ;;  %p211_p3 = scmp.lt.s32.totalorder (!%p176_p2), %s1281_s16, 1 }
   0x6   : > { %179 = sbr.rel (%p176_p2) target bundleno = 315 (0x13b), region = 32  ;;  %1543 = vmatprep.subr.msk.bf16.mxu1 (!%p176_p2), %vm325_vm0, %v1293_v0  ;;  %1547 = vmatprep.subr.msk.bf16.mxu0 (!%p176_p2), %vm325_vm0, %v1609_v1  ;;  %v327_v2 = vsel (!%p176_p2), %vm325_vm0, %v1293_v0, 0  ;;  %v1617_v3 = vsel (!%p176_p2), %vm325_vm0, %v1609_v1, 0  ;;  %v256_v4 = vld [vmem:[%s1903_s1] sm:$0xf] (!%p176_p2)  ;;  %vm273_vm1 = vcmask (!%p176_p2), 1046528  }
   0x7   : > { %1388 = vmatpush3.bf16.msra.mxu1 (!%p176_p2), %v327_v2  ;;  %1428 = vmatpush3.bf16.msra.mxu0 (!%p176_p2), %v1617_v3  ;;  %v1317_v5 = vld [vmem:[%s1903_s1 + $0x14] sm:$0xf] (!%p176_p2)  ;;  %vm312_vm2 = vcmask (!%p176_p2), 64512   ;;  %v407_v13 = vsel (!%p176_p2), %vm325_vm0, %v256_v4, 0  ;;  %vm474_vm3 = vcmask (!%p176_p2), 1045504  }
   0x8   : > { %1544 = vmatprep.subr.msk.bf16.mxu1 (!%p176_p2), %vm325_vm0, %v256_v4  ;;  %1549 = vmatprep.subr.msk.bf16.mxu0 (!%p176_p2), %vm325_vm0, %v1317_v5  ;;  %v818_v17 = vsel (!%p176_p2), %vm325_vm0, %v1317_v5, 0  ;;  %v1322_v54 = vld [vmem:[%s1903_s1 + $0x18] sm:$0xf] (!%p176_p2)  ;;  %v1302_v59 = vld [vmem:[%s1903_s1 + $0x8] sm:$0xf] (!%p176_p2) }
   0xd   : > { %s1908_s16 = smov (!%p211_p3, %s1281_s16), 1 }
   0xe   : > { %s1553_s25 = smul.u32 160, %s1908_s16  ;;  %s1339_s13 = sshll.u32 %s1908_s16, 6 }
   0xf   : > { %s1847_s18 = scalar_lea.vmem %s1904_s2, %s1339_s13  ;;  %s1852_s21 = scalar_lea.vmem %s1905_s3, %s1339_s13 }
  0x10   : > { %s1634_s28 = scalar_lea.vmem %s1902_s0, %s1553_s25  ;;  %s1859_s23 = scalar_lea.vmem %s1906_s4, %s1339_s13 }
  0x11   : > { %v1637_v6 = vld [vmem:[%s1634_s28] sm:$0xff]  ;;  %v1640_v7 = vld [vmem:[%s1634_s28 + $0x8] sm:$0x3]  ;;  %v1643_v8 = vld [vmem:[%s1634_s28 + $0x10] sm:$0xff] }
  0x12   : > { %v1646_v9 = vld [vmem:[%s1634_s28 + $0x18] sm:$0x3]  ;;  %v274_v10 = vrot.slane %v1637_v6, 1  ;;  %v275_v11 = vrot.slane %v1640_v7, 1  ;;  %v277_v12 = vrot.slane %v1643_v8, 1  ;;  %v1654_v15 = vld [vmem:[%s1634_s28 + $0x20] sm:$0xff] }
  0x13   : > { %v278_v14 = vrot.slane %v1646_v9, 1  ;;  %v237_v16 = vld [vmem:[%s1634_s28 + $0x28] sm:$0x3]  ;;  %v1660_v19 = vld [vmem:[%s1634_s28 + $0x30] sm:$0xff]  ;;  %v1663_v20 = vld [vmem:[%s1634_s28 + $0x38] sm:$0x3] }
  0x14   : > { %v276_v18 = vsel %vm273_vm1, %v274_v10, %v275_v11  ;;  %v1666_v21 = vld [vmem:[%s1634_s28 + $0x40] sm:$0xff]  ;;  %v280_v22 = vrot.slane %v1654_v15, 1  ;;  %v281_v23 = vrot.slane %v237_v16, 1  ;;  %v241_v25 = vld [vmem:[%s1634_s28 + $0x48] sm:$0x3]  ;;  %v283_v26 = vrot.slane %v1660_v19, 1 }
  0x15   : > { %v279_v24 = vsel %vm273_vm1, %v277_v12, %v278_v14  ;;  %v284_v27 = vrot.slane %v1663_v20, 1  ;;  %v1674_v28 = vld [vmem:[%s1634_s28 + $0x50] sm:$0xff]  ;;  %v1677_v29 = vld [vmem:[%s1634_s28 + $0x60] sm:$0xff]  ;;  %v286_v32 = vrot.slane %v1666_v21, 1  ;;  %v287_v33 = vrot.slane %v241_v25, 1 }
  0x16   : > { %v306_v30 = vpack.c.bf16 %v279_v24, %v276_v18  ;;  %v282_v31 = vsel %vm273_vm1, %v280_v22, %v281_v23  ;;  %v243_v34 = vld [vmem:[%s1634_s28 + $0x58] sm:$0x3]  ;;  %v245_v35 = vld [vmem:[%s1634_s28 + $0x68] sm:$0x3]  ;;  %v479_v36 = vrot.slane %v1646_v9, 2  ;;  %v482_v38 = vrot.slane %v237_v16, 2 }
  0x17   : > { %v285_v37 = vsel %vm273_vm1, %v283_v26, %v284_v27  ;;  %v485_v39 = vrot.slane %v1663_v20, 2  ;;  %v1687_v40 = vld [vmem:[%s1634_s28 + $0x70] sm:$0xff]  ;;  %v1690_v41 = vld [vmem:[%s1634_s28 + $0x78] sm:$0x3]  ;;  %v288_v42 = vsel %vm273_vm1, %v286_v32, %v287_v33  ;;  %v488_v44 = vrot.slane %v241_v25, 2  ;;  %v1746_v18 = vld [vmem:[%s1634_s28 + $0x80] sm:$0xff] }
  0x18   : > { %1389 = vmatprep.mubr.msk.bf16.mxu1 %vm312_vm2, %v306_v30  ;;  %v1694_v43 = vpack.c.bf16 %v285_v37, %v282_v31  ;;  %v701_v45 = vpack.c.bf16 %v282_v31, %v279_v24  ;;  %v702_v46 = vpack.c.bf16 %v288_v42, %v285_v37  ;;  %v289_v47 = vrot.slane %v1674_v28, 1  ;;  %v1749_v20 = vld [vmem:[%s1634_s28 + $0x88] sm:$0x3]  ;;  %v1327_v32 = vld [vmem:[%s1903_s1 + $0x1c] sm:$0xf] }
  0x19   : > { %v290_v48 = vrot.slane %v243_v34, 1  ;;  %v292_v49 = vrot.slane %v1677_v29, 1  ;;  %v293_v50 = vrot.slane %v245_v35, 1  ;;  %v295_v51 = vrot.slane %v1687_v40, 1 }
  0x1a   : > { %1429 = vmatprep.mubr.msk.bf16.mxu0 %vm312_vm2, %v701_v45  ;;  %1390 = vmatmul.mubr.msk.bf16.vlgmr.msra.gmra.mrb[0].mxu1 %vm312_vm2, %v1694_v43  ;;  %v296_v52 = vrot.slane %v1690_v41, 1  ;;  %v478_v53 = vrot.slane %v1643_v8, 2  ;;  %v481_v56 = vrot.slane %v1654_v15, 2  ;;  %v484_v57 = vrot.slane %v1660_v19, 2 }
  0x1b   : > { %1398 = vmatpush3.bf16.msra.mxu1 %v407_v13  ;;  %1430 = vmatmul.mubr.msk.bf16.vlgmr.msra.gmra.mrb[0].mxu0 %vm312_vm2, %v702_v46  ;;  %v1709_v55 = vsel %vm273_vm1, %v289_v47, %v290_v48  ;;  %v487_v58 = vrot.slane %v1666_v21, 2  ;;  %v1721_v61 = vsel %vm273_vm1, %v292_v49, %v293_v50  ;;  %v490_v5 = vrot.slane %v1674_v28, 2  ;;  %v1332_v46 = vld [vmem:[%s1903_s1 + $0x20] sm:$0xf]  ;;  %v250_v49 = vld [vmem:[%s1634_s28 + $0x90] sm:$0xff] }
  0x1c   : > { %1438 = vmatpush3.bf16.msra.mxu0 %v818_v17  ;;  %v1718_v60 = vpack.c.bf16 %v1709_v55, %v288_v42  ;;  %v1724_v62 = vsel %vm273_vm1, %v295_v51, %v296_v52  ;;  %v480_v63 = vsel %vm474_vm3, %v478_v53, %v479_v36  ;;  %v483_v0 = vsel %vm474_vm3, %v481_v56, %v482_v38  ;;  %v251_v53 = vld [vmem:[%s1634_s28 + $0x98] sm:$0x3] }
  0x1d   : > { %1550 = vmatprep.subr.msk.bf16.mxu0 %vm325_vm0, %v1322_v54  ;;  %v1733_v2 = vpack.c.bf16 %v1724_v62, %v1721_v61  ;;  %v799_v4 = vpack.c.bf16 %v483_v0, %v480_v63  ;;  %1545 = vmatprep.subr.msk.bf16.mxu1 %vm325_vm0, %v1302_v59  ;;  %v252_v9 = vpack.c.bf16 %v1643_v8, %v1637_v6  ;;  %v491_v10 = vrot.slane %v243_v34, 2 }
  0x1e   : > { %1393 = vmatprep.mubr.msk.bf16.mxu1 %vm312_vm2, %v1718_v60  ;;  %v493_v11 = vrot.slane %v1677_v29, 2  ;;  %v494_v12 = vrot.slane %v245_v35, 2  ;;  %v486_v13 = vsel %vm474_vm3, %v484_v57, %v485_v39  ;;  %v489_v14 = vsel %vm474_vm3, %v487_v58, %v488_v44  ;;  %v1307_v39 = vld [vmem:[%s1903_s1 + $0xc] sm:$0xf] }
  0x1f   : > { %1439 = vmatprep.mubr.msk.bf16.mxu0 %vm312_vm2, %v799_v4  ;;  %v492_v16 = vsel %vm474_vm3, %v490_v5, %v491_v10  ;;  %v800_v22 = vpack.c.bf16 %v489_v14, %v486_v13  ;;  %v496_v23 = vrot.slane %v1687_v40, 2  ;;  %v497_v25 = vrot.slane %v1690_v41, 2  ;;  %v1159_v4 = vld [vmem:[%s1847_s18 + $0x10] sm:$0xff]  ;;  %v1157_v10 = vld [vmem:[%s1847_s18] sm:$0xff] }
  0x20   : > { %v495_v17 = vsel %vm474_vm3, %v493_v11, %v494_v12  ;;  %v795_v26 = vrot.slane %v1746_v18, 2  ;;  %v796_v27 = vrot.slane %v1749_v20, 2  ;;  %v900_v30 = vsel %vm325_vm0, %v1322_v54, 0 }
  0x21   : > { %v801_v24 = vpack.c.bf16 %v495_v17, %v492_v16  ;;  %v253_v31 = vpack.c.bf16 %v1660_v19, %v1654_v15  ;;  %v526_v33 = vsel %vm325_vm0, %v1302_v59, 0  ;;  %v254_v34 = vpack.c.bf16 %v1674_v28, %v1666_v21 }
  0x22   : > { %1394 = vmatmul.mubr.msk.bf16.gmra.mrb[4].mxu1 %vm312_vm2, %v1733_v2  ;;  %v475_v35 = vrot.slane %v1637_v6, 2  ;;  %v476_v36 = vrot.slane %v1640_v7, 2  ;;  %v498_v37 = vsel %vm474_vm3, %v496_v23, %v497_v25  ;;  %v1773_v38 = vsel %vm474_vm3, %v795_v26, %v796_v27  ;;  %v1163_v27 = vld [vmem:[%s1847_s18 + $0x30] sm:$0xff] }
  0x23   : > { %1399 = vmatprep.mubr.msk.bf16.mxu1 %vm312_vm2, %v252_v9  ;;  %v802_v6 = vpack.c.bf16 %v1773_v38, %v498_v37  ;;  %v255_v41 = vpack.c.bf16 %v1687_v40, %v1677_v29  ;;  %v988_v44 = vsel %vm325_vm0, %v1327_v32, 0  ;;  %v508_v45 = vpack.c.bf16 %v486_v13, %v483_v0  ;;  %v1160_v13 = vld [vmem:[%s1847_s18 + $0x18] sm:$0xff] }
  0x24   : > { %v477_v7 = vsel %vm474_vm3, %v475_v35, %v476_v36  ;;  %v509_v47 = vpack.c.bf16 %v492_v16, %v489_v14  ;;  %v620_v48 = vsel %vm325_vm0, %v1307_v39, 0  ;;  %v893_v50 = vpack.c.bf16 %v250_v49, %v1746_v18 }
  0x25   : > { %v507_v42 = vpack.c.bf16 %v480_v63, %v477_v7  ;;  %v510_v51 = vpack.c.bf16 %v498_v37, %v495_v17  ;;  %v601_v52 = vpack.c.bf16 %v1654_v15, %v1643_v8  ;;  %v977_v54 = vrot.slane %v250_v49, 1  ;;  %v1164_v37 = vld [vmem:[%s1847_s18 + $0x38] sm:$0xff] }
  0x26   : > { %v697_v56 = vrot.slane %v1746_v18, 1  ;;  %v698_v57 = vrot.slane %v1749_v20, 1  ;;  %v1074_v58 = vsel %vm325_vm0, %v1332_v46, 0  ;;  %v602_v59 = vpack.c.bf16 %v1666_v21, %v1660_v19 }
  0x27   : > { %1440 = vmatmul.mubr.msk.bf16.vlgmr.msra.gmra.mrb[0].mxu0 %vm312_vm2, %v800_v22  ;;  %v603_v8 = vpack.c.bf16 %v1677_v29, %v1674_v28  ;;  %v604_v19 = vpack.c.bf16 %v1746_v18, %v1687_v40  ;;  %v703_v21 = vpack.c.bf16 %v1721_v61, %v1709_v55  ;;  %v1063_v28 = vrot.slane %v250_v49, 2  ;;  %v1158_v18 = vld [vmem:[%s1847_s18 + $0x8] sm:$0xff] }
  0x28   : > { %1448 = vmatpush3.bf16.msra.mxu0 %v900_v30  ;;  %1443 = vmatprep.mubr.msk.bf16.mxu0 %vm312_vm2, %v801_v24  ;;  %v699_v15 = vsel %vm273_vm1, %v697_v56, %v698_v57 }
  0x29   : > { %1551 = vmatprep.subr.msk.bf16.mxu0 %vm325_vm0, %v1327_v32  ;;  %v704_v40 = vpack.c.bf16 %v699_v15, %v1724_v62 }
  0x2a   : > { %1400 = vmatmul.mubr.msk.bf16.vlgmr.msra.gmra.mrb[0].mxu1 %vm312_vm2, %v253_v31 }
  0x2b   : > { %1408 = vmatpush3.bf16.msra.mxu1 %v526_v33  ;;  %1403 = vmatprep.mubr.msk.bf16.mxu1 %vm312_vm2, %v254_v34  ;;  %v1161_v33 = vld [vmem:[%s1847_s18 + $0x20] sm:$0xff] }
  0x2c   : > { %1546 = vmatprep.subr.msk.bf16.mxu1 %vm325_vm0, %v1307_v39 }
  0x2f   : > { %1444 = vmatmul.mubr.msk.bf16.gmra.mrb[4].mxu0 %vm312_vm2, %v802_v6 }
  0x30   : > { %1449 = vmatprep.mubr.msk.bf16.mxu0 %vm312_vm2, %v253_v31 }
  0x32   : > { %1404 = vmatmul.mubr.msk.bf16.gmra.mrb[4].mxu1 %vm312_vm2, %v255_v41 }
  0x33   : > { %1409 = vmatprep.mubr.msk.bf16.mxu1 %vm312_vm2, %v507_v42 }
  0x37   : > { %1450 = vmatmul.mubr.msk.bf16.vlgmr.msra.gmra.mrb[0].mxu0 %vm312_vm2, %v254_v34 }
  0x38   : > { %1458 = vmatpush3.bf16.msra.mxu0 %v988_v44  ;;  %1453 = vmatprep.mubr.msk.bf16.mxu0 %vm312_vm2, %v255_v41  ;;  %v1162_v41 = vld [vmem:[%s1847_s18 + $0x28] sm:$0xff] }
  0x39   : > { %1552 = vmatprep.subr.msk.bf16.mxu0 %vm325_vm0, %v1332_v46 }
  0x3a   : > { %1410 = vmatmul.mubr.msk.bf16.vlgmr.msra.gmra.mrb[0].mxu1 %vm312_vm2, %v508_v45 }
  0x3b   : > { %1418 = vmatpush3.bf16.msra.mxu1 %v620_v48  ;;  %1413 = vmatprep.mubr.msk.bf16.mxu1 %vm312_vm2, %v509_v47 }
  0x3c   : > { %1548 = vmatprep.subr.msk.bf16.mxu1 %vm325_vm0, %v1609_v1  ;;  %v978_v1 = vrot.slane %v251_v53, 1 }
  0x3f   : > { %1454 = vmatmul.mubr.msk.bf16.gmra.mrb[4].mxu0 %vm312_vm2, %v893_v50 }
  0x40   : > { %1459 = vmatprep.mubr.msk.bf16.mxu0 %vm312_vm2, %v1694_v43  ;;  %v979_v43 = vsel %vm273_vm1, %v977_v54, %v978_v1 }
  0x41   : > { %v981_v63 = vpack.c.bf16 %v979_v43, %v699_v15 }
  0x42   : > { %1414 = vmatmul.mubr.msk.bf16.gmra.mrb[4].mxu1 %vm312_vm2, %v510_v51 }
  0x43   : > { %1419 = vmatprep.mubr.msk.bf16.mxu1 %vm312_vm2, %v601_v52 }
  0x47   : > { %1460 = vmatmul.mubr.msk.bf16.vlgmr.msra.gmra.mrb[0].mxu0 %vm312_vm2, %v1718_v60 }
  0x48   : > { %1468 = vmatpush3.bf16.msra.mxu0 %v1074_v58  ;;  %1463 = vmatprep.mubr.msk.bf16.mxu0 %vm312_vm2, %v1733_v2 }
  0x4a   : > { %1420 = vmatmul.mubr.msk.bf16.vlgmr.msra.gmra.mrb[0].mxu1 %vm312_vm2, %v602_v59 }
  0x4b   : > { %1478 = vmatpush3.bf16.msra.mxu1 %v1617_v3  ;;  %1423 = vmatprep.mubr.msk.bf16.mxu1 %vm312_vm2, %v603_v8  ;;  %v1064_v3 = vrot.slane %v251_v53, 2 }
  0x4d   : > { %v1065_v29 = vsel %vm474_vm3, %v1063_v28, %v1064_v3 }
  0x4e   : > { %v1067_v60 = vpack.c.bf16 %v1065_v29, %v1773_v38 }
  0x4f   : > { %1464 = vmatmul.mubr.msk.bf16.gmra.mrb[4].mxu0 %vm312_vm2, %v981_v63 }
  0x50   : > { %1469 = vmatprep.mubr.msk.bf16.mxu0 %vm312_vm2, %v508_v45 }
  0x52   : > { %1424 = vmatmul.mubr.msk.bf16.gmra.mrb[4].mxu1 %vm312_vm2, %v604_v19 }
  0x53   : > { %1433 = vmatprep.mubr.msk.bf16.mxu1 %vm312_vm2, %v703_v21 }
  0x57   : > { %1470 = vmatmul.mubr.msk.bf16.vlgmr.msra.gmra.mrb[0].mxu0 %vm312_vm2, %v509_v47 }
  0x58   : > { %1473 = vmatprep.mubr.msk.bf16.mxu0 %vm312_vm2, %v510_v51 }
  0x5e   : > { %1434 = vmatmul.mubr.msk.bf16.vlgmr.msra.gmra.mrb[4].mxu1 %vm312_vm2, %v704_v40 }
  0x5f   : > { %1474 = vmatmul.mubr.msk.bf16.gmra.mrb[4].mxu0 %vm312_vm2, %v1067_v60 }
 0x11d   : > { %v1421_v55 = vpop.f32.mrb[0].mxu1 }
 0x11e   : > { %v656_v61 = vpop.f32.mrb[1].mxu1 }
 0x11f   : > { %v1422_v0 = vpop.f32.mrb[2].mxu1 }
 0x120   : > { %v659_v2 = vpop.f32.mrb[3].mxu1 }
 0x12a   : > { %v1471_v62 = vpop.f32.mrb[0].mxu0 }
 0x12b   : > { %v1479_v5 = vadd.f32 %v1471_v62, %v1421_v55  ;;  %v1110_v9 = vpop.f32.mrb[1].mxu0 }
 0x12c   : > { %v1480_v11 = vadd.f32 %v1110_v9, %v656_v61  ;;  %v1472_v12 = vpop.f32.mrb[2].mxu0 }
 0x12d   : > { %1151 = vst.msk [vmem:[%s1852_s21 + $0x10] sm:$0xff] %vm312_vm2, %v1479_v5  ;;  %v1167_v14 = vadd.f32 %v1479_v5, %v1159_v4  ;;  %v1481_v16 = vadd.f32 %v1472_v12, %v1422_v0  ;;  %v1113_v17 = vpop.f32.mrb[3].mxu0 }
 0x12e   : > { %1149 = vst.msk [vmem:[%s1852_s21] sm:$0xff] %vm312_vm2, %v1480_v11  ;;  %v1165_v20 = vadd.f32 %v1480_v11, %v1157_v10  ;;  %v1482_v22 = vadd.f32 %v1113_v17, %v659_v2 }
 0x12f   : > { %1175 = vst.msk [vmem:[%s1859_s23 + $0x10] sm:$0xff] %vm312_vm2, %v1167_v14  ;;  %1152 = vst.msk [vmem:[%s1852_s21 + $0x18] sm:$0xff] %vm312_vm2, %v1481_v16  ;;  %v1168_v23 = vadd.f32 %v1481_v16, %v1160_v13 }
 0x130   : > { %1173 = vst.msk [vmem:[%s1859_s23] sm:$0xff] %vm312_vm2, %v1165_v20  ;;  %1150 = vst.msk [vmem:[%s1852_s21 + $0x8] sm:$0xff] %vm312_vm2, %v1482_v22  ;;  %v1166_v24 = vadd.f32 %v1482_v22, %v1158_v18 }
 0x131   : > { %1176 = vst.msk [vmem:[%s1859_s23 + $0x18] sm:$0xff] %vm312_vm2, %v1168_v23  ;;  %v1435_v25 = vpop.f32.mrb[4].mxu1 }
 0x132   : > { %1174 = vst.msk [vmem:[%s1859_s23 + $0x8] sm:$0xff] %vm312_vm2, %v1166_v24  ;;  %v1475_v26 = vpop.f32.mrb[4].mxu0  ;;  %v772_v30 = vpop.f32.mrb[5].mxu1 }
 0x133   : > { %v1483_v31 = vadd.f32 %v1475_v26, %v1435_v25  ;;  %v1126_v32 = vpop.f32.mrb[5].mxu0  ;;  %v1436_v34 = vpop.f32.mrb[6].mxu1 }
 0x134   : > { %v1484_v35 = vadd.f32 %v1126_v32, %v772_v30  ;;  %v1476_v36 = vpop.f32.mrb[6].mxu0  ;;  %v775_v38 = vpop.f32.mrb[7].mxu1 }
 0x135   : > { %1155 = vst.msk [vmem:[%s1852_s21 + $0x30] sm:$0xff] %vm312_vm2, %v1483_v31  ;;  %v1171_v39 = vadd.f32 %v1483_v31, %v1163_v27  ;;  %v1485_v6 = vadd.f32 %v1476_v36, %v1436_v34  ;;  %v1129_v7 = vpop.f32.mrb[7].mxu0 }
 0x136   : > { %1153 = vst.msk [vmem:[%s1852_s21 + $0x20] sm:$0xff] %vm312_vm2, %v1484_v35  ;;  %v1169_v42 = vadd.f32 %v1484_v35, %v1161_v33  ;;  %v1486_v44 = vadd.f32 %v1129_v7, %v775_v38 }
 0x137   : > { %1179 = vst.msk [vmem:[%s1859_s23 + $0x30] sm:$0xff] %vm312_vm2, %v1171_v39  ;;  %1156 = vst.msk [vmem:[%s1852_s21 + $0x38] sm:$0xff] %vm312_vm2, %v1485_v6  ;;  %v1172_v45 = vadd.f32 %v1485_v6, %v1164_v37 }
 0x138   : > { %1177 = vst.msk [vmem:[%s1859_s23 + $0x20] sm:$0xff] %vm312_vm2, %v1169_v42  ;;  %1154 = vst.msk [vmem:[%s1852_s21 + $0x28] sm:$0xff] %vm312_vm2, %v1486_v44  ;;  %v1170_v46 = vadd.f32 %v1486_v44, %v1162_v41 }
 0x139   : > { %1180 = vst.msk [vmem:[%s1859_s23 + $0x38] sm:$0xff] %vm312_vm2, %v1172_v45 }
 0x13a   : > { %1178 = vst.msk [vmem:[%s1859_s23 + $0x28] sm:$0xff] %vm312_vm2, %v1170_v46 }
 0x13b PF: > { %s15_s15 = sadd.s32 1, %s1568_s15  }
 0x13c   : > { %p12_p4 = scmp.ge.s32.totalorder %s15_s15, 4  }
 0x13e   :  { %14 = sbr.rel (!%p12_p4) target bundleno = 1 (0x1), region = 85 }

// kernel: _lambda_.8
= control target key start
LH: loop header
LB: loop body
LE: loop exit
PB: predicated region body
PF: predicated region fallthrough
CT: control target
= control target key end

     0   :  { %s1704_s21 = smov 0   ;;  %s2062_s0 = inlined_call_operand.vmem [shape: f32[2,10,10,8], index: 0, kind: input, shape index: {}]   ;;  %s2063_s1 = inlined_call_operand.vmem [shape: bf16[9,8,8], index: 1, kind: input, shape index: {}]   ;;  %s2064_s2 = inlined_call_operand.vmem [shape: f32[1,8], index: 2, kind: input, shape index: {}, may-alias: {2,4}]   ;;  %s2065_s3 = inlined_call_operand.vmem [shape: f32[1,8], index: 3, kind: input, shape index: {}, may-alias: {3,5}]   ;;  %s2066_s4 = inlined_call_operand.vmem [shape: f32[1,8], index: 4, kind: input, shape index: {}, may-alias: {2,4}]   ;;  %s2067_s5 = inlined_call_operand.vmem [shape: f32[1,8], index: 5, kind: input, shape index: {}, may-alias: {3,5}]   ;;  %s2068_s6 = inlined_call_operand.vmem [shape: f32[2,64,8], index: 6, kind: output, shape index: {}]  }
   0x1 LB: > { %s1380_s22 = sadd.s32 4294967295, %s1666_s21   ;;  %p1384_p0 = scmp.ge.s32.totalorder %s1666_s21, 1  ;;  %s1666_s21 = sphi %s1704_s21, %s16_s21  }
   0x2   : > { %p212_p1 = scmp.lt.s32.totalorder %s1666_s21, 3 }
   0x4   : > { %p213_p2 = pnand %p1384_p0, %p212_p1 }
   0x5   : > { %v1390_v0 = vld [vmem:[%s2063_s1 + $0x4] sm:$0xf] (!%p213_p2)  ;;  %vm455_vm0 = vcmask (!%p213_p2), 1043456   ;;  %v1718_v1 = vld [vmem:[%s2063_s1 + $0x10] sm:$0xf] (!%p213_p2)  ;;  %p242_p3 = scmp.lt.s32.totalorder (!%p213_p2), %s1380_s22, 1  ;;  %v347_v2 = vlaneseq (!%p213_p2) }
   0x6   : > { %216 = sbr.rel (%p213_p2) target bundleno = 333 (0x14d), region = 44  ;;  %1640 = vmatprep.subr.msk.bf16.mxu1 (!%p213_p2), %vm455_vm0, %v1390_v0  ;;  %1644 = vmatprep.subr.msk.bf16.mxu0 (!%p213_p2), %vm455_vm0, %v1718_v1  ;;  %v457_v3 = vsel (!%p213_p2), %vm455_vm0, %v1390_v0, 0  ;;  %v1726_v4 = vsel (!%p213_p2), %vm455_vm0, %v1718_v1, 0  ;;  %v386_v6 = vld [vmem:[%s2063_s1] sm:$0xf] (!%p213_p2)  ;;  %vm403_vm3 = vcmask (!%p213_p2), 1046528  }
   0x7   : > { %1485 = vmatpush3.bf16.msra.mxu1 (!%p213_p2), %v457_v3  ;;  %1525 = vmatpush3.bf16.msra.mxu0 (!%p213_p2), %v1726_v4  ;;  %v1731_v5 = vshrl.u32 (!%p213_p2), %v347_v2, 7  ;;  %v1414_v7 = vld [vmem:[%s2063_s1 + $0x14] sm:$0xf] (!%p213_p2)  ;;  %v1745_v8 = vld [vmem:[%s2064_s2] ss:$0 sm:$0xff] (!%p213_p2)  ;;  %v1668_v36 = vmov (!%p213_p2), 0.0  }
   0x8   : > { %1641 = vmatprep.subr.msk.bf16.mxu1 (!%p213_p2), %vm455_vm0, %v386_v6  ;;  %1646 = vmatprep.subr.msk.bf16.mxu0 (!%p213_p2), %vm455_vm0, %v1414_v7  ;;  %v1755_v9 = vld [vmem:[%s2065_s3] ss:$0 sm:$0xff] (!%p213_p2)  ;;  %v1788_v37 = vrot.slane (!%p213_p2), %v1668_v36, 1  ;;  %vm442_vm4 = vcmask (!%p213_p2), 64512   ;;  %v1809_v53 = vsel (!%p213_p2), %vm455_vm0, %v386_v6, 0  ;;  %v1812_v54 = vsel (!%p213_p2), %vm455_vm0, %v1414_v7, 0 }
   0x9   : > { %v1761_v13 = vadd.s32 (!%p213_p2), 8, %v1731_v5  ;;  %vm350_vm1 = vcmp.lt.s32.totalorder (!%p213_p2), %v1731_v5, 1  ;;  %vm604_vm5 = vcmask (!%p213_p2), 1045504  }
   0xb   : > { %vm357_vm2 = vcmp.gt.s32.totalorder (!%p213_p2), %v1761_v13, 8 }
   0xd   : > { %s2070_s22 = smov (!%p242_p3, %s1380_s22), 1 }
   0xe   : > { %s1650_s7 = smul.u32 160, %s2070_s22 }
  0x10   : > { %s1750_s12 = scalar_lea.vmem %s2062_s0, %s1650_s7  ;;  %s1438_s7 = sshll.u32 %s2070_s22, 6 }
  0x11   : > { %v255_v10 = vld [vmem:[%s1750_s12 + $0x10] sm:$0xff]  ;;  %v256_v11 = vld [vmem:[%s1750_s12 + $0x18] sm:$0x3]  ;;  %v269_v15 = vld [vmem:[%s1750_s12 + $0x80] sm:$0xff]  ;;  %s2041_s10 = scalar_lea.vmem %s2068_s6, %s1438_s7 }
  0x12   : > { %v267_v12 = vld [vmem:[%s1750_s12 + $0x70] sm:$0xff]  ;;  %v268_v14 = vld [vmem:[%s1750_s12 + $0x78] sm:$0x3]  ;;  %v270_v16 = vld [vmem:[%s1750_s12 + $0x88] sm:$0x3]  ;;  %v282_v17 = vmul.f32 %v1745_v8, %v255_v10  ;;  %v283_v18 = vmul.f32 %v1745_v8, %v256_v11  ;;  %v296_v21 = vmul.f32 %v1745_v8, %v269_v15 }
  0x13   : > { %v294_v19 = vmul.f32 %v1745_v8, %v267_v12  ;;  %v295_v20 = vmul.f32 %v1745_v8, %v268_v14  ;;  %v297_v22 = vmul.f32 %v1745_v8, %v270_v16  ;;  %v257_v25 = vld [vmem:[%s1750_s12 + $0x20] sm:$0xff]  ;;  %v258_v27 = vld [vmem:[%s1750_s12 + $0x28] sm:$0x3]  ;;  %v259_v28 = vld [vmem:[%s1750_s12 + $0x30] sm:$0xff] }
  0x14   : > { %v309_v23 = vadd.f32 %v1755_v9, %v282_v17  ;;  %v310_v24 = vadd.f32 %v1755_v9, %v283_v18  ;;  %v323_v30 = vadd.f32 %v1755_v9, %v296_v21  ;;  %v260_v33 = vld [vmem:[%s1750_s12 + $0x38] sm:$0x3]  ;;  %v261_v34 = vld [vmem:[%s1750_s12 + $0x40] sm:$0xff]  ;;  %v284_v38 = vmul.f32 %v1745_v8, %v257_v25  ;;  %v262_v41 = vld [vmem:[%s1750_s12 + $0x48] sm:$0x3] }
  0x15   : > { %v321_v26 = vadd.f32 %v1755_v9, %v294_v19  ;;  %v322_v29 = vadd.f32 %v1755_v9, %v295_v20  ;;  %v1785_v35 = vadd.f32 %v1755_v9, %v297_v22  ;;  %v285_v42 = vmul.f32 %v1745_v8, %v258_v27  ;;  %v263_v63 = vld [vmem:[%s1750_s12 + $0x50] sm:$0xff]  ;;  %v264_v14 = vld [vmem:[%s1750_s12 + $0x58] sm:$0x3] }
  0x16   : > { %v329_v31 = vmax.f32 %v309_v23, 0.0  ;;  %v330_v32 = vmax.f32 %v310_v24, 0.0  ;;  %v286_v43 = vmul.f32 %v1745_v8, %v259_v28  ;;  %v287_v46 = vmul.f32 %v1745_v8, %v260_v33 }
  0x17   : > { %v341_v44 = vmax.f32 %v321_v26, 0.0  ;;  %v288_v47 = vmul.f32 %v1745_v8, %v261_v34  ;;  %v342_v48 = vmax.f32 %v322_v29, 0.0  ;;  %v343_v49 = vmax.f32 %v323_v30, 0.0 }
  0x18   : > { %v1793_v39 = vsel %vm350_vm1, 0.0, %v329_v31  ;;  %v1797_v40 = vsel %vm357_vm2, 0.0, %v330_v32  ;;  %v289_v51 = vmul.f32 %v1745_v8, %v262_v41  ;;  %v311_v52 = vadd.f32 %v1755_v9, %v284_v38  ;;  %v265_v38 = vld [vmem:[%s1750_s12 + $0x60] sm:$0xff]  ;;  %v266_v41 = vld [vmem:[%s1750_s12 + $0x68] sm:$0x3] }
  0x19   : > { %v407_v45 = vrot.slane %v1793_v39, 1  ;;  %v408_v50 = vrot.slane %v1797_v40, 1  ;;  %v344_v55 = vmax.f32 %v1785_v35, 0.0  ;;  %v312_v57 = vadd.f32 %v1755_v9, %v285_v42 }
  0x1a   : > { %v313_v58 = vadd.f32 %v1755_v9, %v286_v43  ;;  %v1820_v59 = vsel %vm350_vm1, 0.0, %v341_v44  ;;  %v314_v61 = vadd.f32 %v1755_v9, %v287_v46  ;;  %v315_v62 = vadd.f32 %v1755_v9, %v288_v47 }
  0x1b   : > { %v409_v56 = vsel %vm403_vm3, %v407_v45, %v408_v50  ;;  %v1828_v0 = vsel %vm357_vm2, 0.0, %v342_v48  ;;  %v1832_v2 = vsel %vm350_vm1, 0.0, %v343_v49  ;;  %v316_v3 = vadd.f32 %v1755_v9, %v289_v51 }
  0x1c   : > { %v436_v60 = vpack.c.bf16 %v409_v56, %v1788_v37  ;;  %v331_v6 = vmax.f32 %v311_v52, 0.0  ;;  %v332_v7 = vmax.f32 %v312_v57, 0.0  ;;  %v333_v10 = vmax.f32 %v313_v58, 0.0  ;;  %v1399_v57 = vld [vmem:[%s2063_s1 + $0x8] sm:$0xf] }
  0x1d   : > { %v334_v11 = vmax.f32 %v314_v61, 0.0  ;;  %v335_v12 = vmax.f32 %v315_v62, 0.0  ;;  %v425_v15 = vrot.slane %v1820_v59, 1  ;;  %v336_v16 = vmax.f32 %v316_v3, 0.0 }
  0x1e   : > { %1486 = vmatprep.mubr.msk.bf16.mxu1 %vm442_vm4, %v436_v60  ;;  %v1840_v17 = vsel %vm350_vm1, 0.0, %v331_v6  ;;  %v290_v18 = vmul.f32 %v1745_v8, %v263_v63  ;;  %v367_v19 = vsel %vm357_vm2, 0.0, %v332_v7  ;;  %v1847_v20 = vsel %vm350_vm1, 0.0, %v333_v10 }
  0x1f   : > { %v369_v21 = vsel %vm357_vm2, 0.0, %v334_v11  ;;  %v1853_v22 = vsel %vm350_vm1, 0.0, %v335_v12  ;;  %v371_v23 = vsel %vm357_vm2, 0.0, %v336_v16  ;;  %v410_v24 = vrot.slane %v1840_v17, 1 }
  0x20   : > { %v411_v25 = vrot.slane %v367_v19, 1  ;;  %v291_v26 = vmul.f32 %v1745_v8, %v264_v14  ;;  %v413_v27 = vrot.slane %v1847_v20, 1  ;;  %v414_v28 = vrot.slane %v369_v21, 1 }
  0x21   : > { %v416_v29 = vrot.slane %v1853_v22, 1  ;;  %v417_v30 = vrot.slane %v371_v23, 1  ;;  %v426_v31 = vrot.slane %v1828_v0, 1  ;;  %v609_v32 = vrot.slane %v1797_v40, 2 }
  0x22   : > { %v412_v33 = vsel %vm403_vm3, %v410_v24, %v411_v25  ;;  %v612_v34 = vrot.slane %v367_v19, 2  ;;  %v415_v42 = vsel %vm403_vm3, %v413_v27, %v414_v28  ;;  %v615_v44 = vrot.slane %v369_v21, 2 }
  0x23   : > { %v418_v43 = vsel %vm403_vm3, %v416_v29, %v417_v30  ;;  %v831_v45 = vpack.c.bf16 %v412_v33, %v409_v56  ;;  %v1868_v46 = vpack.c.bf16 %v415_v42, %v412_v33  ;;  %v317_v48 = vadd.f32 %v1755_v9, %v290_v18  ;;  %v1419_v56 = vld [vmem:[%s2063_s1 + $0x18] sm:$0xf] }
  0x24   : > { %v832_v47 = vpack.c.bf16 %v418_v43, %v415_v42  ;;  %v318_v49 = vadd.f32 %v1755_v9, %v291_v26  ;;  %v292_v40 = vmul.f32 %v1745_v8, %v265_v38  ;;  %v293_v50 = vmul.f32 %v1745_v8, %v266_v41 }
  0x25   : > { %1526 = vmatprep.mubr.msk.bf16.mxu0 %vm442_vm4, %v831_v45  ;;  %v608_v51 = vrot.slane %v1793_v39, 2  ;;  %v611_v52 = vrot.slane %v1840_v17, 2  ;;  %v618_v58 = vrot.slane %v371_v23, 2  ;;  %1487 = vmatmul.mubr.msk.bf16.vlgmr.msra.gmra.mrb[0].mxu1 %vm442_vm4, %v1868_v46  ;;  %v337_v60 = vmax.f32 %v317_v48, 0.0 }
  0x26   : > { %1527 = vmatmul.mubr.msk.bf16.vlgmr.msra.gmra.mrb[0].mxu0 %vm442_vm4, %v832_v47  ;;  %v338_v8 = vmax.f32 %v318_v49, 0.0  ;;  %v614_v61 = vrot.slane %v1847_v20, 2  ;;  %1495 = vmatpush3.bf16.msra.mxu1 %v1809_v53  ;;  %v319_v62 = vadd.f32 %v1755_v9, %v292_v40  ;;  %v320_v63 = vadd.f32 %v1755_v9, %v293_v50 }
  0x27   : > { %1535 = vmatpush3.bf16.msra.mxu0 %v1812_v54  ;;  %v1892_v3 = vsel %vm604_vm5, %v608_v51, %v609_v32  ;;  %v617_v6 = vrot.slane %v1853_v22, 2  ;;  %v1899_v7 = vsel %vm357_vm2, 0.0, %v344_v55  ;;  %v1903_v53 = vsel %vm350_vm1, 0.0, %v337_v60  ;;  %1642 = vmatprep.subr.msk.bf16.mxu1 %vm455_vm0, %v1399_v57  ;;  %v1404_v51 = vld [vmem:[%s2063_s1 + $0xc] sm:$0xf] }
  0x28   : > { %v373_v54 = vsel %vm357_vm2, 0.0, %v338_v8  ;;  %v1908_v9 = vsel %vm604_vm5, %v611_v52, %v612_v34  ;;  %1647 = vmatprep.subr.msk.bf16.mxu0 %vm455_vm0, %v1419_v56  ;;  %v419_v35 = vrot.slane %v1903_v53, 1  ;;  %v339_v11 = vmax.f32 %v319_v62, 0.0  ;;  %v1429_v60 = vld [vmem:[%s2063_s1 + $0x20] sm:$0xf] }
  0x29   : > { %v420_v10 = vrot.slane %v373_v54, 1  ;;  %v340_v55 = vmax.f32 %v320_v63, 0.0  ;;  %v1914_v12 = vsel %vm403_vm3, %v425_v15, %v426_v31  ;;  %v616_v14 = vsel %vm604_vm5, %v614_v61, %v615_v44 }
  0x2a   : > { %v929_v16 = vpack.c.bf16 %v1908_v9, %v1892_v3  ;;  %v626_v18 = vrot.slane %v1820_v59, 2  ;;  %v1925_v21 = vsel %vm350_vm1, 0.0, %v339_v11  ;;  %v619_v15 = vsel %vm604_vm5, %v617_v6, %v618_v58 }
  0x2b   : > { %v1921_v19 = vsel %vm403_vm3, %v419_v35, %v420_v10  ;;  %v375_v23 = vsel %vm357_vm2, 0.0, %v340_v55  ;;  %v422_v25 = vrot.slane %v1925_v21, 1  ;;  %v620_v27 = vrot.slane %v1903_v53, 2  ;;  %v1434_v10 = vld [vmem:[%s2066_s4] ss:$0 sm:$0xff] }
  0x2c   : > { %v1931_v24 = vpack.c.bf16 %v1921_v19, %v418_v43  ;;  %v423_v26 = vrot.slane %v375_v23, 1  ;;  %1536 = vmatprep.mubr.msk.bf16.mxu0 %vm442_vm4, %v929_v16  ;;  %v382_v5 = vpack.c.bf16 %v1793_v39, %v1668_v36  ;;  %v621_v28 = vrot.slane %v373_v54, 2 }
  0x2d   : > { %v623_v29 = vrot.slane %v1925_v21, 2  ;;  %v624_v13 = vrot.slane %v375_v23, 2  ;;  %v930_v31 = vpack.c.bf16 %v619_v15, %v616_v14  ;;  %v627_v32 = vrot.slane %v1828_v0, 2  ;;  %v1424_v0 = vld [vmem:[%s2063_s1 + $0x1c] sm:$0xf] }
  0x2e   : > { %1490 = vmatprep.mubr.msk.bf16.mxu1 %vm442_vm4, %v1931_v24  ;;  %v1942_v30 = vsel %vm403_vm3, %v422_v25, %v423_v26  ;;  %v925_v33 = vrot.slane %v1832_v2, 2  ;;  %v622_v38 = vsel %vm604_vm5, %v620_v27, %v621_v28  ;;  %v926_v42 = vrot.slane %v1899_v7, 2 }
  0x2f   : > { %v439_v34 = vpack.c.bf16 %v1914_v12, %v1942_v30  ;;  %v625_v41 = vsel %vm604_vm5, %v623_v29, %v624_v13  ;;  %v1030_v43 = vsel %vm455_vm0, %v1419_v56, 0  ;;  %v628_v45 = vsel %vm604_vm5, %v626_v18, %v627_v32 }
  0x30   : > { %v931_v44 = vpack.c.bf16 %v625_v41, %v622_v38  ;;  %v927_v47 = vsel %vm604_vm5, %v925_v33, %v926_v42  ;;  %v383_v48 = vpack.c.bf16 %v1847_v20, %v1840_v17  ;;  %v656_v40 = vsel %vm455_vm0, %v1399_v57, 0 }
  0x31   : > { %1491 = vmatmul.mubr.msk.bf16.gmra.mrb[4].mxu1 %vm442_vm4, %v439_v34  ;;  %v932_v49 = vpack.c.bf16 %v927_v47, %v628_v45  ;;  %v384_v50 = vpack.c.bf16 %v1903_v53, %v1853_v22  ;;  %v605_v52 = vrot.slane %v1668_v36, 2  ;;  %v385_v56 = vpack.c.bf16 %v1820_v59, %v1925_v21 }
  0x32   : > { %1537 = vmatmul.mubr.msk.bf16.vlgmr.msra.gmra.mrb[0].mxu0 %vm442_vm4, %v930_v31  ;;  %1496 = vmatprep.mubr.msk.bf16.mxu1 %vm442_vm4, %v382_v5  ;;  %v1118_v58 = vsel %vm455_vm0, %v1424_v0, 0  ;;  %v638_v8 = vpack.c.bf16 %v616_v14, %v1908_v9  ;;  %v1023_v61 = vpack.c.bf16 %v1668_v36, %v1832_v2  ;;  %v750_v62 = vsel %vm455_vm0, %v1404_v51, 0  ;;  %v1435_v14 = vld [vmem:[%s2067_s5] ss:$0 sm:$0xff] }
  0x33   : > { %1545 = vmatpush3.bf16.msra.mxu0 %v1030_v43  ;;  %1540 = vmatprep.mubr.msk.bf16.mxu0 %vm442_vm4, %v931_v44  ;;  %v637_v57 = vpack.c.bf16 %v1892_v3, %v605_v52  ;;  %v639_v63 = vpack.c.bf16 %v622_v38, %v619_v15  ;;  %v640_v3 = vpack.c.bf16 %v628_v45, %v625_v41  ;;  %v827_v6 = vrot.slane %v1832_v2, 1 }
  0x34   : > { %1648 = vmatprep.subr.msk.bf16.mxu0 %vm455_vm0, %v1424_v0  ;;  %v731_v36 = vpack.c.bf16 %v1840_v17, %v1793_v39  ;;  %v828_v54 = vrot.slane %v1899_v7, 1  ;;  %v1204_v9 = vsel %vm455_vm0, %v1429_v60, 0  ;;  %v733_v17 = vpack.c.bf16 %v1925_v21, %v1903_v53 }
  0x35   : > { %v734_v7 = vpack.c.bf16 %v1832_v2, %v1820_v59 }
  0x39   : > { %1497 = vmatmul.mubr.msk.bf16.vlgmr.msra.gmra.mrb[0].mxu1 %vm442_vm4, %v383_v48 }
  0x3a   : > { %1505 = vmatpush3.bf16.msra.mxu1 %v656_v40  ;;  %1541 = vmatmul.mubr.msk.bf16.gmra.mrb[4].mxu0 %vm442_vm4, %v932_v49 }
  0x3b   : > { %1500 = vmatprep.mubr.msk.bf16.mxu1 %vm442_vm4, %v384_v50  ;;  %1546 = vmatprep.mubr.msk.bf16.mxu0 %vm442_vm4, %v383_v48 }
  0x3c   : > { %1643 = vmatprep.subr.msk.bf16.mxu1 %vm455_vm0, %v1404_v51 }
  0x41   : > { %1501 = vmatmul.mubr.msk.bf16.gmra.mrb[4].mxu1 %vm442_vm4, %v385_v56 }
  0x42   : > { %1547 = vmatmul.mubr.msk.bf16.vlgmr.msra.gmra.mrb[0].mxu0 %vm442_vm4, %v384_v50  ;;  %1506 = vmatprep.mubr.msk.bf16.mxu1 %vm442_vm4, %v637_v57 }
  0x43   : > { %1555 = vmatpush3.bf16.msra.mxu0 %v1118_v58  ;;  %1550 = vmatprep.mubr.msk.bf16.mxu0 %vm442_vm4, %v385_v56 }
  0x44   : > { %1649 = vmatprep.subr.msk.bf16.mxu0 %vm455_vm0, %v1429_v60 }
  0x49   : > { %1507 = vmatmul.mubr.msk.bf16.vlgmr.msra.gmra.mrb[0].mxu1 %vm442_vm4, %v638_v8 }
  0x4a   : > { %1515 = vmatpush3.bf16.msra.mxu1 %v750_v62  ;;  %1551 = vmatmul.mubr.msk.bf16.gmra.mrb[4].mxu0 %vm442_vm4, %v1023_v61 }
  0x4b   : > { %1510 = vmatprep.mubr.msk.bf16.mxu1 %vm442_vm4, %v639_v63  ;;  %1556 = vmatprep.mubr.msk.bf16.mxu0 %vm442_vm4, %v1868_v46  ;;  %v829_v46 = vsel %vm403_vm3, %v827_v6, %v828_v54 }
  0x4c   : > { %1645 = vmatprep.subr.msk.bf16.mxu1 %vm455_vm0, %v1718_v1  ;;  %v732_v1 = vpack.c.bf16 %v1853_v22, %v1847_v20  ;;  %v1111_v39 = vpack.c.bf16 %v1788_v37, %v829_v46  ;;  %v833_v20 = vpack.c.bf16 %v1942_v30, %v1921_v19  ;;  %v834_v37 = vpack.c.bf16 %v829_v46, %v1914_v12 }
  0x51   : > { %1511 = vmatmul.mubr.msk.bf16.gmra.mrb[4].mxu1 %vm442_vm4, %v640_v3 }
  0x52   : > { %1557 = vmatmul.mubr.msk.bf16.vlgmr.msra.gmra.mrb[0].mxu0 %vm442_vm4, %v1931_v24  ;;  %1516 = vmatprep.mubr.msk.bf16.mxu1 %vm442_vm4, %v731_v36 }
  0x53   : > { %1565 = vmatpush3.bf16.msra.mxu0 %v1204_v9  ;;  %1560 = vmatprep.mubr.msk.bf16.mxu0 %vm442_vm4, %v439_v34 }
  0x59   : > { %1517 = vmatmul.mubr.msk.bf16.vlgmr.msra.gmra.mrb[0].mxu1 %vm442_vm4, %v732_v1 }
  0x5a   : > { %1575 = vmatpush3.bf16.msra.mxu1 %v1726_v4  ;;  %1561 = vmatmul.mubr.msk.bf16.gmra.mrb[4].mxu0 %vm442_vm4, %v1111_v39  ;;  %v1197_v4 = vpack.c.bf16 %v605_v52, %v927_v47 }
  0x5b   : > { %1520 = vmatprep.mubr.msk.bf16.mxu1 %vm442_vm4, %v733_v17  ;;  %1566 = vmatprep.mubr.msk.bf16.mxu0 %vm442_vm4, %v638_v8 }
  0x61   : > { %1521 = vmatmul.mubr.msk.bf16.gmra.mrb[4].mxu1 %vm442_vm4, %v734_v7 }
  0x62   : > { %1567 = vmatmul.mubr.msk.bf16.vlgmr.msra.gmra.mrb[0].mxu0 %vm442_vm4, %v639_v63  ;;  %1530 = vmatprep.mubr.msk.bf16.mxu1 %vm442_vm4, %v833_v20 }
  0x63   : > { %1570 = vmatprep.mubr.msk.bf16.mxu0 %vm442_vm4, %v640_v3 }
  0x6a   : > { %1571 = vmatmul.mubr.msk.bf16.gmra.mrb[4].mxu0 %vm442_vm4, %v1197_v4 }
  0x6d   : > { %1531 = vmatmul.mubr.msk.bf16.vlgmr.msra.gmra.mrb[4].mxu1 %vm442_vm4, %v834_v37 }
 0x12c   : > { %v1518_v59 = vpop.f32.mrb[0].mxu1 }
 0x12d   : > { %v786_v2 = vpop.f32.mrb[1].mxu1 }
 0x12e   : > { %v1519_v22 = vpop.f32.mrb[2].mxu1 }
 0x12f   : > { %v789_v53 = vpop.f32.mrb[3].mxu1 }
 0x135   : > { %v1568_v35 = vpop.f32.mrb[0].mxu0 }
 0x136   : > { %v1576_v11 = vadd.f32 %v1568_v35, %v1518_v59  ;;  %v1240_v55 = vpop.f32.mrb[1].mxu0 }
 0x137   : > { %v1577_v12 = vadd.f32 %v1240_v55, %v786_v2  ;;  %v1569_v16 = vpop.f32.mrb[2].mxu0 }
 0x138   : > { %v1288_v18 = vmul.f32 %v1576_v11, %v1434_v10  ;;  %v1578_v19 = vadd.f32 %v1569_v16, %v1519_v22  ;;  %v1243_v21 = vpop.f32.mrb[3].mxu0 }
 0x139   : > { %v1286_v23 = vmul.f32 %v1577_v12, %v1434_v10  ;;  %v1579_v15 = vadd.f32 %v1243_v21, %v789_v53 }
 0x13a   : > { %v1303_v24 = vadd.f32 %v1435_v14, %v1288_v18  ;;  %v1289_v25 = vmul.f32 %v1578_v19, %v1434_v10 }
 0x13b   : > { %v1301_v26 = vadd.f32 %v1435_v14, %v1286_v23  ;;  %v1287_v27 = vmul.f32 %v1579_v15, %v1434_v10 }
 0x13c   : > { %v1311_v5 = vmax.f32 %v1303_v24, 0.0  ;;  %v1304_v28 = vadd.f32 %v1435_v14, %v1289_v25 }
 0x13d   : > { %v1309_v29 = vmax.f32 %v1301_v26, 0.0  ;;  %v1302_v13 = vadd.f32 %v1435_v14, %v1287_v27  ;;  %v1572_v30 = vpop.f32.mrb[4].mxu0 }
 0x13e   : > { %1319 = vst.msk [vmem:[%s2041_s10 + $0x10] sm:$0xff] %vm442_vm4, %v1311_v5  ;;  %v1312_v31 = vmax.f32 %v1304_v28, 0.0  ;;  %v1256_v32 = vpop.f32.mrb[5].mxu0 }
 0x13f   : > { %1317 = vst.msk [vmem:[%s2041_s10] sm:$0xff] %vm442_vm4, %v1309_v29  ;;  %v1310_v33 = vmax.f32 %v1302_v13, 0.0  ;;  %v1573_v34 = vpop.f32.mrb[6].mxu0 }
 0x140   : > { %1320 = vst.msk [vmem:[%s2041_s10 + $0x18] sm:$0xff] %vm442_vm4, %v1312_v31  ;;  %v1532_v38 = vpop.f32.mrb[4].mxu1  ;;  %v1259_v41 = vpop.f32.mrb[7].mxu0 }
 0x141   : > { %1318 = vst.msk [vmem:[%s2041_s10 + $0x8] sm:$0xff] %vm442_vm4, %v1310_v33  ;;  %v1580_v42 = vadd.f32 %v1572_v30, %v1532_v38  ;;  %v902_v43 = vpop.f32.mrb[5].mxu1 }
 0x142   : > { %v1581_v44 = vadd.f32 %v1256_v32, %v902_v43  ;;  %v1533_v0 = vpop.f32.mrb[6].mxu1 }
 0x143   : > { %v1292_v45 = vmul.f32 %v1580_v42, %v1434_v10  ;;  %v1582_v47 = vadd.f32 %v1573_v34, %v1533_v0  ;;  %v905_v48 = vpop.f32.mrb[7].mxu1 }
 0x144   : > { %v1290_v49 = vmul.f32 %v1581_v44, %v1434_v10  ;;  %v1583_v40 = vadd.f32 %v1259_v41, %v905_v48 }
 0x145   : > { %v1307_v50 = vadd.f32 %v1435_v14, %v1292_v45  ;;  %v1293_v51 = vmul.f32 %v1582_v47, %v1434_v10 }
 0x146   : > { %v1305_v52 = vadd.f32 %v1435_v14, %v1290_v49  ;;  %v1291_v56 = vmul.f32 %v1583_v40, %v1434_v10 }
 0x147   : > { %v1315_v57 = vmax.f32 %v1307_v50, 0.0  ;;  %v1308_v58 = vadd.f32 %v1435_v14, %v1293_v51 }
 0x148   : > { %v1313_v60 = vmax.f32 %v1305_v52, 0.0  ;;  %v1306_v8 = vadd.f32 %v1435_v14, %v1291_v56 }
 0x149   : > { %1323 = vst.msk [vmem:[%s2041_s10 + $0x30] sm:$0xff] %vm442_vm4, %v1315_v57  ;;  %v1316_v61 = vmax.f32 %v1308_v58, 0.0 }
 0x14a   : > { %1321 = vst.msk [vmem:[%s2041_s10 + $0x20] sm:$0xff] %vm442_vm4, %v1313_v60  ;;  %v1314_v62 = vmax.f32 %v1306_v8, 0.0 }
 0x14b   : > { %1324 = vst.msk [vmem:[%s2041_s10 + $0x38] sm:$0xff] %vm442_vm4, %v1316_v61 }
 0x14c   : > { %1322 = vst.msk [vmem:[%s2041_s10 + $0x28] sm:$0xff] %vm442_vm4, %v1314_v62 }
 0x14d PF: > { %s16_s21 = sadd.s32 1, %s1666_s21  }
 0x14e   : > { %p13_p4 = scmp.ge.s32.totalorder %s16_s21, 4  }
 0x150   :  { %15 = sbr.rel (!%p13_p4) target bundleno = 1 (0x1), region = 82 }

// kernel: _lambda_.6
= control target key start
LH: loop header
LB: loop body
LE: loop exit
PB: predicated region body
PF: predicated region fallthrough
CT: control target
= control target key end

     0   :  { %s2098_s27 = smov 0   ;;  %s2659_s0 = inlined_call_operand.vmem [shape: f32[2,36,9,4], index: 0, kind: input, shape index: {}]   ;;  %s2660_s1 = inlined_call_operand.vmem [shape: bf16[9,4,8], index: 1, kind: input, shape index: {}]   ;;  %s2661_s2 = inlined_call_operand.vmem [shape: f32[1,4], index: 2, kind: input, shape index: {}]   ;;  %s2662_s3 = inlined_call_operand.vmem [shape: f32[1,4], index: 3, kind: input, shape index: {}]   ;;  %s2663_s4 = inlined_call_operand.vmem [shape: f32[1,8], index: 4, kind: input, shape index: {}]   ;;  %s2664_s5 = inlined_call_operand.vmem [shape: f32[1,8], index: 5, kind: input, shape index: {}]   ;;  %s2665_s6 = inlined_call_operand.vmem [shape: bf16[4,8], index: 6, kind: input, shape index: {}]   ;;  %s2666_s7 = inlined_call_operand.vmem [shape: f32[2,64,8], index: 7, kind: output, shape index: {0}]   ;;  %s2667_s8 = inlined_call_operand.vmem [shape: f32[2,64,8], index: 8, kind: output, shape index: {1}]  }
   0x1 LB: > { %s1744_s28 = sadd.s32 4294967295, %s2050_s27   ;;  %p1748_p0 = scmp.ge.s32.totalorder %s2050_s27, 1  ;;  %s2050_s27 = sphi %s2098_s27, %s19_s27  }
   0x2   : > { %p265_p1 = scmp.lt.s32.totalorder %s2050_s27, 3 }
   0x4   : > { %p266_p2 = pnand %p1748_p0, %p265_p1 }
   0x5   : > { %vm622_vm0 = vcmask (!%p266_p2), 1041408   ;;  %v1775_v0 = vld [vmem:[%s2660_s1 + $0x8] sm:$0x3] (!%p266_p2)  ;;  %v1756_v1 = vld [vmem:[%s2660_s1 + $0x2] sm:$0x3] (!%p266_p2)  ;;  %p304_p3 = scmp.lt.s32.totalorder (!%p266_p2), %s1744_s28, 1  ;;  %v538_v7 = vlaneseq (!%p266_p2) }
   0x6   : > { %269 = sbr.rel (%p266_p2) target bundleno = 340 (0x154), region = 48  ;;  %2028 = vmatprep.subr.msk.bf16.mxu0 (!%p266_p2), %vm622_vm0, %v1775_v0  ;;  %2024 = vmatprep.subr.msk.bf16.mxu1 (!%p266_p2), %vm622_vm0, %v1756_v1  ;;  %v1027_v2 = vsel (!%p266_p2), %vm622_vm0, %v1775_v0, 0  ;;  %v624_v3 = vsel (!%p266_p2), %vm622_vm0, %v1756_v1, 0  ;;  %v2121_v4 = vld [vmem:[%s2660_s1 + $0xa] sm:$0x3] (!%p266_p2)  ;;  %vm609_vm1 = vcmask (!%p266_p2), 31744  }
   0x7   : > { %1901 = vmatpush3.bf16.msra.mxu0 (!%p266_p2), %v1027_v2  ;;  %1861 = vmatpush3.bf16.msra.mxu1 (!%p266_p2), %v624_v3  ;;  %v602_v5 = vld [vmem:[%s2660_s1] sm:$0x3] (!%p266_p2)  ;;  %v539_v24 = vshrl.u32 (!%p266_p2), %v538_v7, 7  ;;  %v2207_v61 = vld [vmem:[%s2660_s1 + $0x4] sm:$0x3] (!%p266_p2)  ;;  %v1169_v63 = vsel (!%p266_p2), %vm622_vm0, %v2121_v4, 0 }
   0x8   : > { %2029 = vmatprep.subr.msk.bf16.mxu0 (!%p266_p2), %vm622_vm0, %v2121_v4  ;;  %2025 = vmatprep.subr.msk.bf16.mxu1 (!%p266_p2), %vm622_vm0, %v602_v5  ;;  %v2133_v6 = vld [vmem:[%s2661_s2] ss:$0 sm:$0xff] (!%p266_p2)  ;;  %v704_v18 = vsel (!%p266_p2), %vm622_vm0, %v602_v5, 0  ;;  %v2226_v4 = vld [vmem:[%s2660_s1 + $0xc] sm:$0x3] (!%p266_p2)  ;;  %vm787_vm3 = vcmask (!%p266_p2), 1046528  }
   0x9   : > { %v2143_v8 = vld [vmem:[%s2662_s3] ss:$0 sm:$0xff] (!%p266_p2)  ;;  %v2188_v50 = vadd.s32 (!%p266_p2), 8, %v539_v24  ;;  %vm1570_vm4 = vcmask (!%p266_p2), 64512  }
   0xb   : > { %vm542_vm2 = vcmp.eq.s32.totalorder (!%p266_p2), %v2188_v50, 8 }
   0xd   : > { %s2679_s28 = smov (!%p304_p3, %s1744_s28), 1 }
   0xe   : > { %s2034_s15 = smul.u32 576, %s2679_s28 }
  0x10   : > { %s2138_s20 = scalar_lea.vmem %s2659_s0, %s2034_s15  ;;  %s1808_s15 = sshll.u32 %s2679_s28, 6 }
  0x11   : > { %v338_v9 = vld [vmem:[%s2138_s20 + $0x90] sm:$0xff]  ;;  %v339_v10 = vld [vmem:[%s2138_s20 + $0xa0] sm:$0xff]  ;;  %s2611_s18 = scalar_lea.vmem %s2667_s8, %s1808_s15  ;;  %s2630_s24 = scalar_lea.vmem %s2666_s7, %s1808_s15 }
  0x12   : > { %v340_v11 = vld [vmem:[%s2138_s20 + $0xb0] sm:$0xff]  ;;  %v396_v12 = vmul.f32 %v2133_v6, %v338_v9  ;;  %v397_v13 = vmul.f32 %v2133_v6, %v339_v10  ;;  %v364_v16 = vld [vmem:[%s2138_s20 + $0x1c0] sm:$0xff] }
  0x13   : > { %v398_v14 = vmul.f32 %v2133_v6, %v340_v11  ;;  %v363_v15 = vld [vmem:[%s2138_s20 + $0x1b0] sm:$0xff]  ;;  %v341_v17 = vld [vmem:[%s2138_s20 + $0xc0] sm:$0xff]  ;;  %v422_v20 = vmul.f32 %v2133_v6, %v364_v16 }
  0x14   : > { %v421_v19 = vmul.f32 %v2133_v6, %v363_v15  ;;  %v399_v21 = vmul.f32 %v2133_v6, %v341_v17  ;;  %v365_v22 = vld [vmem:[%s2138_s20 + $0x1d0] sm:$0xff]  ;;  %v366_v23 = vld [vmem:[%s2138_s20 + $0x1e0] sm:$0xff]  ;;  %v454_v25 = vadd.f32 %v2143_v8, %v396_v12  ;;  %v2162_v26 = vadd.f32 %v2143_v8, %v397_v13 }
  0x15   : > { %v2165_v27 = vadd.f32 %v2143_v8, %v398_v14  ;;  %v423_v28 = vmul.f32 %v2133_v6, %v365_v22  ;;  %v480_v30 = vadd.f32 %v2143_v8, %v422_v20  ;;  %v424_v32 = vmul.f32 %v2133_v6, %v366_v23  ;;  %v342_v33 = vld [vmem:[%s2138_s20 + $0xd0] sm:$0xff]  ;;  %v343_v38 = vld [vmem:[%s2138_s20 + $0xe0] sm:$0xff] }
  0x16   : > { %v479_v29 = vadd.f32 %v2143_v8, %v421_v19  ;;  %v2171_v31 = vadd.f32 %v2143_v8, %v399_v21  ;;  %v505_v34 = vmax.f32 %v454_v25, 0.0  ;;  %v506_v35 = vmax.f32 %v2162_v26, 0.0  ;;  %v367_v43 = vld [vmem:[%s2138_s20 + $0x1f0] sm:$0xff]  ;;  %v368_v44 = vld [vmem:[%s2138_s20 + $0x200] sm:$0xff]  ;;  %v348_v19 = vld [vmem:[%s2138_s20 + $0x128] sm:$0x1] }
  0x17   : > { %v507_v36 = vmax.f32 %v2165_v27, 0.0  ;;  %v481_v37 = vadd.f32 %v2143_v8, %v423_v28  ;;  %v531_v40 = vmax.f32 %v480_v30, 0.0  ;;  %v482_v42 = vadd.f32 %v2143_v8, %v424_v32  ;;  %v344_v45 = vld [vmem:[%s2138_s20 + $0xf0] sm:$0xff]  ;;  %v345_v49 = vld [vmem:[%s2138_s20 + $0x100] sm:$0xff]  ;;  %v350_v25 = vld [vmem:[%s2138_s20 + $0x138] sm:$0x1] }
  0x18   : > { %v530_v39 = vmax.f32 %v479_v29, 0.0  ;;  %v508_v41 = vmax.f32 %v2171_v31, 0.0  ;;  %v603_v46 = vpack.c.bf16 %v506_v35, %v505_v34  ;;  %v400_v48 = vmul.f32 %v2133_v6, %v342_v33  ;;  %v369_v59 = vld [vmem:[%s2138_s20 + $0x210] sm:$0xff]  ;;  %v370_v60 = vld [vmem:[%s2138_s20 + $0x220] sm:$0xff] }
  0x19   : > { %v532_v47 = vmax.f32 %v481_v37, 0.0  ;;  %v533_v53 = vmax.f32 %v482_v42, 0.0  ;;  %v401_v54 = vmul.f32 %v2133_v6, %v343_v38  ;;  %v425_v56 = vmul.f32 %v2133_v6, %v367_v43  ;;  %v320_v13 = vld [vmem:[%s2138_s20] sm:$0xff]  ;;  %v322_v14 = vld [vmem:[%s2138_s20 + $0x10] sm:$0xff] }
  0x1a   : > { %v1008_v51 = vpack.c.bf16 %v531_v40, %v530_v39  ;;  %v604_v52 = vpack.c.bf16 %v508_v41, %v507_v36  ;;  %1862 = vmatprep.mubr.msk.bf16.mxu1 %vm609_vm1, %v603_v46  ;;  %v2197_v55 = vadd.f32 %v2143_v8, %v400_v48  ;;  %v426_v57 = vmul.f32 %v2133_v6, %v368_v44  ;;  %v347_v15 = vld [vmem:[%s2138_s20 + $0x120] sm:$0xff]  ;;  %v349_v24 = vld [vmem:[%s2138_s20 + $0x130] sm:$0xff] }
  0x1b   : > { %v402_v58 = vmul.f32 %v2133_v6, %v344_v45  ;;  %v1009_v62 = vpack.c.bf16 %v533_v53, %v532_v47  ;;  %v2214_v0 = vadd.f32 %v2143_v8, %v401_v54  ;;  %v403_v1 = vmul.f32 %v2133_v6, %v345_v49  ;;  %v324_v33 = vld [vmem:[%s2138_s20 + $0x20] sm:$0xff]  ;;  %v326_v45 = vld [vmem:[%s2138_s20 + $0x30] sm:$0xff] }
  0x1c   : > { %1902 = vmatprep.mubr.msk.bf16.mxu0 %vm609_vm1, %v1008_v51  ;;  %1863 = vmatmul.mubr.msk.bf16.vlgmr.msra.gmra.mrb[0].mxu1 %vm609_vm1, %v604_v52  ;;  %v509_v2 = vmax.f32 %v2197_v55, 0.0  ;;  %v483_v3 = vadd.f32 %v2143_v8, %v425_v56  ;;  %v484_v5 = vadd.f32 %v2143_v8, %v426_v57  ;;  %v427_v11 = vmul.f32 %v2133_v6, %v369_v59 }
  0x1d   : > { %v2221_v7 = vadd.f32 %v2143_v8, %v402_v58  ;;  %1871 = vmatpush3.bf16.msra.mxu1 %v704_v18  ;;  %1903 = vmatmul.mubr.msk.bf16.vlgmr.msra.gmra.mrb[0].mxu0 %vm609_vm1, %v1009_v62  ;;  %v2672_v9 = vmax.f32 %v2214_v0, 0.0  ;;  %v2231_v10 = vadd.f32 %v2143_v8, %v403_v1  ;;  %v428_v12 = vmul.f32 %v2133_v6, %v370_v60  ;;  %v351_v60 = vld [vmem:[%s2138_s20 + $0x140] sm:$0xff] }
  0x1e   : > { %2026 = vmatprep.subr.msk.bf16.mxu1 %vm622_vm0, %v2207_v61  ;;  %1911 = vmatpush3.bf16.msra.mxu0 %v1169_v63  ;;  %v534_v16 = vmax.f32 %v483_v3, 0.0  ;;  %v535_v17 = vmax.f32 %v484_v5, 0.0  ;;  %v485_v22 = vadd.f32 %v2143_v8, %v427_v11  ;;  %v378_v29 = vmul.f32 %v2133_v6, %v320_v13  ;;  %v352_v3 = vld [vmem:[%s2138_s20 + $0x148] sm:$0x1]  ;;  %v353_v5 = vld [vmem:[%s2138_s20 + $0x150] sm:$0xff] }
  0x1f   : > { %v2671_v18 = vmax.f32 %v2221_v7, 0.0  ;;  %v605_v20 = vpack.c.bf16 %v2672_v9, %v509_v2  ;;  %v2668_v21 = vmax.f32 %v2231_v10, 0.0  ;;  %v486_v23 = vadd.f32 %v2143_v8, %v428_v12  ;;  %2030 = vmatprep.subr.msk.bf16.mxu0 %vm622_vm0, %v2226_v4  ;;  %v335_v9 = vld [vmem:[%s2138_s20 + $0x78] sm:$0x1] }
  0x20   : > { %v1010_v28 = vpack.c.bf16 %v535_v17, %v534_v16  ;;  %v380_v30 = vmul.f32 %v2133_v6, %v322_v14  ;;  %v405_v32 = vmul.f32 %v2133_v6, %v347_v15  ;;  %v536_v37 = vmax.f32 %v485_v22, 0.0  ;;  %v354_v16 = vld [vmem:[%s2138_s20 + $0x158] sm:$0x1]  ;;  %v328_v17 = vld [vmem:[%s2138_s20 + $0x40] sm:$0xff] }
  0x21   : > { %1866 = vmatprep.mubr.msk.bf16.mxu1 %vm609_vm1, %v605_v20  ;;  %v606_v34 = vpack.c.bf16 %v2668_v21, %v2671_v18  ;;  %v537_v38 = vmax.f32 %v486_v23, 0.0  ;;  %v406_v39 = vmul.f32 %v2133_v6, %v348_v19  ;;  %v2266_v40 = vadd.f32 %v2143_v8, %v378_v29  ;;  %v330_v29 = vld [vmem:[%s2138_s20 + $0x50] sm:$0xff] }
  0x22   : > { %1906 = vmatprep.mubr.msk.bf16.mxu0 %vm609_vm1, %v1010_v28  ;;  %v438_v42 = vadd.f32 %v2143_v8, %v380_v30  ;;  %v407_v43 = vmul.f32 %v2133_v6, %v349_v24  ;;  %v408_v44 = vmul.f32 %v2133_v6, %v350_v25  ;;  %v2274_v47 = vadd.f32 %v2143_v8, %v405_v32 }
  0x23   : > { %v1011_v46 = vpack.c.bf16 %v537_v38, %v536_v37  ;;  %v464_v48 = vadd.f32 %v2143_v8, %v406_v39  ;;  %v382_v49 = vmul.f32 %v2133_v6, %v324_v33  ;;  %v487_v51 = vmax.f32 %v2266_v40, 0.0  ;;  %v355_v37 = vld [vmem:[%s2138_s20 + $0x160] sm:$0xff] }
  0x24   : > { %1867 = vmatmul.mubr.msk.bf16.gmra.mrb[4].mxu1 %vm609_vm1, %v606_v34  ;;  %v2279_v52 = vmax.f32 %v438_v42, 0.0  ;;  %v2282_v53 = vadd.f32 %v2143_v8, %v407_v43  ;;  %v466_v54 = vadd.f32 %v2143_v8, %v408_v44  ;;  %v514_v56 = vmax.f32 %v2274_v47, 0.0  ;;  %v356_v44 = vld [vmem:[%s2138_s20 + $0x168] sm:$0x1] }
  0x25   : > { %1907 = vmatmul.mubr.msk.bf16.gmra.mrb[4].mxu0 %vm609_vm1, %v1011_v46  ;;  %v515_v57 = vmax.f32 %v464_v48, 0.0  ;;  %v384_v58 = vmul.f32 %v2133_v6, %v326_v45  ;;  %v440_v59 = vadd.f32 %v2143_v8, %v382_v49  ;;  %v839_v11 = vsel %vm622_vm0, %v2207_v61, 0 }
  0x26   : > { %v2293_v62 = vpack.c.bf16 %v2279_v52, %v487_v51  ;;  %v516_v63 = vmax.f32 %v2282_v53, 0.0  ;;  %v517_v1 = vmax.f32 %v466_v54, 0.0  ;;  %v1118_v13 = vrot.slane %v514_v56, 1  ;;  %v357_v54 = vld [vmem:[%s2138_s20 + $0x170] sm:$0xff] }
  0x27   : > { %v575_v12 = vsel %vm542_vm2, 0.0, %v515_v57  ;;  %v442_v14 = vadd.f32 %v2143_v8, %v384_v58  ;;  %v2305_v15 = vmax.f32 %v440_v59, 0.0  ;;  %v409_v22 = vmul.f32 %v2133_v6, %v351_v60  ;;  %v2345_v57 = vld [vmem:[%s2660_s1 + $0x6] sm:$0x3] }
  0x28   : > { %1872 = vmatprep.mubr.msk.bf16.mxu1 %vm609_vm1, %v2293_v62  ;;  %v577_v61 = vsel %vm542_vm2, 0.0, %v517_v1  ;;  %v1119_v19 = vrot.slane %v575_v12, 1  ;;  %v1121_v20 = vrot.slane %v516_v63, 1  ;;  %v410_v25 = vmul.f32 %v2133_v6, %v352_v3  ;;  %v358_v1 = vld [vmem:[%s2138_s20 + $0x178] sm:$0x1] }
  0x29   : > { %v1122_v23 = vrot.slane %v577_v61, 1  ;;  %v2316_v24 = vmax.f32 %v442_v14, 0.0  ;;  %v411_v28 = vmul.f32 %v2133_v6, %v353_v5  ;;  %v412_v32 = vmul.f32 %v2133_v6, %v354_v16 }
  0x2a   : > { %v1120_v30 = vsel %vm787_vm3, %v1118_v13, %v1119_v19  ;;  %v2324_v33 = vadd.f32 %v2143_v8, %v409_v22  ;;  %v386_v34 = vmul.f32 %v2133_v6, %v328_v17  ;;  %v468_v42 = vadd.f32 %v2143_v8, %v410_v25  ;;  %v332_v25 = vld [vmem:[%s2138_s20 + $0x60] sm:$0xff] }
  0x2b   : > { %v1123_v38 = vsel %vm787_vm3, %v1121_v20, %v1122_v23  ;;  %v2331_v39 = vpack.c.bf16 %v2316_v24, %v2305_v15  ;;  %v2335_v43 = vadd.f32 %v2143_v8, %v411_v28  ;;  %v470_v46 = vadd.f32 %v2143_v8, %v412_v32 }
  0x2c   : > { %v1150_v45 = vpack.c.bf16 %v1123_v38, %v1120_v30  ;;  %v518_v48 = vmax.f32 %v2324_v33, 0.0  ;;  %v388_v49 = vmul.f32 %v2133_v6, %v330_v29  ;;  %v519_v58 = vmax.f32 %v468_v42, 0.0 }
  0x2d   : > { %1873 = vmatmul.mubr.msk.bf16.vlgmr.msra.gmra.mrb[0].mxu1 %vm609_vm1, %v2331_v39  ;;  %v520_v59 = vmax.f32 %v2335_v43, 0.0  ;;  %v444_v60 = vadd.f32 %v2143_v8, %v386_v34  ;;  %v413_v3 = vmul.f32 %v2133_v6, %v355_v37  ;;  %v521_v5 = vmax.f32 %v470_v46, 0.0  ;;  %v334_v34 = vld [vmem:[%s2138_s20 + $0x70] sm:$0xff] }
  0x2e   : > { %1912 = vmatprep.mubr.msk.bf16.mxu0 %vm609_vm1, %v1150_v45  ;;  %v1124_v12 = vrot.slane %v518_v48, 1  ;;  %v446_v13 = vadd.f32 %v2143_v8, %v388_v49  ;;  %v414_v14 = vmul.f32 %v2133_v6, %v356_v44  ;;  %1881 = vmatpush3.bf16.msra.mxu1 %v839_v11  ;;  %v579_v16 = vsel %vm542_vm2, 0.0, %v519_v58 }
  0x2f   : > { %v1127_v17 = vrot.slane %v520_v59, 1  ;;  %v2362_v61 = vmax.f32 %v444_v60, 0.0  ;;  %v415_v19 = vmul.f32 %v2133_v6, %v357_v54  ;;  %2027 = vmatprep.subr.msk.bf16.mxu1 %vm622_vm0, %v2345_v57  ;;  %v581_v20 = vsel %vm542_vm2, 0.0, %v521_v5  ;;  %v360_v5 = vld [vmem:[%s2138_s20 + $0x188] sm:$0x1] }
  0x30   : > { %v1125_v22 = vrot.slane %v579_v16, 1  ;;  %v2369_v23 = vmax.f32 %v446_v13, 0.0  ;;  %v416_v11 = vmul.f32 %v2133_v6, %v358_v1  ;;  %v1128_v28 = vrot.slane %v581_v20, 1  ;;  %v2409_v20 = vld [vmem:[%s2660_s1 + $0xe] sm:$0x3] }
  0x31   : > { %v1263_v29 = vsel %vm622_vm0, %v2226_v4, 0  ;;  %v2376_v30 = vadd.f32 %v2143_v8, %v413_v3  ;;  %v472_v32 = vadd.f32 %v2143_v8, %v414_v14  ;;  %v2386_v42 = vadd.f32 %v2143_v8, %v415_v19  ;;  %v359_v4 = vld [vmem:[%s2138_s20 + $0x180] sm:$0xff] }
  0x32   : > { %v1126_v37 = vsel %vm787_vm3, %v1124_v12, %v1125_v22  ;;  %v2383_v38 = vpack.c.bf16 %v2369_v23, %v2362_v61  ;;  %v474_v44 = vadd.f32 %v2143_v8, %v416_v11  ;;  %v1129_v45 = vsel %vm787_vm3, %v1127_v17, %v1128_v28  ;;  %v361_v12 = vld [vmem:[%s2138_s20 + $0x190] sm:$0xff]  ;;  %v362_v17 = vld [vmem:[%s2138_s20 + $0x198] sm:$0x1] }
  0x33   : > { %v522_v46 = vmax.f32 %v2376_v30, 0.0  ;;  %v523_v49 = vmax.f32 %v472_v32, 0.0  ;;  %v390_v54 = vmul.f32 %v2133_v6, %v332_v25  ;;  %v1151_v58 = vpack.c.bf16 %v1129_v45, %v1126_v37  ;;  %v321_v32 = vld [vmem:[%s2138_s20 + $0x8] sm:$0x1] }
  0x34   : > { %1876 = vmatprep.mubr.msk.bf16.mxu1 %vm609_vm1, %v2383_v38  ;;  %v524_v60 = vmax.f32 %v2386_v42, 0.0  ;;  %v525_v1 = vmax.f32 %v474_v44, 0.0  ;;  %v392_v3 = vmul.f32 %v2133_v6, %v334_v34  ;;  %v417_v19 = vmul.f32 %v2133_v6, %v359_v4 }
  0x35   : > { %v583_v13 = vsel %vm542_vm2, 0.0, %v523_v49  ;;  %v1130_v14 = vrot.slane %v522_v46, 1  ;;  %v448_v16 = vadd.f32 %v2143_v8, %v390_v54  ;;  %1913 = vmatmul.mubr.msk.bf16.vlgmr.msra.gmra.mrb[0].mxu0 %vm609_vm1, %v1151_v58  ;;  %v418_v44 = vmul.f32 %v2133_v6, %v360_v5 }
  0x36   : > { %v585_v22 = vsel %vm542_vm2, 0.0, %v525_v1  ;;  %v1131_v11 = vrot.slane %v583_v13, 1  ;;  %v1133_v25 = vrot.slane %v524_v60, 1  ;;  %v450_v28 = vadd.f32 %v2143_v8, %v392_v3  ;;  %1921 = vmatpush3.bf16.msra.mxu0 %v1263_v29  ;;  %v323_v1 = vld [vmem:[%s2138_s20 + $0x18] sm:$0x1] }
  0x37   : > { %v1134_v34 = vrot.slane %v585_v22, 1  ;;  %v2418_v37 = vmax.f32 %v448_v16, 0.0  ;;  %v419_v4 = vmul.f32 %v2133_v6, %v361_v12  ;;  %v420_v54 = vmul.f32 %v2133_v6, %v362_v17  ;;  %2031 = vmatprep.subr.msk.bf16.mxu0 %vm622_vm0, %v2409_v20 }
  0x38   : > { %v1132_v45 = vsel %vm787_vm3, %v1130_v14, %v1131_v11  ;;  %v2423_v49 = vmax.f32 %v450_v28, 0.0  ;;  %v2427_v58 = vadd.f32 %v2143_v8, %v417_v19  ;;  %v476_v3 = vadd.f32 %v2143_v8, %v418_v44  ;;  %v325_v28 = vld [vmem:[%s2138_s20 + $0x28] sm:$0x1] }
  0x39   : > { %v1135_v29 = vsel %vm787_vm3, %v1133_v25, %v1134_v34  ;;  %v2435_v5 = vadd.f32 %v2143_v8, %v419_v4  ;;  %v379_v12 = vmul.f32 %v2133_v6, %v321_v32  ;;  %v478_v16 = vadd.f32 %v2143_v8, %v420_v54  ;;  %v327_v34 = vld [vmem:[%s2138_s20 + $0x38] sm:$0x1] }
  0x3a   : > { %v1152_v13 = vpack.c.bf16 %v1135_v29, %v1132_v45  ;;  %v2440_v14 = vpack.c.bf16 %v2423_v49, %v2418_v37  ;;  %v2670_v17 = vmax.f32 %v2427_v58, 0.0  ;;  %v527_v19 = vmax.f32 %v476_v3, 0.0 }
  0x3b   : > { %v2669_v22 = vmax.f32 %v2435_v5, 0.0  ;;  %v381_v11 = vmul.f32 %v2133_v6, %v323_v1  ;;  %v437_v25 = vadd.f32 %v2143_v8, %v379_v12  ;;  %v788_v32 = vrot.slane %v487_v51, 1 }
  0x3c   : > { %1916 = vmatprep.mubr.msk.bf16.mxu0 %vm609_vm1, %v1152_v13  ;;  %1877 = vmatmul.mubr.msk.bf16.gmra.mrb[4].mxu1 %vm609_vm1, %v2440_v14  ;;  %v529_v44 = vmax.f32 %v478_v16, 0.0  ;;  %v1136_v4 = vrot.slane %v2670_v17, 1  ;;  %v2458_v45 = vsel %vm622_vm0, %v2345_v57, 0  ;;  %v587_v54 = vsel %vm542_vm2, 0.0, %v527_v19  ;;  %v329_v57 = vld [vmem:[%s2138_s20 + $0x48] sm:$0x1] }
  0x3d   : > { %v1139_v40 = vrot.slane %v2669_v22, 1  ;;  %v439_v51 = vadd.f32 %v2143_v8, %v381_v11  ;;  %v488_v1 = vmax.f32 %v437_v25, 0.0  ;;  %v1137_v3 = vrot.slane %v587_v54, 1 }
  0x3e   : > { %v589_v29 = vsel %vm542_vm2, 0.0, %v529_v44  ;;  %v383_v12 = vmul.f32 %v2133_v6, %v325_v28  ;;  %v385_v13 = vmul.f32 %v2133_v6, %v327_v34  ;;  %v791_v22 = vrot.slane %v2279_v52, 1  ;;  %v331_v28 = vld [vmem:[%s2138_s20 + $0x58] sm:$0x1] }
  0x3f   : > { %v1140_v16 = vrot.slane %v589_v29, 1  ;;  %v490_v21 = vmax.f32 %v439_v51, 0.0  ;;  %v548_v19 = vsel %vm542_vm2, 0.0, %v488_v1  ;;  %v1138_v17 = vsel %vm787_vm3, %v1136_v4, %v1137_v3 }
  0x40   : > { %v789_v11 = vrot.slane %v548_v19, 1  ;;  %v441_v25 = vadd.f32 %v2143_v8, %v383_v12  ;;  %v443_v44 = vadd.f32 %v2143_v8, %v385_v13  ;;  %v1244_v51 = vpack.c.bf16 %v2305_v15, %v2279_v52 }
  0x41   : > { %v1141_v34 = vsel %vm787_vm3, %v1139_v40, %v1140_v16  ;;  %v550_v54 = vsel %vm542_vm2, 0.0, %v490_v21  ;;  %v387_v1 = vmul.f32 %v2133_v6, %v329_v57  ;;  %v794_v18 = vrot.slane %v2305_v15, 1  ;;  %v333_v16 = vld [vmem:[%s2138_s20 + $0x68] sm:$0x1] }
  0x42   : > { %v1153_v29 = vpack.c.bf16 %v1141_v34, %v1138_v17  ;;  %v790_v4 = vsel %vm787_vm3, %v788_v32, %v789_v11  ;;  %v792_v3 = vrot.slane %v550_v54, 1  ;;  %v492_v19 = vmax.f32 %v441_v25, 0.0 }
  0x43   : > { %v494_v12 = vmax.f32 %v443_v44, 0.0  ;;  %v389_v13 = vmul.f32 %v2133_v6, %v331_v28  ;;  %v445_v40 = vadd.f32 %v2143_v8, %v387_v1  ;;  %v1245_v21 = vpack.c.bf16 %v2362_v61, %v2316_v24 }
  0x44   : > { %1917 = vmatmul.mubr.msk.bf16.gmra.mrb[4].mxu0 %vm609_vm1, %v1153_v29  ;;  %v2493_v52 = vsel %vm787_vm3, %v791_v22, %v792_v3  ;;  %v552_v17 = vsel %vm542_vm2, 0.0, %v492_v19  ;;  %v797_v32 = vrot.slane %v2316_v24, 1  ;;  %v391_v22 = vmul.f32 %v2133_v6, %v333_v16 }
  0x45   : > { %v820_v15 = vpack.c.bf16 %v2493_v52, %v790_v4  ;;  %1922 = vmatprep.mubr.msk.bf16.mxu0 %vm609_vm1, %v1244_v51  ;;  %v554_v57 = vsel %vm542_vm2, 0.0, %v494_v12  ;;  %v795_v11 = vrot.slane %v552_v17, 1  ;;  %v447_v25 = vadd.f32 %v2143_v8, %v389_v13 }
  0x46   : > { %v798_v44 = vrot.slane %v554_v57, 1  ;;  %v496_v28 = vmax.f32 %v445_v40, 0.0  ;;  %v393_v34 = vmul.f32 %v2133_v6, %v335_v9  ;;  %v800_v51 = vrot.slane %v2362_v61, 1 }
  0x47   : > { %1882 = vmatprep.mubr.msk.bf16.mxu1 %vm609_vm1, %v820_v15  ;;  %v2507_v24 = vsel %vm787_vm3, %v794_v18, %v795_v11  ;;  %v498_v54 = vmax.f32 %v447_v25, 0.0  ;;  %v803_v1 = vrot.slane %v2369_v23, 1  ;;  %v449_v3 = vadd.f32 %v2143_v8, %v391_v22  ;;  %v1795_v15 = vld [vmem:[%s2660_s1 + $0x10] sm:$0x3] }
  0x48   : > { %v2512_v29 = vsel %vm787_vm3, %v797_v32, %v798_v44  ;;  %v556_v4 = vsel %vm542_vm2, 0.0, %v496_v28  ;;  %v451_v6 = vadd.f32 %v2143_v8, %v393_v34  ;;  %v1246_v61 = vpack.c.bf16 %v2418_v37, %v2369_v23  ;;  %v1579_v23 = vld [vmem:[%s2665_s6] sm:$0x3] }
  0x49   : > { %v821_v9 = vpack.c.bf16 %v2512_v29, %v2507_v24  ;;  %v558_v18 = vsel %vm542_vm2, 0.0, %v498_v54  ;;  %v801_v19 = vrot.slane %v556_v4, 1  ;;  %v1357_v12 = vsel %vm622_vm0, %v2409_v20, 0 }
  0x4a   : > { %v804_v13 = vrot.slane %v558_v18, 1  ;;  %v500_v40 = vmax.f32 %v449_v3, 0.0  ;;  %v502_v16 = vmax.f32 %v451_v6, 0.0  ;;  %v806_v17 = vrot.slane %v2418_v37, 1 }
  0x4b   : > { %1883 = vmatmul.mubr.msk.bf16.vlgmr.msra.gmra.mrb[0].mxu1 %vm609_vm1, %v821_v9  ;;  %v802_v8 = vsel %vm787_vm3, %v800_v51, %v801_v19  ;;  %v809_v32 = vrot.slane %v2423_v49, 1  ;;  %v2052_v22 = vmov 0.0   ;;  %v914_v34 = vpack.c.bf16 %v516_v63, %v514_v56 }
  0x4c   : > { %1923 = vmatmul.mubr.msk.bf16.vlgmr.msra.gmra.mrb[0].mxu0 %vm609_vm1, %v1245_v21  ;;  %v805_v20 = vsel %vm787_vm3, %v803_v1, %v804_v13  ;;  %v560_v57 = vsel %vm542_vm2, 0.0, %v500_v40  ;;  %v562_v37 = vsel %vm542_vm2, 0.0, %v502_v16  ;;  %1891 = vmatpush3.bf16.msra.mxu1 %v2458_v45  ;;  %v1247_v45 = vpack.c.bf16 %v2052_v22, %v2423_v49  ;;  %v1801_v1 = vld [vmem:[%s2664_s5] ss:$0 sm:$0xff] }
  0x4d   : > { %1931 = vmatpush3.bf16.msra.mxu0 %v1357_v12  ;;  %v822_v11 = vpack.c.bf16 %v805_v20, %v802_v8  ;;  %1926 = vmatprep.mubr.msk.bf16.mxu0 %vm609_vm1, %v1246_v61  ;;  %v807_v25 = vrot.slane %v560_v57, 1  ;;  %v810_v44 = vrot.slane %v562_v37, 1  ;;  %v1338_v54 = vpack.c.bf16 %v507_v36, %v506_v35 }
  0x4e   : > { %2032 = vmatprep.subr.msk.bf16.mxu0 %vm622_vm0, %v1795_v15  ;;  %2033 = vmatprep.subr.msk.bf16.mxu1 %vm622_vm0, %v1579_v23  ;;  %v915_v47 = vpack.c.bf16 %v520_v59, %v518_v48  ;;  %v1339_v26 = vpack.c.bf16 %v509_v2, %v508_v41  ;;  %v916_v27 = vpack.c.bf16 %v524_v60, %v522_v46  ;;  %v2673_v35 = vmax.f32 %v2214_v0, 0.0 }
  0x4f   : > { %1886 = vmatprep.mubr.msk.bf16.mxu1 %vm609_vm1, %v822_v11  ;;  %v808_v21 = vsel %vm787_vm3, %v806_v17, %v807_v25  ;;  %v811_v28 = vsel %vm787_vm3, %v809_v32, %v810_v44  ;;  %v2674_v36 = vmax.f32 %v2221_v7, 0.0  ;;  %v1457_v56 = vsel %vm622_vm0, %v1795_v15, 0 }
  0x50   : > { %v823_v50 = vpack.c.bf16 %v811_v28, %v808_v21  ;;  %v1581_v63 = vsel %vm622_vm0, %v1579_v23, 0  ;;  %v2675_v31 = vmax.f32 %v2427_v58, 0.0  ;;  %v2676_v41 = vmax.f32 %v2435_v5, 0.0  ;;  %v1800_v5 = vld [vmem:[%s2663_s4] ss:$0 sm:$0xff] }
  0x51   : > { %v1340_v53 = vpack.c.bf16 %v2674_v36, %v2673_v35  ;;  %v2677_v0 = vmax.f32 %v2231_v10, 0.0  ;;  %v1438_v7 = vpack.c.bf16 %v2507_v24, %v2493_v52  ;;  %v1439_v33 = vpack.c.bf16 %v802_v8, %v2512_v29 }
  0x52   : > { %v917_v55 = vpack.c.bf16 %v2676_v41, %v2675_v31  ;;  %v1440_v43 = vpack.c.bf16 %v808_v21, %v805_v20  ;;  %v1434_v10 = vrot.slane %v2052_v22, 1 }
  0x53   : > { %1887 = vmatmul.mubr.msk.bf16.gmra.mrb[4].mxu1 %vm609_vm1, %v823_v50  ;;  %v1341_v2 = vpack.c.bf16 %v2052_v22, %v2677_v0 }
  0x54   : > { %1927 = vmatmul.mubr.msk.bf16.gmra.mrb[4].mxu0 %vm609_vm1, %v1247_v45  ;;  %1892 = vmatprep.mubr.msk.bf16.mxu1 %vm609_vm1, %v914_v34  ;;  %v1441_v48 = vpack.c.bf16 %v1434_v10, %v811_v28 }
  0x55   : > { %1932 = vmatprep.mubr.msk.bf16.mxu0 %vm609_vm1, %v1338_v54 }
  0x5b   : > { %1893 = vmatmul.mubr.msk.bf16.vlgmr.msra.gmra.mrb[0].mxu1 %vm609_vm1, %v915_v47 }
  0x5c   : > { %1933 = vmatmul.mubr.msk.bf16.vlgmr.msra.gmra.mrb[0].mxu0 %vm609_vm1, %v1339_v26  ;;  %1896 = vmatprep.mubr.msk.bf16.mxu1 %vm609_vm1, %v916_v27 }
  0x5d   : > { %1941 = vmatpush3.bf16.msra.mxu0 %v1457_v56  ;;  %1936 = vmatprep.mubr.msk.bf16.mxu0 %vm609_vm1, %v1340_v53 }
  0x5e   : > { %1951 = vmatpush3.bf16.msra.mxu1 %v1581_v63 }
  0x63   : > { %1897 = vmatmul.mubr.msk.bf16.gmra.mrb[4].mxu1 %vm609_vm1, %v917_v55 }
  0x64   : > { %1937 = vmatmul.mubr.msk.bf16.gmra.mrb[4].mxu0 %vm609_vm1, %v1341_v2  ;;  %1952 = vmatprep.mubr.msk.bf16.mxu1 %vm609_vm1, %v2293_v62 }
  0x65   : > { %1942 = vmatprep.mubr.msk.bf16.mxu0 %vm609_vm1, %v1438_v7 }
  0x6b   : > { %1953 = vmatmul.mubr.msk.bf16.vlgmr.msra.gmra.mrb[8].mxu1 %vm609_vm1, %v2331_v39 }
  0x6c   : > { %1943 = vmatmul.mubr.msk.bf16.vlgmr.msra.gmra.mrb[0].mxu0 %vm609_vm1, %v1439_v33  ;;  %1956 = vmatprep.mubr.msk.bf16.mxu1 %vm609_vm1, %v2383_v38 }
  0x6d   : > { %1946 = vmatprep.mubr.msk.bf16.mxu0 %vm609_vm1, %v1440_v43 }
  0x73   : > { %1957 = vmatmul.mubr.msk.bf16.gmra.mrb[12].mxu1 %vm609_vm1, %v2440_v14 }
  0x74   : > { %1947 = vmatmul.mubr.msk.bf16.gmra.mrb[4].mxu0 %vm609_vm1, %v1441_v48 }
 0x12e   : > { %v1894_v62 = vpop.f32.mrb[0].mxu1 }
 0x12f   : > { %v969_v59 = vpop.f32.mrb[1].mxu1 }
 0x130   : > { %v1895_v30 = vpop.f32.mrb[2].mxu1 }
 0x131   : > { %v972_v42 = vpop.f32.mrb[3].mxu1 }
 0x136   : > { %v1898_v39 = vpop.f32.mrb[4].mxu1 }
 0x137   : > { %v985_v46 = vpop.f32.mrb[5].mxu1 }
 0x138   : > { %v1899_v60 = vpop.f32.mrb[6].mxu1 }
 0x139   : > { %v988_v49 = vpop.f32.mrb[7].mxu1 }
 0x13e   : > { %v1954_v38 = vpop.f32.mrb[8].mxu1 }
 0x13f   : > { %v1944_v58 = vpop.f32.mrb[0].mxu0  ;;  %1650 = vst.msk [vmem:[%s2611_s18 + $0x10] sm:$0xff] %vm1570_vm4, %v1954_v38  ;;  %v1617_v14 = vpop.f32.mrb[9].mxu1 }
 0x140   : > { %v1960_v52 = vadd.f32 %v1944_v58, %v1894_v62  ;;  %v1493_v24 = vpop.f32.mrb[1].mxu0  ;;  %1648 = vst.msk [vmem:[%s2611_s18] sm:$0xff] %vm1570_vm4, %v1617_v14  ;;  %v1955_v51 = vpop.f32.mrb[10].mxu1 }
 0x141   : > { %v1961_v29 = vadd.f32 %v1493_v24, %v969_v59  ;;  %v1945_v4 = vpop.f32.mrb[2].mxu0  ;;  %1651 = vst.msk [vmem:[%s2611_s18 + $0x18] sm:$0xff] %vm1570_vm4, %v1955_v51  ;;  %v1620_v3 = vpop.f32.mrb[11].mxu1 }
 0x142   : > { %v1541_v6 = vmul.f32 %v1960_v52, %v1800_v5  ;;  %v1962_v9 = vadd.f32 %v1945_v4, %v1895_v30  ;;  %v1496_v18 = vpop.f32.mrb[3].mxu0  ;;  %1649 = vst.msk [vmem:[%s2611_s18 + $0x8] sm:$0xff] %vm1570_vm4, %v1620_v3 }
 0x143   : > { %v1539_v19 = vmul.f32 %v1961_v29, %v1800_v5  ;;  %v1963_v61 = vadd.f32 %v1496_v18, %v972_v42 }
 0x144   : > { %v1556_v12 = vadd.f32 %v1801_v1, %v1541_v6  ;;  %v1542_v13 = vmul.f32 %v1962_v9, %v1800_v5 }
 0x145   : > { %v1554_v40 = vadd.f32 %v1801_v1, %v1539_v19  ;;  %v1540_v16 = vmul.f32 %v1963_v61, %v1800_v5 }
 0x146   : > { %v1564_v8 = vmax.f32 %v1556_v12, 0.0  ;;  %v1557_v17 = vadd.f32 %v1801_v1, %v1542_v13  ;;  %v1958_v32 = vpop.f32.mrb[12].mxu1 }
 0x147   : > { %v1562_v15 = vmax.f32 %v1554_v40, 0.0  ;;  %v1555_v23 = vadd.f32 %v1801_v1, %v1540_v16  ;;  %v1948_v20 = vpop.f32.mrb[4].mxu0  ;;  %1654 = vst.msk [vmem:[%s2611_s18 + $0x30] sm:$0xff] %vm1570_vm4, %v1958_v32  ;;  %v1633_v57 = vpop.f32.mrb[13].mxu1 }
 0x148   : > { %1573 = vst.msk [vmem:[%s2630_s24 + $0x10] sm:$0xff] %vm1570_vm4, %v1564_v8  ;;  %v1565_v37 = vmax.f32 %v1557_v17, 0.0  ;;  %v1964_v11 = vadd.f32 %v1948_v20, %v1898_v39  ;;  %v1509_v25 = vpop.f32.mrb[5].mxu0  ;;  %1652 = vst.msk [vmem:[%s2611_s18 + $0x20] sm:$0xff] %vm1570_vm4, %v1633_v57  ;;  %v1959_v44 = vpop.f32.mrb[14].mxu1 }
 0x149   : > { %1571 = vst.msk [vmem:[%s2630_s24] sm:$0xff] %vm1570_vm4, %v1562_v15  ;;  %v1563_v21 = vmax.f32 %v1555_v23, 0.0  ;;  %v1965_v28 = vadd.f32 %v1509_v25, %v985_v46  ;;  %v1949_v50 = vpop.f32.mrb[6].mxu0  ;;  %1655 = vst.msk [vmem:[%s2611_s18 + $0x38] sm:$0xff] %vm1570_vm4, %v1959_v44  ;;  %v1636_v22 = vpop.f32.mrb[15].mxu1 }
 0x14a   : > { %1574 = vst.msk [vmem:[%s2630_s24 + $0x18] sm:$0xff] %vm1570_vm4, %v1565_v37  ;;  %v1545_v45 = vmul.f32 %v1964_v11, %v1800_v5  ;;  %v1966_v34 = vadd.f32 %v1949_v50, %v1899_v60  ;;  %v1512_v54 = vpop.f32.mrb[7].mxu0  ;;  %1653 = vst.msk [vmem:[%s2611_s18 + $0x28] sm:$0xff] %vm1570_vm4, %v1636_v22 }
 0x14b   : > { %1572 = vst.msk [vmem:[%s2630_s24 + $0x8] sm:$0xff] %vm1570_vm4, %v1563_v21  ;;  %v1543_v47 = vmul.f32 %v1965_v28, %v1800_v5  ;;  %v1967_v26 = vadd.f32 %v1512_v54, %v988_v49 }
 0x14c   : > { %v1560_v27 = vadd.f32 %v1801_v1, %v1545_v45  ;;  %v1546_v35 = vmul.f32 %v1966_v34, %v1800_v5 }
 0x14d   : > { %v1558_v36 = vadd.f32 %v1801_v1, %v1543_v47  ;;  %v1544_v53 = vmul.f32 %v1967_v26, %v1800_v5 }
 0x14e   : > { %v1568_v56 = vmax.f32 %v1560_v27, 0.0  ;;  %v1561_v63 = vadd.f32 %v1801_v1, %v1546_v35 }
 0x14f   : > { %v1566_v31 = vmax.f32 %v1558_v36, 0.0  ;;  %v1559_v41 = vadd.f32 %v1801_v1, %v1544_v53 }
 0x150   : > { %1577 = vst.msk [vmem:[%s2630_s24 + $0x30] sm:$0xff] %vm1570_vm4, %v1568_v56  ;;  %v1569_v55 = vmax.f32 %v1561_v63, 0.0 }
 0x151   : > { %1575 = vst.msk [vmem:[%s2630_s24 + $0x20] sm:$0xff] %vm1570_vm4, %v1566_v31  ;;  %v1567_v0 = vmax.f32 %v1559_v41, 0.0 }
 0x152   : > { %1578 = vst.msk [vmem:[%s2630_s24 + $0x38] sm:$0xff] %vm1570_vm4, %v1569_v55 }
 0x153   : > { %1576 = vst.msk [vmem:[%s2630_s24 + $0x28] sm:$0xff] %vm1570_vm4, %v1567_v0 }
 0x154 PF: > { %s19_s27 = sadd.s32 1, %s2050_s27  }
 0x155   : > { %p16_p4 = scmp.ge.s32.totalorder %s19_s27, 4  }
 0x157   :  { %18 = sbr.rel (!%p16_p4) target bundleno = 1 (0x1), region = 98 }

// kernel: _lambda_.11
= control target key start
LH: loop header
LB: loop body
LE: loop exit
PB: predicated region body
PF: predicated region fallthrough
CT: control target
= control target key end

     0   :  { %12 = vsyncpa [#allocation3], 0  ;;  %s2327_s0 = inlined_call_operand.vmem [shape: f32[2,10,10,8], index: 0, kind: input, shape index: {}]   ;;  %s2328_s1 = inlined_call_operand.vmem [shape: bf16[9,8,8], index: 1, kind: input, shape index: {}]   ;;  %s2329_s2 = inlined_call_operand.vmem [shape: f32[2,64,8], index: 2, kind: input, shape index: {}]   ;;  %s2330_s3 = inlined_call_operand.vmem [shape: f32[2,64,8], index: 3, kind: input, shape index: {}]   ;;  %s2331_s4 = inlined_call_operand.vmem [shape: f32[2,64,8], index: 4, kind: input, shape index: {}]   ;;  %s2332_s5 = inlined_call_operand.vmem [shape: f32[2,64,8], index: 5, kind: output, shape index: {0}]   ;;  %s2333_s6 = inlined_call_operand.hbm [shape: f32[2,64,8], index: 6, kind: output, shape index: {1}]  }
   0x1   :  { %14 = vsyncpa [#allocation3 + $0x1], 0  ;;  %s1897_s21 = smov 0   ;;  %s1899_s22 = smov 0  }
   0x2   :  { %s1901_s23 = smov 0   ;;  %s1903_s24 = smov 0  }
   0x3 LB: > { %s1918_s25 = sadd.s32 4294967295, %s1857_s24   ;;  %s1474_s26 = sadd.s32 4294967294, %s1857_s24   ;;  %s1857_s24 = sphi %s1903_s24, %s2339_s24   ;;  %s1853_s23 = sphi %s1901_s23, %s2338_s23   ;;  %s1849_s22 = sphi %s1899_s22, %s2337_s22   ;;  %s1845_s21 = sphi %s1897_s21, %s2336_s21  }
   0x4   : > { %s1922_s27 = sadd.s32 1, %s1857_s24   ;;  %s178_s28 = sadd.s32 1, %s1853_s23 }
   0x5   : > { %s175_s29 = ssub.s32 %s1857_s24, %s1922_s27  ;;  %p188_p0 = scmp.ne.s32.totalorder %s1853_s23, %s1849_s22 }
   0x6   : > { %p176_p1 = scmp.eq.s32.totalorder %s175_s29, 0  ;;  %p189_p2 = scmp.eq.s32.totalorder %s1918_s25, 1 }
   0x7   : > { %p194_p3 = scmp.ne.s32.totalorder %s1849_s22, %s1845_s21  ;;  %p195_p4 = scmp.eq.s32.totalorder %s1474_s26, 1 }
   0x8   : > { %s1933_s30 = scalar_select %p176_p1, %s1853_s23, %s178_s28  }
   0x9   : > { %p1935_p5 = por %p189_p2, %p188_p0  ;;  %p1939_p6 = por %p195_p4, %p194_p3 }
   0xa   : > { %p1477_p7 = scmp.ge.s32.totalorder %s1857_s24, 1  ;;  %p248_p8 = scmp.lt.s32.totalorder %s1857_s24, 3 }
   0xc   : > { %p249_p9 = pnand %p1477_p7, %p248_p8 }
   0xd   : > { %v1488_v0 = vld [vmem:[%s2328_s1 + $0x4] sm:$0xf] (!%p249_p9)  ;;  %vm417_vm0 = vcmask (!%p249_p9), 1043456   ;;  %v1951_v1 = vld [vmem:[%s2328_s1 + $0x10] sm:$0xf] (!%p249_p9)  ;;  %p298_p10 = scmp.lt.s32.totalorder (!%p249_p9), %s1918_s25, 1 }
   0xe   : > { %252 = sbr.rel (%p249_p9) target bundleno = 342 (0x156), region = 40  ;;  %1743 = vmatprep.subr.msk.bf16.mxu1 (!%p249_p9), %vm417_vm0, %v1488_v0  ;;  %1747 = vmatprep.subr.msk.bf16.mxu0 (!%p249_p9), %vm417_vm0, %v1951_v1  ;;  %v419_v2 = vsel (!%p249_p9), %vm417_vm0, %v1488_v0, 0  ;;  %v1960_v3 = vsel (!%p249_p9), %vm417_vm0, %v1951_v1, 0  ;;  %v348_v4 = vld [vmem:[%s2328_s1] sm:$0xf] (!%p249_p9)  ;;  %vm365_vm1 = vcmask (!%p249_p9), 1046528  }
   0xf   : > { %1588 = vmatpush3.bf16.msra.mxu1 (!%p249_p9), %v419_v2  ;;  %1628 = vmatpush3.bf16.msra.mxu0 (!%p249_p9), %v1960_v3  ;;  %v1512_v5 = vld [vmem:[%s2328_s1 + $0x14] sm:$0xf] (!%p249_p9)  ;;  %vm404_vm2 = vcmask (!%p249_p9), 64512   ;;  %v499_v13 = vsel (!%p249_p9), %vm417_vm0, %v348_v4, 0  ;;  %vm566_vm3 = vcmask (!%p249_p9), 1045504  }
  0x10   : > { %1744 = vmatprep.subr.msk.bf16.mxu1 (!%p249_p9), %vm417_vm0, %v348_v4  ;;  %1749 = vmatprep.subr.msk.bf16.mxu0 (!%p249_p9), %vm417_vm0, %v1512_v5  ;;  %v910_v17 = vsel (!%p249_p9), %vm417_vm0, %v1512_v5, 0  ;;  %v1517_v54 = vld [vmem:[%s2328_s1 + $0x18] sm:$0xf] (!%p249_p9)  ;;  %v1497_v59 = vld [vmem:[%s2328_s1 + $0x8] sm:$0xf] (!%p249_p9) }
  0x15   : > { %s1967_s15 = scalar_select %p298_p10, %s1918_s25, 1 }
  0x17   : > { %s1753_s18 = smul.u32 160, %s1967_s15  ;;  %s2189_s19 = sshll.u32 %s1967_s15, 6 }
  0x18   : > { %s2197_s29 = scalar_lea.vmem %s2330_s3, %s2189_s19  ;;  %s2203_s11 = scalar_lea.vmem %s2329_s2, %s2189_s19 }
  0x19   : > { %s1978_s26 = scalar_lea.vmem %s2327_s0, %s1753_s18  ;;  %s295_s18 = sand.u32 1, %s1849_s22  }
  0x1a   : > { %v1981_v6 = vld [vmem:[%s1978_s26] sm:$0xff]  ;;  %v1984_v7 = vld [vmem:[%s1978_s26 + $0x8] sm:$0x3]  ;;  %v1987_v8 = vld [vmem:[%s1978_s26 + $0x10] sm:$0xff]  ;;  %s1478_s20 = sshll.u32 %s295_s18, 6  ;;  %s2209_s13 = scalar_lea.vmem %s2331_s4, %s2189_s19 }
  0x1b   : > { %v1990_v9 = vld [vmem:[%s1978_s26 + $0x18] sm:$0x3]  ;;  %v366_v10 = vrot.slane %v1981_v6, 1  ;;  %v367_v11 = vrot.slane %v1984_v7, 1  ;;  %v369_v12 = vrot.slane %v1987_v8, 1  ;;  %v1998_v15 = vld [vmem:[%s1978_s26 + $0x20] sm:$0xff] }
  0x1c   : > { %v370_v14 = vrot.slane %v1990_v9, 1  ;;  %v329_v16 = vld [vmem:[%s1978_s26 + $0x28] sm:$0x3]  ;;  %v2004_v19 = vld [vmem:[%s1978_s26 + $0x30] sm:$0xff]  ;;  %v2007_v20 = vld [vmem:[%s1978_s26 + $0x38] sm:$0x3] }
  0x1d   : > { %v368_v18 = vsel %vm365_vm1, %v366_v10, %v367_v11  ;;  %v2010_v21 = vld [vmem:[%s1978_s26 + $0x40] sm:$0xff]  ;;  %v372_v22 = vrot.slane %v1998_v15, 1  ;;  %v373_v23 = vrot.slane %v329_v16, 1  ;;  %v333_v25 = vld [vmem:[%s1978_s26 + $0x48] sm:$0x3]  ;;  %v375_v26 = vrot.slane %v2004_v19, 1 }
  0x1e   : > { %v371_v24 = vsel %vm365_vm1, %v369_v12, %v370_v14  ;;  %v376_v27 = vrot.slane %v2007_v20, 1  ;;  %v2018_v28 = vld [vmem:[%s1978_s26 + $0x50] sm:$0xff]  ;;  %v2021_v29 = vld [vmem:[%s1978_s26 + $0x60] sm:$0xff]  ;;  %v378_v32 = vrot.slane %v2010_v21, 1  ;;  %v379_v33 = vrot.slane %v333_v25, 1  ;;  %s2216_s14 = scalar_lea.vmem [#allocation2], %s1478_s20  ;;  %s2237_s20 = scalar_lea.vmem %s2332_s5, %s2189_s19 }
  0x1f   : > { %v398_v30 = vpack.c.bf16 %v371_v24, %v368_v18  ;;  %v374_v31 = vsel %vm365_vm1, %v372_v22, %v373_v23  ;;  %v335_v34 = vld [vmem:[%s1978_s26 + $0x58] sm:$0x3]  ;;  %v337_v35 = vld [vmem:[%s1978_s26 + $0x68] sm:$0x3]  ;;  %v571_v36 = vrot.slane %v1990_v9, 2  ;;  %v574_v38 = vrot.slane %v329_v16, 2 }
  0x20   : > { %v377_v37 = vsel %vm365_vm1, %v375_v26, %v376_v27  ;;  %v577_v39 = vrot.slane %v2007_v20, 2  ;;  %v2031_v40 = vld [vmem:[%s1978_s26 + $0x70] sm:$0xff]  ;;  %v2034_v41 = vld [vmem:[%s1978_s26 + $0x78] sm:$0x3]  ;;  %v380_v42 = vsel %vm365_vm1, %v378_v32, %v379_v33  ;;  %v580_v44 = vrot.slane %v333_v25, 2  ;;  %v2090_v18 = vld [vmem:[%s1978_s26 + $0x80] sm:$0xff] }
  0x21   : > { %1589 = vmatprep.mubr.msk.bf16.mxu1 %vm404_vm2, %v398_v30  ;;  %v2038_v43 = vpack.c.bf16 %v377_v37, %v374_v31  ;;  %v793_v45 = vpack.c.bf16 %v374_v31, %v371_v24  ;;  %v794_v46 = vpack.c.bf16 %v380_v42, %v377_v37  ;;  %v381_v47 = vrot.slane %v2018_v28, 1  ;;  %v2093_v20 = vld [vmem:[%s1978_s26 + $0x88] sm:$0x3]  ;;  %v1522_v32 = vld [vmem:[%s2328_s1 + $0x1c] sm:$0xf]  ;;  %s1351_s28 = sshll.u32 %s2216_s14, 4  ;;  %s2258_s28 = int_to_ptr.vmem [resolvable:$true] %s1351_s28 }
  0x22   : > { %v382_v48 = vrot.slane %v335_v34, 1  ;;  %v384_v49 = vrot.slane %v2021_v29, 1  ;;  %v385_v50 = vrot.slane %v337_v35, 1  ;;  %v387_v51 = vrot.slane %v2031_v40, 1  ;;  %s1795_s10 = scalar_lea.vmem %s2258_s28, 1024 }
  0x23   : > { %1629 = vmatprep.mubr.msk.bf16.mxu0 %vm404_vm2, %v793_v45  ;;  %1590 = vmatmul.mubr.msk.bf16.vlgmr.msra.gmra.mrb[0].mxu1 %vm404_vm2, %v2038_v43  ;;  %v388_v52 = vrot.slane %v2034_v41, 1  ;;  %v570_v53 = vrot.slane %v1987_v8, 2  ;;  %v573_v56 = vrot.slane %v1998_v15, 2  ;;  %v576_v57 = vrot.slane %v2004_v19, 2  ;;  %p1796_p11 = scmp.ne.s32.totalorder %s2258_s28, %s1795_s10 }
  0x24   : > { %1598 = vmatpush3.bf16.msra.mxu1 %v499_v13  ;;  %1630 = vmatmul.mubr.msk.bf16.vlgmr.msra.gmra.mrb[0].mxu0 %vm404_vm2, %v794_v46  ;;  %v2053_v55 = vsel %vm365_vm1, %v381_v47, %v382_v48  ;;  %v579_v58 = vrot.slane %v2010_v21, 2  ;;  %v2065_v61 = vsel %vm365_vm1, %v384_v49, %v385_v50  ;;  %v582_v5 = vrot.slane %v2018_v28, 2  ;;  %v1527_v46 = vld [vmem:[%s2328_s1 + $0x20] sm:$0xf]  ;;  %v342_v49 = vld [vmem:[%s1978_s26 + $0x90] sm:$0xff] }
  0x25   : > { %1638 = vmatpush3.bf16.msra.mxu0 %v910_v17  ;;  %v2062_v60 = vpack.c.bf16 %v2053_v55, %v380_v42  ;;  %v2068_v62 = vsel %vm365_vm1, %v387_v51, %v388_v52  ;;  %v572_v63 = vsel %vm566_vm3, %v570_v53, %v571_v36  ;;  %v575_v0 = vsel %vm566_vm3, %v573_v56, %v574_v38  ;;  %v343_v53 = vld [vmem:[%s1978_s26 + $0x98] sm:$0x3]  ;;  %s1541_s26 = sshll.u32 %s1918_s25, 10  ;;  %p1797_p12 = pnand %p1796_p11, %p1935_p5 }
  0x26   : > { %1750 = vmatprep.subr.msk.bf16.mxu0 %vm417_vm0, %v1517_v54  ;;  %v2077_v2 = vpack.c.bf16 %v2068_v62, %v2065_v61  ;;  %v891_v4 = vpack.c.bf16 %v575_v0, %v572_v63  ;;  %1745 = vmatprep.subr.msk.bf16.mxu1 %vm417_vm0, %v1497_v59  ;;  %v344_v9 = vpack.c.bf16 %v1987_v8, %v1981_v6  ;;  %v583_v10 = vrot.slane %v335_v34, 2  ;;  %s2256_s9 = scalar_lea.hbm %s2333_s6, %s1541_s26 }
  0x27   : > { %1593 = vmatprep.mubr.msk.bf16.mxu1 %vm404_vm2, %v2062_v60  ;;  %v585_v11 = vrot.slane %v2021_v29, 2  ;;  %v586_v12 = vrot.slane %v337_v35, 2  ;;  %v578_v13 = vsel %vm566_vm3, %v576_v57, %v577_v39  ;;  %v581_v14 = vsel %vm566_vm3, %v579_v58, %v580_v44  ;;  %v1502_v39 = vld [vmem:[%s2328_s1 + $0xc] sm:$0xf]  ;;  %p1798_p13 = pneg %p1797_p12 }
  0x28   : > { %1639 = vmatprep.mubr.msk.bf16.mxu0 %vm404_vm2, %v891_v4  ;;  %v584_v16 = vsel %vm566_vm3, %v582_v5, %v583_v10  ;;  %v892_v22 = vpack.c.bf16 %v581_v14, %v578_v13  ;;  %v588_v23 = vrot.slane %v2031_v40, 2  ;;  %v589_v25 = vrot.slane %v2034_v41, 2  ;;  %v1267_v4 = vld [vmem:[%s2197_s29 + $0x10] sm:$0xff]  ;;  %v1265_v10 = vld [vmem:[%s2197_s29] sm:$0xff] }
  0x29   : > { %v587_v17 = vsel %vm566_vm3, %v585_v11, %v586_v12  ;;  %v887_v26 = vrot.slane %v2090_v18, 2  ;;  %v888_v27 = vrot.slane %v2093_v20, 2  ;;  %v992_v30 = vsel %vm417_vm0, %v1517_v54, 0  ;;  %v1243_v11 = vld [vmem:[%s2203_s11 + $0x10] sm:$0xff] }
  0x2a   : > { %v893_v24 = vpack.c.bf16 %v587_v17, %v584_v16  ;;  %v345_v31 = vpack.c.bf16 %v2004_v19, %v1998_v15  ;;  %v618_v33 = vsel %vm417_vm0, %v1497_v59, 0  ;;  %v346_v34 = vpack.c.bf16 %v2018_v28, %v2010_v21  ;;  %v1291_v12 = vld [vmem:[%s2209_s13 + $0x10] sm:$0xff] }
  0x2b   : > { %1594 = vmatmul.mubr.msk.bf16.gmra.mrb[4].mxu1 %vm404_vm2, %v2077_v2  ;;  %v567_v35 = vrot.slane %v1981_v6, 2  ;;  %v568_v36 = vrot.slane %v1984_v7, 2  ;;  %v590_v37 = vsel %vm566_vm3, %v588_v23, %v589_v25  ;;  %v2117_v38 = vsel %vm566_vm3, %v887_v26, %v888_v27  ;;  %v1266_v25 = vld [vmem:[%s2197_s29 + $0x8] sm:$0xff] }
  0x2c   : > { %1599 = vmatprep.mubr.msk.bf16.mxu1 %vm404_vm2, %v344_v9  ;;  %v894_v6 = vpack.c.bf16 %v2117_v38, %v590_v37  ;;  %v347_v41 = vpack.c.bf16 %v2031_v40, %v2021_v29  ;;  %v1080_v44 = vsel %vm417_vm0, %v1522_v32, 0  ;;  %v600_v45 = vpack.c.bf16 %v578_v13, %v575_v0 }
  0x2d   : > { %v569_v7 = vsel %vm566_vm3, %v567_v35, %v568_v36  ;;  %v601_v47 = vpack.c.bf16 %v584_v16, %v581_v14  ;;  %v712_v48 = vsel %vm417_vm0, %v1502_v39, 0  ;;  %v985_v50 = vpack.c.bf16 %v342_v49, %v2090_v18  ;;  %v1268_v16 = vld [vmem:[%s2197_s29 + $0x18] sm:$0xff] }
  0x2e   : > { %v599_v42 = vpack.c.bf16 %v572_v63, %v569_v7  ;;  %v602_v51 = vpack.c.bf16 %v590_v37, %v587_v17  ;;  %v693_v52 = vpack.c.bf16 %v1998_v15, %v1987_v8  ;;  %v1069_v54 = vrot.slane %v342_v49, 1  ;;  %v1242_v37 = vld [vmem:[%s2203_s11 + $0x8] sm:$0xff] }
  0x2f   : > { %v789_v56 = vrot.slane %v2090_v18, 1  ;;  %v790_v57 = vrot.slane %v2093_v20, 1  ;;  %v1166_v58 = vsel %vm417_vm0, %v1527_v46, 0  ;;  %v694_v59 = vpack.c.bf16 %v2010_v21, %v2004_v19  ;;  %v1241_v20 = vld [vmem:[%s2203_s11] sm:$0xff] }
  0x30   : > { %1640 = vmatmul.mubr.msk.bf16.vlgmr.msra.gmra.mrb[0].mxu0 %vm404_vm2, %v892_v22  ;;  %v695_v8 = vpack.c.bf16 %v2021_v29, %v2018_v28  ;;  %v696_v19 = vpack.c.bf16 %v2090_v18, %v2031_v40  ;;  %v795_v21 = vpack.c.bf16 %v2065_v61, %v2053_v55  ;;  %v1156_v28 = vrot.slane %v343_v53, 2  ;;  %v1289_v22 = vld [vmem:[%s2209_s13] sm:$0xff] }
  0x31   : > { %1648 = vmatpush3.bf16.msra.mxu0 %v992_v30  ;;  %1643 = vmatprep.mubr.msk.bf16.mxu0 %vm404_vm2, %v893_v24  ;;  %v791_v15 = vsel %vm365_vm1, %v789_v56, %v790_v57  ;;  %v1275_v18 = vmul.f32 0.0, %v1267_v4  ;;  %v1273_v27 = vmul.f32 0.0, %v1265_v10  ;;  %v1244_v30 = vld [vmem:[%s2203_s11 + $0x18] sm:$0xff]  ;;  %v1276_v36 = vmul.f32 0.0, %v1268_v16 }
  0x32   : > { %1751 = vmatprep.subr.msk.bf16.mxu0 %vm417_vm0, %v1522_v32  ;;  %v796_v40 = vpack.c.bf16 %v791_v15, %v2068_v62  ;;  %v1296_v10 = vld [vmem:[%s2209_s13 + $0x38] sm:$0xff] }
  0x33   : > { %1600 = vmatmul.mubr.msk.bf16.vlgmr.msra.gmra.mrb[0].mxu1 %vm404_vm2, %v345_v31 }
  0x34   : > { %1608 = vmatpush3.bf16.msra.mxu1 %v618_v33  ;;  %1603 = vmatprep.mubr.msk.bf16.mxu1 %vm404_vm2, %v346_v34 }
  0x35   : > { %1746 = vmatprep.subr.msk.bf16.mxu1 %vm417_vm0, %v1502_v39 }
  0x38   : > { %1644 = vmatmul.mubr.msk.bf16.gmra.mrb[4].mxu0 %vm404_vm2, %v894_v6  ;;  %v1297_v6 = vmul.f32 0.0, %v1289_v22 }
  0x39   : > { %1649 = vmatprep.mubr.msk.bf16.mxu0 %vm404_vm2, %v345_v31  ;;  %v1292_v31 = vld [vmem:[%s2209_s13 + $0x18] sm:$0xff] }
  0x3b   : > { %1604 = vmatmul.mubr.msk.bf16.gmra.mrb[4].mxu1 %vm404_vm2, %v347_v41 }
  0x3c   : > { %1609 = vmatprep.mubr.msk.bf16.mxu1 %vm404_vm2, %v599_v42 }
  0x40   : > { %1650 = vmatmul.mubr.msk.bf16.vlgmr.msra.gmra.mrb[0].mxu0 %vm404_vm2, %v346_v34  ;;  %v1299_v34 = vmul.f32 0.0, %v1291_v12 }
  0x41   : > { %1658 = vmatpush3.bf16.msra.mxu0 %v1080_v44  ;;  %1653 = vmatprep.mubr.msk.bf16.mxu0 %vm404_vm2, %v347_v41  ;;  %v1274_v41 = vmul.f32 0.0, %v1266_v25 }
  0x42   : > { %1752 = vmatprep.subr.msk.bf16.mxu0 %vm417_vm0, %v1527_v46 }
  0x43   : > { %1610 = vmatmul.mubr.msk.bf16.vlgmr.msra.gmra.mrb[0].mxu1 %vm404_vm2, %v600_v45 }
  0x44   : > { %1618 = vmatpush3.bf16.msra.mxu1 %v712_v48  ;;  %1613 = vmatprep.mubr.msk.bf16.mxu1 %vm404_vm2, %v601_v47 }
  0x45   : > { %1748 = vmatprep.subr.msk.bf16.mxu1 %vm417_vm0, %v1951_v1  ;;  %v1070_v1 = vrot.slane %v343_v53, 1 }
  0x48   : > { %1654 = vmatmul.mubr.msk.bf16.gmra.mrb[4].mxu0 %vm404_vm2, %v985_v50 }
  0x49   : > { %1659 = vmatprep.mubr.msk.bf16.mxu0 %vm404_vm2, %v2038_v43  ;;  %v1071_v43 = vsel %vm365_vm1, %v1069_v54, %v1070_v1  ;;  %v1269_v1 = vld [vmem:[%s2197_s29 + $0x20] sm:$0xff] }
  0x4a   : > { %v1073_v63 = vpack.c.bf16 %v1071_v43, %v791_v15  ;;  %v1247_v15 = vld [vmem:[%s2203_s11 + $0x30] sm:$0xff] }
  0x4b   : > { %1614 = vmatmul.mubr.msk.bf16.gmra.mrb[4].mxu1 %vm404_vm2, %v602_v51  ;;  %v1295_v43 = vld [vmem:[%s2209_s13 + $0x30] sm:$0xff] }
  0x4c   : > { %1619 = vmatprep.mubr.msk.bf16.mxu1 %vm404_vm2, %v693_v52 }
  0x50   : > { %1660 = vmatmul.mubr.msk.bf16.vlgmr.msra.gmra.mrb[0].mxu0 %vm404_vm2, %v2062_v60 }
  0x51   : > { %1668 = vmatpush3.bf16.msra.mxu0 %v1166_v58  ;;  %1663 = vmatprep.mubr.msk.bf16.mxu0 %vm404_vm2, %v2077_v2 }
  0x53   : > { %1620 = vmatmul.mubr.msk.bf16.vlgmr.msra.gmra.mrb[0].mxu1 %vm404_vm2, %v694_v59 }
  0x54   : > { %1678 = vmatpush3.bf16.msra.mxu1 %v1960_v3  ;;  %1623 = vmatprep.mubr.msk.bf16.mxu1 %vm404_vm2, %v695_v8  ;;  %v1155_v3 = vrot.slane %v342_v49, 2 }
  0x56   : > { %v1157_v29 = vsel %vm566_vm3, %v1155_v3, %v1156_v28 }
  0x57   : > { %v1159_v55 = vpack.c.bf16 %v1157_v29, %v2117_v38  ;;  %v1290_v38 = vld [vmem:[%s2209_s13 + $0x8] sm:$0xff] }
  0x58   : > { %1664 = vmatmul.mubr.msk.bf16.gmra.mrb[4].mxu0 %vm404_vm2, %v1073_v63  ;;  %v1298_v49 = vmul.f32 0.0, %v1290_v38 }
  0x59   : > { %1669 = vmatprep.mubr.msk.bf16.mxu0 %vm404_vm2, %v600_v45  ;;  %v1300_v45 = vmul.f32 0.0, %v1292_v31 }
  0x5b   : > { %1624 = vmatmul.mubr.msk.bf16.gmra.mrb[4].mxu1 %vm404_vm2, %v696_v19 }
  0x5c   : > { %1633 = vmatprep.mubr.msk.bf16.mxu1 %vm404_vm2, %v795_v21  ;;  %v1272_v21 = vld [vmem:[%s2197_s29 + $0x38] sm:$0xff] }
  0x5d   : > { %v1280_v16 = vmul.f32 0.0, %v1272_v21 }
  0x60   : > { %1670 = vmatmul.mubr.msk.bf16.vlgmr.msra.gmra.mrb[0].mxu0 %vm404_vm2, %v601_v47 }
  0x61   : > { %1673 = vmatprep.mubr.msk.bf16.mxu0 %vm404_vm2, %v602_v51  ;;  %v1271_v51 = vld [vmem:[%s2197_s29 + $0x30] sm:$0xff] }
  0x67   : > { %1634 = vmatmul.mubr.msk.bf16.vlgmr.msra.gmra.mrb[4].mxu1 %vm404_vm2, %v796_v40  ;;  %v1279_v40 = vmul.f32 0.0, %v1271_v51 }
  0x68   : > { %1674 = vmatmul.mubr.msk.bf16.gmra.mrb[4].mxu0 %vm404_vm2, %v1159_v55  ;;  %v1245_v55 = vld [vmem:[%s2203_s11 + $0x20] sm:$0xff] }
 0x126   : > { %v1621_v60 = vpop.f32.mrb[0].mxu1 }
 0x127   : > { %v748_v61 = vpop.f32.mrb[1].mxu1 }
 0x128   : > { %v1622_v0 = vpop.f32.mrb[2].mxu1 }
 0x129   : > { %v751_v2 = vpop.f32.mrb[3].mxu1 }
 0x133   : > { %v1671_v62 = vpop.f32.mrb[0].mxu0 }
 0x134   : > { %v1679_v5 = vadd.f32 %v1671_v62, %v1621_v60  ;;  %v1202_v9 = vpop.f32.mrb[1].mxu0  ;;  %v1293_v60 = vld [vmem:[%s2209_s13 + $0x20] sm:$0xff] }
 0x135   : > { %v1680_v13 = vadd.f32 %v1202_v9, %v748_v61  ;;  %v1672_v14 = vpop.f32.mrb[2].mxu0  ;;  %v1248_v9 = vld [vmem:[%s2203_s11 + $0x38] sm:$0xff]  ;;  %v1301_v22 = vmul.f32 0.0, %v1293_v60 }
 0x136   : > { %v1251_v17 = vmul.f32 0.0, %v1679_v5  ;;  %1323 = vst.msk [vmem:[%s2216_s14 + $0x10] sm:$0xff] %vm404_vm2, %v1679_v5  ;;  %v1681_v23 = vadd.f32 %v1672_v14, %v1622_v0  ;;  %v1205_v24 = vpop.f32.mrb[3].mxu0  ;;  %v1277_v5 = vmul.f32 0.0, %v1269_v1 }
 0x137   : > { %v1249_v26 = vmul.f32 0.0, %v1680_v13  ;;  %1321 = vst.msk [vmem:[%s2216_s14] sm:$0xff] %vm404_vm2, %v1680_v13  ;;  %v1682_v32 = vadd.f32 %v1205_v24, %v751_v2  ;;  %v1270_v2 = vld [vmem:[%s2197_s29 + $0x28] sm:$0xff]  ;;  %v1303_v13 = vmul.f32 0.0, %v1295_v43  ;;  %s2278_s29 = scalar_lea.sflag [#allocation3], %s295_s18 }
 0x138   : > { %v1259_v33 = vsub.f32 %v1243_v11, %v1251_v17  ;;  %v1252_v35 = vmul.f32 0.0, %v1681_v23  ;;  %1324 = vst.msk [vmem:[%s2216_s14 + $0x18] sm:$0xff] %vm404_vm2, %v1681_v23  ;;  %v1246_v17 = vld [vmem:[%s2203_s11 + $0x28] sm:$0xff]  ;;  %v1278_v24 = vmul.f32 0.0, %v1270_v2  ;;  %s1859_s11 = smov [#allocation2]  }
 0x139   : > { %v1257_v39 = vsub.f32 %v1241_v20, %v1249_v26  ;;  %v1250_v7 = vmul.f32 0.0, %v1682_v32  ;;  %1322 = vst.msk [vmem:[%s2216_s14 + $0x8] sm:$0xff] %vm404_vm2, %v1682_v32  ;;  %s1799_s15 = sshll.u32 %s1859_s11, 4  ;;  %s1800_s15 = int_to_ptr.vmem [resolvable:$false] %s1799_s15 }
 0x13a   : > { %v1283_v42 = vsub.f32 %v1259_v33, %v1275_v18  ;;  %v1260_v44 = vsub.f32 %v1244_v30, %v1252_v35  ;;  %v1635_v46 = vpop.f32.mrb[4].mxu1  ;;  %v1294_v18 = vld [vmem:[%s2209_s13 + $0x28] sm:$0xff]  ;;  %s1801_s12 = scalar_lea.vmem %s1800_s15, 2048  ;;  %p1802_p0 = scmp.lt.s32.totalorder %s2258_s28, %s1800_s15 }
 0x13b   : > { %v1281_v47 = vsub.f32 %v1257_v39, %v1273_v27  ;;  %v1258_v48 = vsub.f32 %v1242_v37, %v1250_v7  ;;  %v1675_v50 = vpop.f32.mrb[4].mxu0  ;;  %v864_v52 = vpop.f32.mrb[5].mxu1  ;;  %v1304_v27 = vmul.f32 0.0, %v1296_v10  ;;  %p1803_p1 = scmp.lt.s32.totalorder %s1801_s12, %s1795_s10 }
 0x13c   : > { %v1307_v53 = vsub.f32 %v1283_v42, %v1299_v34  ;;  %v1284_v54 = vsub.f32 %v1260_v44, %v1276_v36  ;;  %v1683_v56 = vadd.f32 %v1675_v50, %v1635_v46  ;;  %v1218_v57 = vpop.f32.mrb[5].mxu0  ;;  %v1636_v58 = vpop.f32.mrb[6].mxu1 }
 0x13d   : > { %v1305_v59 = vsub.f32 %v1281_v47, %v1297_v6  ;;  %v1282_v8 = vsub.f32 %v1258_v48, %v1274_v41  ;;  %v1684_v63 = vadd.f32 %v1218_v57, %v864_v52  ;;  %v1676_v19 = vpop.f32.mrb[6].mxu0  ;;  %v867_v3 = vpop.f32.mrb[7].mxu1  ;;  %p1804_p2 = por %p1803_p1, %p1802_p0 }
 0x13e   : > { %1315 = vst.msk [vmem:[%s2237_s20 + $0x10] sm:$0xff] %vm404_vm2, %v1307_v53  ;;  %v1308_v28 = vsub.f32 %v1284_v54, %v1300_v45  ;;  %v1255_v29 = vmul.f32 0.0, %v1683_v56  ;;  %1327 = vst.msk [vmem:[%s2216_s14 + $0x30] sm:$0xff] %vm404_vm2, %v1683_v56  ;;  %v1685_v61 = vadd.f32 %v1676_v19, %v1636_v58  ;;  %v1221_v0 = vpop.f32.mrb[7].mxu0 }
 0x13f   : > { %1313 = vst.msk [vmem:[%s2237_s20] sm:$0xff] %vm404_vm2, %v1305_v59  ;;  %v1306_v62 = vsub.f32 %v1282_v8, %v1298_v49  ;;  %v1253_v4 = vmul.f32 0.0, %v1684_v63  ;;  %1325 = vst.msk [vmem:[%s2216_s14 + $0x20] sm:$0xff] %vm404_vm2, %v1684_v63  ;;  %v1686_v11 = vadd.f32 %v1221_v0, %v867_v3  ;;  %p1805_p3 = pnand %p1804_p2, %p1798_p13 }
 0x140   : > { %1316 = vst.msk [vmem:[%s2237_s20 + $0x18] sm:$0xff] %vm404_vm2, %v1308_v28  ;;  %v1263_v12 = vsub.f32 %v1247_v15, %v1255_v29  ;;  %v1256_v14 = vmul.f32 0.0, %v1685_v61  ;;  %1328 = vst.msk [vmem:[%s2216_s14 + $0x38] sm:$0xff] %vm404_vm2, %v1685_v61 }
 0x141   : > { %1314 = vst.msk [vmem:[%s2237_s20 + $0x8] sm:$0xff] %vm404_vm2, %v1306_v62  ;;  %v1261_v20 = vsub.f32 %v1245_v55, %v1253_v4  ;;  %v1254_v23 = vmul.f32 0.0, %v1686_v11  ;;  %1326 = vst.msk [vmem:[%s2216_s14 + $0x28] sm:$0xff] %vm404_vm2, %v1686_v11 }
 0x142   : > { %v1287_v25 = vsub.f32 %v1263_v12, %v1279_v40  ;;  %v1264_v26 = vsub.f32 %v1248_v9, %v1256_v14 }
 0x143   : > { %1808 = shalt.err (!%p1805_p3)
}
 0x144   : > { %s1809_s18 = scalar_lea.hbm %s2256_s9, 1024  ;;  %s1813_s16 = scalar_lea.hbm %s2333_s6, 2048 }
 0x145   : > { %p1810_p4 = scmp.ne.s32.totalorder %s2256_s9, %s1809_s18  ;;  %p1814_p9 = scmp.lt.u32.totalorder %s2256_s9, %s2333_s6 }
 0x146   : > { %p1815_p10 = scmp.lt.u32.totalorder %s1813_s16, %s1809_s18  ;;  %p1817_p12 = scmp.lt.u32.totalorder %s1809_s18, %s2256_s9 }
 0x147   : > { %p1811_p7 = pnand %p1810_p4, %p1935_p5 }
 0x148   : > { %p1816_p11 = por %p1815_p10, %p1814_p9 }
 0x149   : > { %p1812_p8 = pneg %p1811_p7 }
 0x14a   : > { %p1818_p13 = por %p1817_p12, %p1816_p11 }
 0x14c   : > { %p1819_p0 = pnand %p1818_p13, %p1812_p8 }
 0x14e   : > { %1822 = shalt.err (!%p1819_p0)
}
 0x14f   : > { %s1860_s25 = smov 128   ;;  %s1861_s19 = smov 8   ;;  %v1285_v30 = vsub.f32 %v1261_v20, %v1277_v5  ;;  %v1262_v31 = vsub.f32 %v1246_v17, %v1254_v23  ;;  %v1302_v32 = vmul.f32 0.0, %v1294_v18  ;;  %v1311_v33 = vsub.f32 %v1287_v25, %v1303_v13 }
 0x150   : > { %1754 = dma.vmem_to_hbm [thread:$0]  (%p1935_p5), %s2258_s28, 1024, %s2256_s9, %s2278_s29, %s1860_s25, %s1860_s25, %s1861_s19   ;;  %v1288_v34 = vsub.f32 %v1264_v26, %v1280_v16 }
 0x151   : > { %v1309_v35 = vsub.f32 %v1285_v30, %v1301_v22  ;;  %v1286_v36 = vsub.f32 %v1262_v31, %v1278_v24  ;;  %1319 = vst.msk [vmem:[%s2237_s20 + $0x30] sm:$0xff] %vm404_vm2, %v1311_v33 }
 0x152   : > { %v1312_v37 = vsub.f32 %v1288_v34, %v1304_v27 }
 0x153   : > { %1317 = vst.msk [vmem:[%s2237_s20 + $0x20] sm:$0xff] %vm404_vm2, %v1309_v35  ;;  %v1310_v38 = vsub.f32 %v1286_v36, %v1302_v32 }
 0x154   : > { %1320 = vst.msk [vmem:[%s2237_s20 + $0x38] sm:$0xff] %vm404_vm2, %v1312_v37 }
 0x155   : > { %1318 = vst.msk [vmem:[%s2237_s20 + $0x28] sm:$0xff] %vm404_vm2, %v1310_v38 }
 0x156 PF: > { %p1760_p5 = scmp.ge.s32.totalorder %s1857_s24, 2  ;;  %s1374_s7 = sand.u32 1, %s1845_s21  }
 0x157   : > { %s1375_s28 = scalar_lea.sflag [#allocation3], %s1374_s7 }
 0x158   : > { %p1757_p1 = pnand %p1760_p5, %p1939_p6 }
 0x15a   : > { %1840 = dma.done.wait (!%p1757_p1), %s1375_s28, 1024  }
 0x15b   : > { %1842 = vsyncadd (!%p1757_p1), %s1375_s28, 4294966272  ;;  %p17_p2 = scmp.ge.s32.totalorder %s1922_s27, 4   ;;  %s2336_s21 = smov %s1849_s22 }
 0x15c   : > { %s2337_s22 = smov %s1853_s23  ;;  %s2338_s23 = smov %s1933_s30 }
 0x15d   : > { %s2339_s24 = smov %s1922_s27  ;;  %19 = sbr.rel (!%p17_p2) target bundleno = 3 (0x3), region = 104 }
 0x164   :  { %1380 = vsyncpa [#allocation3], 1 }
 0x165   :  { %1382 = vsyncpa [#allocation3 + $0x1], 1 }

</bundles_post_ra>
